<compile_context>
chip_gen: v5e
topology: v5e:2x2
jax: 0.10.0
libtpu: 0.0.40
codegen_flags: <defaults>
</compile_context>

<pallas_src>
import functools

import jax
import jax.numpy as jnp
from jax.experimental import pallas as pl
from jax.experimental.pallas import tpu as pltpu


def _round_up(x, m):
    return ((x + m - 1) // m) * m


def _aplora_kernel(x_ref, wt_ref, b_ref, at_ref, bt_ref, o_ref, z_ref):
    """One (row-tile i, out-tile j) grid step.

    x_ref : (TM, IN)  bf16   row tile (re-fetched only when i changes)
    wt_ref: (IN, TN)  bf16   base-weight slab, streamed over j
    b_ref : (1, TN)   f32    base-bias slab
    at_ref: (IN, RP)  bf16   lora_A^T (rank zero-padded to RP), resident
    bt_ref: (RP, TN)  bf16   lora_B^T * (alpha/rank), streamed over j
    o_ref : (TM, TN)  bf16
    z_ref : (TM, RP)  bf16   scratch: x @ A^T, computed once per row tile
    """
    # LoRA down-projection is independent of the OUT tile: compute it on the
    # first j step only and reuse across the rest of the row tile.
    @pl.when(pl.program_id(1) == 0)
    def _():
        z = jnp.dot(x_ref[...], at_ref[...],
                    preferred_element_type=jnp.float32)
        z_ref[...] = z.astype(z_ref.dtype)

    # Base path (f32 MXU accumulation) + bias.
    base = jnp.dot(x_ref[...], wt_ref[...],
                   preferred_element_type=jnp.float32)
    base = base + b_ref[...]

    # LoRA up-projection; alpha/rank already folded into bt.
    # TODO(synk): dropout_p > 0.0 would need pltpu.prng_* on z; p=0.0 -> no-op.
    lora = jnp.dot(z_ref[...], bt_ref[...],
                   preferred_element_type=jnp.float32)

    o_ref[...] = (base + lora).astype(o_ref.dtype)


def prepare_aplora_params(w_base, b_base, lora_a, lora_b, *, alpha, rank,
                          rank_pad=128):
    """One-time weight massaging. Do NOT run this per forward call.

    Returns (wt [IN,OUT], bias [1,OUT] f32, at [IN,Rp], bt_scaled [Rp,OUT]).
    """
    out_f, in_f = w_base.shape
    r = lora_a.shape[0]
    rp = max(rank_pad, _round_up(r, 128))
    scaling = float(alpha) / float(rank)

    wt = jnp.transpose(w_base)                                    # [IN, OUT]
    bias = b_base.reshape(1, out_f).astype(jnp.float32)           # [1, OUT]
    at = jnp.pad(jnp.transpose(lora_a), ((0, 0), (0, rp - r)))    # [IN, Rp]
    bt = (jnp.transpose(lora_b).astype(jnp.float32) * scaling
          ).astype(lora_b.dtype)                                  # fold scale
    bt = jnp.pad(bt, ((0, rp - r), (0, 0)))                       # [Rp, OUT]
    return wt, bias, at, bt


def aplora_forward(x, wt, bias, at, bt, *, tm=256, tn=256):
    """x: [B, S, IN] bf16; weights from prepare_aplora_params."""
    B, S, IN = x.shape
    OUT = wt.shape[1]
    RP = at.shape[1]

    M = B * S
    # Row tile: as large as possible (feed the MXU with >=128 rows when M
    # allows), rounded to the bf16 sublane packing of 16; pad M to a multiple.
    tm = min(tm, _round_up(M, 16))
    m_pad = _round_up(M, tm)
    # OUT tile: lane-dense multiple of 128 that divides OUT, else full OUT.
    if OUT % tn != 0:
        tn = 128 if OUT % 128 == 0 else OUT

    x2d = x.reshape(M, IN)
    if m_pad != M:
        x2d = jnp.pad(x2d, ((0, m_pad - M), (0, 0)))

    grid = (m_pad // tm, OUT // tn)

    # VMEM budget: double-buffered pipeline blocks + resident A^T + scratch,
    # with ~25% headroom (clamped to [32 MiB, 100 MiB]).
    bpe = 2  # bf16
    per_step = (tm * IN + IN * tn + RP * tn + tm * tn) * bpe + tn * 4
    vmem_limit = int(2 * per_step * 1.25) + (2 * IN * RP + tm * RP) * bpe
    vmem_limit = min(max(vmem_limit, 32 << 20), 100 << 20)

    flops = 2 * m_pad * IN * OUT + 2 * m_pad * IN * RP + 2 * m_pad * RP * OUT
    bytes_accessed = (x2d.size + wt.size + at.size + bt.size
                      + m_pad * OUT) * bpe + bias.size * 4

    out2d = pl.pallas_call(
        _aplora_kernel,
        out_shape=jax.ShapeDtypeStruct((m_pad, OUT), x.dtype),
        grid_spec=pltpu.PrefetchScalarGridSpec(
            num_scalar_prefetch=0,
            grid=grid,
            in_specs=[
                pl.BlockSpec((tm, IN), lambda i, j: (i, 0)),   # x rows
                pl.BlockSpec((IN, tn), lambda i, j: (0, j)),   # W^T slab
                pl.BlockSpec((1, tn), lambda i, j: (0, j)),    # bias slab
                pl.BlockSpec((IN, RP), lambda i, j: (0, 0)),   # A^T (resident)
                pl.BlockSpec((RP, tn), lambda i, j: (0, j)),   # B^T * s slab
            ],
            out_specs=pl.BlockSpec((tm, tn), lambda i, j: (i, j)),
            scratch_shapes=[pltpu.VMEM((tm, RP), x.dtype)],    # z = x @ A^T
        ),
        compiler_params=pltpu.CompilerParams(
            # j carries the z_ref reuse -> must stay sequential ("arbitrary");
            # row tiles are independent -> "parallel" (megacore sharding).
            dimension_semantics=("parallel", "arbitrary"),
            vmem_limit_bytes=vmem_limit,
        ),
        cost_estimate=pl.CostEstimate(
            flops=flops, transcendentals=0, bytes_accessed=bytes_accessed),
    )(x2d, wt, bias, at, bt)

    return out2d[:M].reshape(B, S, OUT)


def aplora_reference(x, w_base, b_base, lora_a, lora_b, *, alpha, rank):
    scaling = float(alpha) / float(rank)
    xf = x.astype(jnp.float32)
    base = xf @ w_base.astype(jnp.float32).T + b_base.astype(jnp.float32)
    lora = (xf @ lora_a.astype(jnp.float32).T) @ lora_b.astype(jnp.float32).T
    return (base + lora * scaling).astype(x.dtype)


if __name__ == "__main__":
    # Small shapes consistent with the Linear-wrapper forward; M = B*S = 500
    # (not a multiple of the row tile, to exercise the padding path).
    B, S = 2, 250
    IN, OUT = 512, 512
    RANK, ALPHA = 32, 32.0
    LORA_INIT_SCALE = 0.01

    key = jax.random.PRNGKey(0)
    kx, kw, kb, ka, kb2 = jax.random.split(key, 5)

    x = (jax.random.normal(kx, (B, S, IN), dtype=jnp.float32)
         .astype(jnp.bfloat16))
    # Deterministic synthetic parameters (no checkpoint load).
    w_base = (0.02 * jax.random.normal(kw, (OUT, IN), dtype=jnp.float32)
              ).astype(jnp.bfloat16)
    b_base = (0.01 * jax.random.normal(kb, (OUT,), dtype=jnp.float32)
              ).astype(jnp.bfloat16)
    lora_a = (LORA_INIT_SCALE
              * jax.random.normal(ka, (RANK, IN), dtype=jnp.float32)
              ).astype(jnp.bfloat16)
    lora_b = (LORA_INIT_SCALE
              * jax.random.normal(kb2, (OUT, RANK), dtype=jnp.float32)
              ).astype(jnp.bfloat16)

    # One-time weight preparation (transpose + rank pad + fold alpha/rank).
    wt, bias, at, bt = prepare_aplora_params(
        w_base, b_base, lora_a, lora_b, alpha=ALPHA, rank=RANK)

    fwd = jax.jit(aplora_forward)
    out = jax.block_until_ready(fwd(x, wt, bias, at, bt))

    ref = aplora_reference(x, w_base, b_base, lora_a, lora_b,
                           alpha=ALPHA, rank=RANK)
    err = jnp.max(jnp.abs(out.astype(jnp.float32) - ref.astype(jnp.float32)))
    assert out.shape == (B, S, OUT), out.shape
    assert float(err) < 5e-2, f"mismatch vs reference: {float(err)}"

    print("KERNEL_OK")
</pallas_src>

<mosaic_0001>
module attributes {stable_mosaic.version = 11 : i64} {
  func.func @_aplora_kernel(%arg0: i32, %arg1: i32, %arg2: memref<256x512xbf16, #tpu.memory_space<vmem>>, %arg3: memref<512x256xbf16, #tpu.memory_space<vmem>>, %arg4: memref<1x256xf32, #tpu.memory_space<vmem>>, %arg5: memref<512x128xbf16, #tpu.memory_space<vmem>>, %arg6: memref<128x256xbf16, #tpu.memory_space<vmem>>, %arg7: memref<256x256xbf16, #tpu.memory_space<vmem>>, %arg8: memref<256x128xbf16, #tpu.memory_space<vmem>>) attributes {dimension_semantics = [#tpu.dimension_semantics<parallel>, #tpu.dimension_semantics<arbitrary>], iteration_bounds = array<i64: 2, 2>, scalar_prefetch = 0 : i64, scratch_operands = 1 : i64, tpu.core_type = #tpu.core_type<tc>, window_params = [{transform_indices = @transform_0, window_bounds = array<i64: 256, 512>}, {transform_indices = @transform_1, window_bounds = array<i64: 512, 256>}, {transform_indices = @transform_2, window_bounds = array<i64: 1, 256>}, {pipeline_mode = #tpu.pipeline_mode<synchronous>, transform_indices = @transform_3, window_bounds = array<i64: 512, 128>}, {transform_indices = @transform_4, window_bounds = array<i64: 128, 256>}, {transform_indices = @transform_5, window_bounds = array<i64: 256, 256>}]} {
    %c0_i32 = arith.constant 0 : i32
    %0 = arith.cmpi eq, %arg1, %c0_i32 : i32
    %1 = arith.extui %0 : i1 to i32
    %c0_i32_0 = arith.constant 0 : i32
    %2 = arith.cmpi ne, %1, %c0_i32_0 : i32
    scf.if %2 {
      %c0_13 = arith.constant 0 : index
      %c0_14 = arith.constant 0 : index
      %15 = vector.load %arg2[%c0_13, %c0_14] : memref<256x512xbf16, #tpu.memory_space<vmem>>, vector<256x512xbf16>
      %c0_15 = arith.constant 0 : index
      %c0_16 = arith.constant 0 : index
      %16 = vector.load %arg5[%c0_15, %c0_16] : memref<512x128xbf16, #tpu.memory_space<vmem>>, vector<512x128xbf16>
      %cst_17 = arith.constant dense<0.000000e+00> : vector<256x128xf32>
      %17 = tpu.matmul %15, %16, %cst_17 {dimension_numbers = #tpu.dot_dimension_numbers<[1], [0], [0], [1], [0, 0, 1, 1], [], []>} : vector<256x512xbf16>, vector<512x128xbf16>, vector<256x128xf32> -> vector<256x128xf32>
      %18 = arith.truncf %17 : vector<256x128xf32> to vector<256x128xbf16>
      %c0_18 = arith.constant 0 : index
      %c0_19 = arith.constant 0 : index
      %19 = vector.load %arg8[%c0_18, %c0_19] : memref<256x128xbf16, #tpu.memory_space<vmem>>, vector<256x128xbf16>
      tpu.vector_store %arg8[%c0_18, %c0_19], %18 {strides = array<i32>} : memref<256x128xbf16, #tpu.memory_space<vmem>>, vector<256x128xbf16>,
    } else {
    }
    %c0 = arith.constant 0 : index
    %c0_1 = arith.constant 0 : index
    %3 = vector.load %arg2[%c0, %c0_1] : memref<256x512xbf16, #tpu.memory_space<vmem>>, vector<256x512xbf16>
    %c0_2 = arith.constant 0 : index
    %c0_3 = arith.constant 0 : index
    %4 = vector.load %arg3[%c0_2, %c0_3] : memref<512x256xbf16, #tpu.memory_space<vmem>>, vector<512x256xbf16>
    %cst = arith.constant dense<0.000000e+00> : vector<256x256xf32>
    %5 = tpu.matmul %3, %4, %cst {dimension_numbers = #tpu.dot_dimension_numbers<[1], [0], [0], [1], [0, 0, 1, 1], [], []>} : vector<256x512xbf16>, vector<512x256xbf16>, vector<256x256xf32> -> vector<256x256xf32>
    %c0_4 = arith.constant 0 : index
    %c0_5 = arith.constant 0 : index
    %6 = vector.load %arg4[%c0_4, %c0_5] : memref<1x256xf32, #tpu.memory_space<vmem>>, vector<1x256xf32>
    %7 = vector.broadcast %6 : vector<1x256xf32> to vector<256x256xf32>
    %8 = arith.addf %5, %7 : vector<256x256xf32>
    %c0_6 = arith.constant 0 : index
    %c0_7 = arith.constant 0 : index
    %9 = vector.load %arg8[%c0_6, %c0_7] : memref<256x128xbf16, #tpu.memory_space<vmem>>, vector<256x128xbf16>
    %c0_8 = arith.constant 0 : index
    %c0_9 = arith.constant 0 : index
    %10 = vector.load %arg6[%c0_8, %c0_9] : memref<128x256xbf16, #tpu.memory_space<vmem>>, vector<128x256xbf16>
    %cst_10 = arith.constant dense<0.000000e+00> : vector<256x256xf32>
    %11 = tpu.matmul %9, %10, %cst_10 {dimension_numbers = #tpu.dot_dimension_numbers<[1], [0], [0], [1], [0, 0, 1, 1], [], []>} : vector<256x128xbf16>, vector<128x256xbf16>, vector<256x256xf32> -> vector<256x256xf32>
    %12 = arith.addf %8, %11 : vector<256x256xf32>
    %13 = arith.truncf %12 : vector<256x256xf32> to vector<256x256xbf16>
    %c0_11 = arith.constant 0 : index
    %c0_12 = arith.constant 0 : index
    %14 = vector.load %arg7[%c0_11, %c0_12] : memref<256x256xbf16, #tpu.memory_space<vmem>>, vector<256x256xbf16>
    tpu.vector_store %arg7[%c0_11, %c0_12], %13 {strides = array<i32>} : memref<256x256xbf16, #tpu.memory_space<vmem>>, vector<256x256xbf16>,
    return
  }
  func.func @transform_0(%arg0: i32, %arg1: i32) -> (i32, i32) {
    %c0_i32 = arith.constant 0 : i32
    %c0_i32_0 = arith.constant 0 : i32
    return %arg0, %c0_i32 : i32, i32
  }
  func.func @transform_1(%arg0: i32, %arg1: i32) -> (i32, i32) {
    %c0_i32 = arith.constant 0 : i32
    %c0_i32_0 = arith.constant 0 : i32
    return %c0_i32, %arg1 : i32, i32
  }
  func.func @transform_2(%arg0: i32, %arg1: i32) -> (i32, i32) {
    %c0_i32 = arith.constant 0 : i32
    %c0_i32_0 = arith.constant 0 : i32
    return %c0_i32, %arg1 : i32, i32
  }
  func.func @transform_3(%arg0: i32, %arg1: i32) -> (i32, i32) {
    %c0_i32 = arith.constant 0 : i32
    %c0_i32_0 = arith.constant 0 : i32
    %c0_i32_1 = arith.constant 0 : i32
    return %c0_i32, %c0_i32_0 : i32, i32
  }
  func.func @transform_4(%arg0: i32, %arg1: i32) -> (i32, i32) {
    %c0_i32 = arith.constant 0 : i32
    %c0_i32_0 = arith.constant 0 : i32
    return %c0_i32, %arg1 : i32, i32
  }
  func.func @transform_5(%arg0: i32, %arg1: i32) -> (i32, i32) {
    %c0_i32 = arith.constant 0 : i32
    return %arg0, %arg1 : i32, i32
  }
}

</mosaic_0001>

<bundles_post_ra>
// kernel: aplora_forward.1
= control target key start
LH: loop header
LB: loop body
LE: loop exit
PB: predicated region body
PF: predicated region fallthrough
CT: control target
= control target key end

     0   :  { %s7176_s0 = inlined_call_operand.vmem [shape: bf16[512,512], index: 0, kind: input, shape index: {}]   ;;  %s7177_s1 = inlined_call_operand.vmem [shape: bf16[512,512], index: 1, kind: input, shape index: {}]   ;;  %s7178_s2 = inlined_call_operand.vmem [shape: f32[1,512], index: 2, kind: input, shape index: {}]   ;;  %s7179_s3 = inlined_call_operand.vmem [shape: bf16[512,128], index: 3, kind: input, shape index: {}]   ;;  %s7180_s4 = inlined_call_operand.vmem [shape: bf16[128,512], index: 4, kind: input, shape index: {}]   ;;  %s7181_s5 = inlined_call_operand.vmem [shape: bf16[512,512], index: 5, kind: output, shape index: {}]  }
   0x1   :  { %7198 = sst [smem:[#allocation42_spill]] %s7176_s0 }
   0x2   :  { %7199 = sst [smem:[#allocation43_spill]] %s7177_s1 }
   0x3   :  { %7200 = sst [smem:[#allocation44_spill]] %s7180_s4 }
   0x4   :  { %s5640_s18 = smov 0   ;;  %s5642_s19 = smov 0  }
   0x5   :  { %s5644_s20 = smov 0   ;;  %s5646_s21 = smov 0  }
   0x6   :  { %s5648_s22 = smov 0   ;;  %s5650_s23 = smov 0  }
   0x7   :  { %s5652_s24 = smov 0   ;;  %s5654_s25 = smov 0  }
   0x8   :  { %s5656_s26 = smov 0  }
   0x9 LB: > { %s4045_s27 = sadd.s32 4294967295, %s5608_s26   ;;  %s24_s28 = sadd.s32 1, %s5600_s24  ;;  %s5608_s26 = sphi %s5656_s26, %s15_s26   ;;  %s5604_s25 = sphi %s5654_s25, %s7319_s25   ;;  %s5600_s24 = sphi %s5652_s24, %s7318_s24   ;;  %s5596_s23 = sphi %s5650_s23, %s7317_s23   ;;  %s5592_s22 = sphi %s5648_s22, %s7316_s22   ;;  %s5588_s21 = sphi %s5646_s21, %s7315_s21   ;;  %s5584_s20 = sphi %s5644_s20, %s7314_s20   ;;  %s5580_s19 = sphi %s5642_s19, %s7313_s19   ;;  %s5576_s18 = sphi %s5640_s18, %s7312_s18  }
   0xa   : > { %p25_p0 = scmp.ge.s32.totalorder %s24_s28, 2  ;;  %s27_s29 = sadd.s32 1, %s5604_s25 }
   0xb   : > { %s60_s30 = sadd.s32 1, %s5588_s21  ;;  %p67_p1 = scmp.ne.s32.totalorder %s5588_s21, %s5584_s20 }
   0xc   : > { %s7321_s28 = smov (%p25_p0, %s24_s28), 0  ;;  %s7323_s29 = smov (!%p25_p0, %s27_s29), %s5604_s25 }
   0xd   : > { %s57_s6 = ssub.s32 %s5600_s24, %s7321_s28  ;;  %p68_p2 = scmp.eq.s32.totalorder %s5608_s26, 0 }
   0xe   : > { %p29_p3 = scmp.ge.s32.totalorder %s7323_s29, 2  ;;  %p58_p4 = scmp.eq.s32.totalorder %s57_s6, 0 }
   0xf   : > { %p5697_p5 = por %p68_p2, %p67_p1  ;;  %s161_s8 = sadd.s32 1, %s5580_s19 }
  0x10   : > { %s7325_s29 = smov (%p29_p3, %s7323_s29), 0  ;;  %p171_p6 = scmp.ne.s32.totalorder %s5580_s19, %s5576_s18 }
  0x11   : > { %7202 = sst [smem:[#allocation6_spill]] %s7325_s29  ;;  %s156_s10 = ssub.s32 %s5604_s25, %s7325_s29 }
  0x12   : > { %s5705_s9 = scalar_select %p58_p4, %s5588_s21, %s60_s30  }
  0x13   : > { %s158_s11 = sor.u32 %s156_s10, %s57_s6  ;;  %p172_p7 = scmp.eq.s32.totalorder %s4045_s27, 3 }
  0x14   : > { %p159_p8 = scmp.eq.s32.totalorder %s158_s11, 0  ;;  %p4048_p10 = scmp.ge.s32.totalorder %s5608_s26, 4 }
  0x15   : > { %p5711_p9 = por %p172_p7, %p171_p6 }
  0x16   : > { %s5716_s13 = scalar_select %p159_p8, %s5580_s19, %s161_s8  }
  0x17   : > { %197 = sbr.rel (%p4048_p10) target bundleno = 128 (0x80), region = 20 }
  0x1c   : > { %210 = sbr.rel (!%p5697_p5) target bundleno = 102 (0x66), region = 28  ;;  %s212_s14 = sand.u32 (%p5697_p5), 1, %s5588_s21  }
  0x1d   : > { %s5095_s15 = sshll.u32 (%p5697_p5), %s5600_s24, 3  ;;  %s4049_s16 = sshll.u32 (%p5697_p5), %s212_s14, 9 }
  0x1e   : > { %s7204_s1 = sld [smem:[#allocation43_spill]] (%p5697_p5)  ;;  %s5731_s6 = scalar_lea.vmem (%p5697_p5), [#allocation3], %s4049_s16 }
  0x24   : > { %s5726_s30 = scalar_lea.vmem %s7204_s1, %s5095_s15 }
  0x25   : > { %v372_v0 = vld [vmem:[%s5726_s30] sm:$0xff]  ;;  %v374_v1 = vld [vmem:[%s5726_s30 + $0x10] sm:$0xff] }
  0x26   : > { %v376_v2 = vld [vmem:[%s5726_s30 + $0x20] sm:$0xff]  ;;  %373 = vst [vmem:[%s5731_s6] sm:$0xff] %v372_v0  ;;  %v378_v3 = vld [vmem:[%s5726_s30 + $0x30] sm:$0xff] }
  0x27   : > { %375 = vst [vmem:[%s5731_s6 + $0x8] sm:$0xff] %v374_v1  ;;  %v380_v4 = vld [vmem:[%s5726_s30 + $0x40] sm:$0xff]  ;;  %v382_v5 = vld [vmem:[%s5726_s30 + $0x50] sm:$0xff] }
  0x28   : > { %377 = vst [vmem:[%s5731_s6 + $0x10] sm:$0xff] %v376_v2  ;;  %v384_v6 = vld [vmem:[%s5726_s30 + $0x60] sm:$0xff]  ;;  %v386_v7 = vld [vmem:[%s5726_s30 + $0x70] sm:$0xff] }
  0x29   : > { %379 = vst [vmem:[%s5731_s6 + $0x18] sm:$0xff] %v378_v3  ;;  %v388_v8 = vld [vmem:[%s5726_s30 + $0x80] sm:$0xff]  ;;  %v390_v9 = vld [vmem:[%s5726_s30 + $0x90] sm:$0xff] }
  0x2a   : > { %381 = vst [vmem:[%s5731_s6 + $0x20] sm:$0xff] %v380_v4  ;;  %v392_v10 = vld [vmem:[%s5726_s30 + $0xa0] sm:$0xff]  ;;  %v394_v11 = vld [vmem:[%s5726_s30 + $0xb0] sm:$0xff] }
  0x2b   : > { %383 = vst [vmem:[%s5731_s6 + $0x28] sm:$0xff] %v382_v5  ;;  %v396_v12 = vld [vmem:[%s5726_s30 + $0xc0] sm:$0xff]  ;;  %v398_v13 = vld [vmem:[%s5726_s30 + $0xd0] sm:$0xff] }
  0x2c   : > { %385 = vst [vmem:[%s5731_s6 + $0x30] sm:$0xff] %v384_v6  ;;  %v400_v14 = vld [vmem:[%s5726_s30 + $0xe0] sm:$0xff]  ;;  %v402_v15 = vld [vmem:[%s5726_s30 + $0xf0] sm:$0xff] }
  0x2d   : > { %387 = vst [vmem:[%s5731_s6 + $0x38] sm:$0xff] %v386_v7  ;;  %v404_v16 = vld [vmem:[%s5726_s30 + $0x100] sm:$0xff]  ;;  %v406_v17 = vld [vmem:[%s5726_s30 + $0x110] sm:$0xff] }
  0x2e   : > { %389 = vst [vmem:[%s5731_s6 + $0x40] sm:$0xff] %v388_v8  ;;  %v408_v18 = vld [vmem:[%s5726_s30 + $0x120] sm:$0xff]  ;;  %v410_v19 = vld [vmem:[%s5726_s30 + $0x130] sm:$0xff] }
  0x2f   : > { %391 = vst [vmem:[%s5731_s6 + $0x48] sm:$0xff] %v390_v9  ;;  %v412_v20 = vld [vmem:[%s5726_s30 + $0x140] sm:$0xff]  ;;  %v414_v21 = vld [vmem:[%s5726_s30 + $0x150] sm:$0xff] }
  0x30   : > { %393 = vst [vmem:[%s5731_s6 + $0x50] sm:$0xff] %v392_v10  ;;  %v416_v22 = vld [vmem:[%s5726_s30 + $0x160] sm:$0xff]  ;;  %v418_v23 = vld [vmem:[%s5726_s30 + $0x170] sm:$0xff] }
  0x31   : > { %395 = vst [vmem:[%s5731_s6 + $0x58] sm:$0xff] %v394_v11  ;;  %v420_v24 = vld [vmem:[%s5726_s30 + $0x180] sm:$0xff]  ;;  %v422_v25 = vld [vmem:[%s5726_s30 + $0x190] sm:$0xff] }
  0x32   : > { %397 = vst [vmem:[%s5731_s6 + $0x60] sm:$0xff] %v396_v12  ;;  %v424_v26 = vld [vmem:[%s5726_s30 + $0x1a0] sm:$0xff]  ;;  %v426_v27 = vld [vmem:[%s5726_s30 + $0x1b0] sm:$0xff] }
  0x33   : > { %399 = vst [vmem:[%s5731_s6 + $0x68] sm:$0xff] %v398_v13  ;;  %v428_v28 = vld [vmem:[%s5726_s30 + $0x1c0] sm:$0xff]  ;;  %v430_v29 = vld [vmem:[%s5726_s30 + $0x1d0] sm:$0xff] }
  0x34   : > { %401 = vst [vmem:[%s5731_s6 + $0x70] sm:$0xff] %v400_v14  ;;  %v432_v30 = vld [vmem:[%s5726_s30 + $0x1e0] sm:$0xff]  ;;  %v434_v31 = vld [vmem:[%s5726_s30 + $0x1f0] sm:$0xff] }
  0x35   : > { %403 = vst [vmem:[%s5731_s6 + $0x78] sm:$0xff] %v402_v15  ;;  %v436_v32 = vld [vmem:[%s5726_s30 + $0x200] sm:$0xff]  ;;  %v438_v33 = vld [vmem:[%s5726_s30 + $0x210] sm:$0xff] }
  0x36   : > { %405 = vst [vmem:[%s5731_s6 + $0x80] sm:$0xff] %v404_v16  ;;  %v440_v34 = vld [vmem:[%s5726_s30 + $0x220] sm:$0xff]  ;;  %v442_v35 = vld [vmem:[%s5726_s30 + $0x230] sm:$0xff] }
  0x37   : > { %407 = vst [vmem:[%s5731_s6 + $0x88] sm:$0xff] %v406_v17  ;;  %v444_v36 = vld [vmem:[%s5726_s30 + $0x240] sm:$0xff]  ;;  %v446_v37 = vld [vmem:[%s5726_s30 + $0x250] sm:$0xff] }
  0x38   : > { %409 = vst [vmem:[%s5731_s6 + $0x90] sm:$0xff] %v408_v18  ;;  %v448_v38 = vld [vmem:[%s5726_s30 + $0x260] sm:$0xff]  ;;  %v450_v39 = vld [vmem:[%s5726_s30 + $0x270] sm:$0xff] }
  0x39   : > { %411 = vst [vmem:[%s5731_s6 + $0x98] sm:$0xff] %v410_v19  ;;  %v452_v40 = vld [vmem:[%s5726_s30 + $0x280] sm:$0xff]  ;;  %v454_v41 = vld [vmem:[%s5726_s30 + $0x290] sm:$0xff] }
  0x3a   : > { %413 = vst [vmem:[%s5731_s6 + $0xa0] sm:$0xff] %v412_v20  ;;  %v456_v42 = vld [vmem:[%s5726_s30 + $0x2a0] sm:$0xff]  ;;  %v458_v43 = vld [vmem:[%s5726_s30 + $0x2b0] sm:$0xff] }
  0x3b   : > { %415 = vst [vmem:[%s5731_s6 + $0xa8] sm:$0xff] %v414_v21  ;;  %v460_v44 = vld [vmem:[%s5726_s30 + $0x2c0] sm:$0xff]  ;;  %v462_v45 = vld [vmem:[%s5726_s30 + $0x2d0] sm:$0xff] }
  0x3c   : > { %417 = vst [vmem:[%s5731_s6 + $0xb0] sm:$0xff] %v416_v22  ;;  %v464_v46 = vld [vmem:[%s5726_s30 + $0x2e0] sm:$0xff]  ;;  %v466_v47 = vld [vmem:[%s5726_s30 + $0x2f0] sm:$0xff] }
  0x3d   : > { %419 = vst [vmem:[%s5731_s6 + $0xb8] sm:$0xff] %v418_v23  ;;  %v468_v48 = vld [vmem:[%s5726_s30 + $0x300] sm:$0xff]  ;;  %v470_v49 = vld [vmem:[%s5726_s30 + $0x310] sm:$0xff] }
  0x3e   : > { %421 = vst [vmem:[%s5731_s6 + $0xc0] sm:$0xff] %v420_v24  ;;  %v472_v50 = vld [vmem:[%s5726_s30 + $0x320] sm:$0xff]  ;;  %v474_v51 = vld [vmem:[%s5726_s30 + $0x330] sm:$0xff] }
  0x3f   : > { %423 = vst [vmem:[%s5731_s6 + $0xc8] sm:$0xff] %v422_v25  ;;  %v476_v52 = vld [vmem:[%s5726_s30 + $0x340] sm:$0xff]  ;;  %v478_v53 = vld [vmem:[%s5726_s30 + $0x350] sm:$0xff] }
  0x40   : > { %425 = vst [vmem:[%s5731_s6 + $0xd0] sm:$0xff] %v424_v26  ;;  %v480_v54 = vld [vmem:[%s5726_s30 + $0x360] sm:$0xff]  ;;  %v482_v55 = vld [vmem:[%s5726_s30 + $0x370] sm:$0xff] }
  0x41   : > { %427 = vst [vmem:[%s5731_s6 + $0xd8] sm:$0xff] %v426_v27  ;;  %v484_v56 = vld [vmem:[%s5726_s30 + $0x380] sm:$0xff]  ;;  %v486_v57 = vld [vmem:[%s5726_s30 + $0x390] sm:$0xff] }
  0x42   : > { %429 = vst [vmem:[%s5731_s6 + $0xe0] sm:$0xff] %v428_v28  ;;  %v488_v58 = vld [vmem:[%s5726_s30 + $0x3a0] sm:$0xff]  ;;  %v490_v59 = vld [vmem:[%s5726_s30 + $0x3b0] sm:$0xff] }
  0x43   : > { %431 = vst [vmem:[%s5731_s6 + $0xe8] sm:$0xff] %v430_v29  ;;  %v492_v60 = vld [vmem:[%s5726_s30 + $0x3c0] sm:$0xff]  ;;  %v494_v61 = vld [vmem:[%s5726_s30 + $0x3d0] sm:$0xff] }
  0x44   : > { %433 = vst [vmem:[%s5731_s6 + $0xf0] sm:$0xff] %v432_v30  ;;  %v496_v62 = vld [vmem:[%s5726_s30 + $0x3e0] sm:$0xff]  ;;  %v498_v63 = vld [vmem:[%s5726_s30 + $0x3f0] sm:$0xff] }
  0x45   : > { %435 = vst [vmem:[%s5731_s6 + $0xf8] sm:$0xff] %v434_v31 }
  0x46   : > { %437 = vst [vmem:[%s5731_s6 + $0x100] sm:$0xff] %v436_v32 }
  0x47   : > { %439 = vst [vmem:[%s5731_s6 + $0x108] sm:$0xff] %v438_v33 }
  0x48   : > { %441 = vst [vmem:[%s5731_s6 + $0x110] sm:$0xff] %v440_v34 }
  0x49   : > { %443 = vst [vmem:[%s5731_s6 + $0x118] sm:$0xff] %v442_v35 }
  0x4a   : > { %445 = vst [vmem:[%s5731_s6 + $0x120] sm:$0xff] %v444_v36 }
  0x4b   : > { %447 = vst [vmem:[%s5731_s6 + $0x128] sm:$0xff] %v446_v37 }
  0x4c   : > { %449 = vst [vmem:[%s5731_s6 + $0x130] sm:$0xff] %v448_v38 }
  0x4d   : > { %451 = vst [vmem:[%s5731_s6 + $0x138] sm:$0xff] %v450_v39 }
  0x4e   : > { %453 = vst [vmem:[%s5731_s6 + $0x140] sm:$0xff] %v452_v40 }
  0x4f   : > { %455 = vst [vmem:[%s5731_s6 + $0x148] sm:$0xff] %v454_v41 }
  0x50   : > { %457 = vst [vmem:[%s5731_s6 + $0x150] sm:$0xff] %v456_v42 }
  0x51   : > { %459 = vst [vmem:[%s5731_s6 + $0x158] sm:$0xff] %v458_v43 }
  0x52   : > { %461 = vst [vmem:[%s5731_s6 + $0x160] sm:$0xff] %v460_v44 }
  0x53   : > { %463 = vst [vmem:[%s5731_s6 + $0x168] sm:$0xff] %v462_v45 }
  0x54   : > { %465 = vst [vmem:[%s5731_s6 + $0x170] sm:$0xff] %v464_v46 }
  0x55   : > { %467 = vst [vmem:[%s5731_s6 + $0x178] sm:$0xff] %v466_v47 }
  0x56   : > { %469 = vst [vmem:[%s5731_s6 + $0x180] sm:$0xff] %v468_v48 }
  0x57   : > { %471 = vst [vmem:[%s5731_s6 + $0x188] sm:$0xff] %v470_v49 }
  0x58   : > { %473 = vst [vmem:[%s5731_s6 + $0x190] sm:$0xff] %v472_v50 }
  0x59   : > { %475 = vst [vmem:[%s5731_s6 + $0x198] sm:$0xff] %v474_v51 }
  0x5a   : > { %477 = vst [vmem:[%s5731_s6 + $0x1a0] sm:$0xff] %v476_v52 }
  0x5b   : > { %479 = vst [vmem:[%s5731_s6 + $0x1a8] sm:$0xff] %v478_v53 }
  0x5c   : > { %481 = vst [vmem:[%s5731_s6 + $0x1b0] sm:$0xff] %v480_v54 }
  0x5d   : > { %483 = vst [vmem:[%s5731_s6 + $0x1b8] sm:$0xff] %v482_v55 }
  0x5e   : > { %485 = vst [vmem:[%s5731_s6 + $0x1c0] sm:$0xff] %v484_v56 }
  0x5f   : > { %487 = vst [vmem:[%s5731_s6 + $0x1c8] sm:$0xff] %v486_v57 }
  0x60   : > { %489 = vst [vmem:[%s5731_s6 + $0x1d0] sm:$0xff] %v488_v58 }
  0x61   : > { %491 = vst [vmem:[%s5731_s6 + $0x1d8] sm:$0xff] %v490_v59 }
  0x62   : > { %493 = vst [vmem:[%s5731_s6 + $0x1e0] sm:$0xff] %v492_v60 }
  0x63   : > { %495 = vst [vmem:[%s5731_s6 + $0x1e8] sm:$0xff] %v494_v61 }
  0x64   : > { %497 = vst [vmem:[%s5731_s6 + $0x1f0] sm:$0xff] %v496_v62 }
  0x65   : > { %499 = vst [vmem:[%s5731_s6 + $0x1f8] sm:$0xff] %v498_v63 }
  0x66 PF: > { %513 = sbr.rel (!%p5697_p5) target bundleno = 128 (0x80), region = 70  ;;  %s515_s8 = sand.u32 (%p5697_p5), 1, %s5588_s21  }
  0x67   : > { %s5096_s10 = sshll.u32 (%p5697_p5), %s5600_s24, 3  ;;  %s4052_s11 = sshll.u32 (%p5697_p5), %s515_s8, 7 }
  0x68   : > { %s7205_s4 = sld [smem:[#allocation44_spill]] (%p5697_p5)  ;;  %s517_s7 = scalar_lea.vmem (%p5697_p5), [#allocation4], %s4052_s11 }
  0x6e   : > { %s5865_s16 = scalar_lea.vmem %s7205_s4, %s5096_s10 }
  0x6f   : > { %v579_v0 = vld [vmem:[%s5865_s16] sm:$0xff]  ;;  %v581_v1 = vld [vmem:[%s5865_s16 + $0x10] sm:$0xff] }
  0x70   : > { %v583_v2 = vld [vmem:[%s5865_s16 + $0x20] sm:$0xff]  ;;  %580 = vst [vmem:[%s517_s7] sm:$0xff] %v579_v0  ;;  %v585_v3 = vld [vmem:[%s5865_s16 + $0x30] sm:$0xff] }
  0x71   : > { %582 = vst [vmem:[%s517_s7 + $0x8] sm:$0xff] %v581_v1  ;;  %v587_v4 = vld [vmem:[%s5865_s16 + $0x40] sm:$0xff]  ;;  %v589_v5 = vld [vmem:[%s5865_s16 + $0x50] sm:$0xff] }
  0x72   : > { %584 = vst [vmem:[%s517_s7 + $0x10] sm:$0xff] %v583_v2  ;;  %v591_v6 = vld [vmem:[%s5865_s16 + $0x60] sm:$0xff]  ;;  %v593_v7 = vld [vmem:[%s5865_s16 + $0x70] sm:$0xff] }
  0x73   : > { %586 = vst [vmem:[%s517_s7 + $0x18] sm:$0xff] %v585_v3  ;;  %v595_v8 = vld [vmem:[%s5865_s16 + $0x80] sm:$0xff]  ;;  %v597_v9 = vld [vmem:[%s5865_s16 + $0x90] sm:$0xff] }
  0x74   : > { %588 = vst [vmem:[%s517_s7 + $0x20] sm:$0xff] %v587_v4  ;;  %v599_v10 = vld [vmem:[%s5865_s16 + $0xa0] sm:$0xff]  ;;  %v601_v11 = vld [vmem:[%s5865_s16 + $0xb0] sm:$0xff] }
  0x75   : > { %590 = vst [vmem:[%s517_s7 + $0x28] sm:$0xff] %v589_v5  ;;  %v603_v12 = vld [vmem:[%s5865_s16 + $0xc0] sm:$0xff]  ;;  %v605_v13 = vld [vmem:[%s5865_s16 + $0xd0] sm:$0xff] }
  0x76   : > { %592 = vst [vmem:[%s517_s7 + $0x30] sm:$0xff] %v591_v6  ;;  %v607_v14 = vld [vmem:[%s5865_s16 + $0xe0] sm:$0xff]  ;;  %v609_v15 = vld [vmem:[%s5865_s16 + $0xf0] sm:$0xff] }
  0x77   : > { %594 = vst [vmem:[%s517_s7 + $0x38] sm:$0xff] %v593_v7 }
  0x78   : > { %596 = vst [vmem:[%s517_s7 + $0x40] sm:$0xff] %v595_v8 }
  0x79   : > { %598 = vst [vmem:[%s517_s7 + $0x48] sm:$0xff] %v597_v9 }
  0x7a   : > { %600 = vst [vmem:[%s517_s7 + $0x50] sm:$0xff] %v599_v10 }
  0x7b   : > { %602 = vst [vmem:[%s517_s7 + $0x58] sm:$0xff] %v601_v11 }
  0x7c   : > { %604 = vst [vmem:[%s517_s7 + $0x60] sm:$0xff] %v603_v12 }
  0x7d   : > { %606 = vst [vmem:[%s517_s7 + $0x68] sm:$0xff] %v605_v13 }
  0x7e   : > { %608 = vst [vmem:[%s517_s7 + $0x70] sm:$0xff] %v607_v14 }
  0x7f   : > { %610 = vst [vmem:[%s517_s7 + $0x78] sm:$0xff] %v609_v15 }
  0x80 PF: > { %p4055_p11 = scmp.ge.s32.totalorder %s5608_s26, 1  ;;  %p615_p12 = scmp.lt.s32.totalorder %s5608_s26, 5 }
  0x82   : > { %p616_p13 = pnand %p4055_p11, %p615_p12 }
  0x84   : > { %619 = sbr.rel (%p616_p13) target bundleno = 1388 (0x56c), region = 108 }
  0x89   : > { %s622_s17 = sand.u32 1, %s5584_s20   ;;  %s666_s27 = sand.u32 1, %s5576_s18  }
  0x8a   : > { %s4056_s30 = sshll.u32 %s622_s17, 9  ;;  %s4057_s6 = sshll.u32 %s622_s17, 7 }
  0x8b   : > { %s4058_s8 = sshll.u32 %s666_s27, 8  ;;  %s4059_s10 = sshll.u32 %s5596_s23, 5 }
  0x8c   : > { %p670_p0 = scmp.lt.s32.totalorder %s4059_s10, 63  ;;  %s5889_s11 = sshll.u32 %s5592_s22, 1 }
  0x8d   : > { %p678_p1 = scmp.lt.s32.totalorder %s5889_s11, 3  ;;  %s7206_s0 = sld [smem:[#allocation42_spill]] }
  0x8e   : > { %s7327_s10 = smov (!%p670_p0, %s4059_s10), 63  ;;  %s5904_s27 = scalar_lea.vmem [#allocation3], %s4056_s30 }
  0x8f   : > { %s5097_s14 = sshll.u32 %s7327_s10, 4  ;;  %s5906_s4 = scalar_lea.vmem [#allocation4], %s4057_s6 }
  0x90   : > { %s5898_s1 = scalar_select %p678_p1, %s5889_s11, 3 }
  0x91   : > { %s5908_s29 = scalar_lea.vmem [#allocation5], %s4058_s8  ;;  %p4063_p2 = scmp.ne.s32.totalorder %s5592_s22, 0 }
  0x92   : > { %s680_s17 = scalar_lea.vmem %s7178_s2, %s5898_s1 }
  0x93   : > { %s5895_s7 = scalar_lea.vmem %s7206_s0, %s5097_s14  ;;  %688 = sbr.rel (%p4063_p2) target bundleno = 573 (0x23d), region = 120 }
  0x98   : > { %v5169_v16 = vld [vmem:[%s7179_s3 + $0x38] sm:$0xff]  ;;  %v5168_v20 = vld [vmem:[%s7179_s3 + $0x30] sm:$0xff]  ;;  %v5167_v24 = vld [vmem:[%s7179_s3 + $0x28] sm:$0xff] }
  0x99   : > { %v5177_v17 = vld [vmem:[%s7179_s3 + $0x78] sm:$0xff]  ;;  %1329 = vmatpush.bf16.msra.mxu0 %v5169_v16  ;;  %v5176_v21 = vld [vmem:[%s7179_s3 + $0x70] sm:$0xff]  ;;  %v5175_v25 = vld [vmem:[%s7179_s3 + $0x68] sm:$0xff] }
  0x9a   : > { %v5185_v18 = vld [vmem:[%s7179_s3 + $0xb8] sm:$0xff]  ;;  %1418 = vmatpush.bf16.msra.mxu1 %v5177_v17  ;;  %v5184_v22 = vld [vmem:[%s7179_s3 + $0xb0] sm:$0xff]  ;;  %v5183_v26 = vld [vmem:[%s7179_s3 + $0xa8] sm:$0xff] }
  0x9b   : > { %v5193_v19 = vld [vmem:[%s7179_s3 + $0xf8] sm:$0xff]  ;;  %1507 = vmatpush.bf16.msra.mxu2 %v5185_v18  ;;  %v5192_v23 = vld [vmem:[%s7179_s3 + $0xf0] sm:$0xff]  ;;  %v5191_v27 = vld [vmem:[%s7179_s3 + $0xe8] sm:$0xff] }
  0x9c   : > { %1596 = vmatpush.bf16.msra.mxu3 %v5193_v19  ;;  %v5166_v28 = vld [vmem:[%s7179_s3 + $0x20] sm:$0xff]  ;;  %v5165_v32 = vld [vmem:[%s7179_s3 + $0x18] sm:$0xff]  ;;  %v5164_v36 = vld [vmem:[%s7179_s3 + $0x10] sm:$0xff] }
  0x9d   : > { %1330 = vmatpush.bf16.msra.mxu0 %v5168_v20  ;;  %v5174_v29 = vld [vmem:[%s7179_s3 + $0x60] sm:$0xff]  ;;  %v5173_v33 = vld [vmem:[%s7179_s3 + $0x58] sm:$0xff]  ;;  %v5172_v37 = vld [vmem:[%s7179_s3 + $0x50] sm:$0xff] }
  0x9e   : > { %1419 = vmatpush.bf16.msra.mxu1 %v5176_v21  ;;  %v5182_v30 = vld [vmem:[%s7179_s3 + $0xa0] sm:$0xff]  ;;  %v5181_v34 = vld [vmem:[%s7179_s3 + $0x98] sm:$0xff]  ;;  %v5180_v38 = vld [vmem:[%s7179_s3 + $0x90] sm:$0xff] }
  0x9f   : > { %1508 = vmatpush.bf16.msra.mxu2 %v5184_v22  ;;  %v5190_v31 = vld [vmem:[%s7179_s3 + $0xe0] sm:$0xff]  ;;  %v5189_v35 = vld [vmem:[%s7179_s3 + $0xd8] sm:$0xff]  ;;  %v5188_v39 = vld [vmem:[%s7179_s3 + $0xd0] sm:$0xff] }
  0xa0   : > { %1597 = vmatpush.bf16.msra.mxu3 %v5192_v23  ;;  %v5163_v40 = vld [vmem:[%s7179_s3 + $0x8] sm:$0xff]  ;;  %v5162_v44 = vld [vmem:[%s7179_s3] sm:$0xff]  ;;  %v5100_v49 = vld [vmem:[%s5895_s7 + $0xc] sm:$0xf0] }
  0xa1   : > { %1331 = vmatpush.bf16.msra.mxu0 %v5167_v24  ;;  %v5171_v41 = vld [vmem:[%s7179_s3 + $0x48] sm:$0xff]  ;;  %v5170_v45 = vld [vmem:[%s7179_s3 + $0x40] sm:$0xff]  ;;  %v4068_v51 = vld [vmem:[%s5895_s7 + $0x10] sm:$0xf0] }
  0xa2   : > { %1420 = vmatpush.bf16.msra.mxu1 %v5175_v25  ;;  %v5179_v42 = vld [vmem:[%s7179_s3 + $0x88] sm:$0xff]  ;;  %v5178_v46 = vld [vmem:[%s7179_s3 + $0x80] sm:$0xff]  ;;  %v5101_v53 = vld [vmem:[%s5895_s7 + $0x14] sm:$0xf0] }
  0xa3   : > { %1509 = vmatpush.bf16.msra.mxu2 %v5183_v26  ;;  %v5187_v43 = vld [vmem:[%s7179_s3 + $0xc8] sm:$0xff]  ;;  %v5186_v47 = vld [vmem:[%s7179_s3 + $0xc0] sm:$0xff]  ;;  %v4076_v55 = vld [vmem:[%s5895_s7 + $0x18] sm:$0xf0] }
  0xa4   : > { %1598 = vmatpush.bf16.msra.mxu3 %v5191_v27  ;;  %v4066_v48 = vld [vmem:[%s5895_s7] sm:$0xf]  ;;  %v5098_v50 = vld [vmem:[%s5895_s7 + $0x4] sm:$0xf]  ;;  %v4074_v52 = vld [vmem:[%s5895_s7 + $0x8] sm:$0xf] }
  0xa5   : > { %1332 = vmatpush.bf16.msra.mxu0 %v5166_v28  ;;  %v5099_v54 = vld [vmem:[%s5895_s7 + $0xc] sm:$0xf]  ;;  %v4067_v56 = vor.u32 %v5100_v49, %v4066_v48  ;;  %v4071_v57 = vor.u32 %v5098_v50, %v4068_v51  ;;  %v4075_v58 = vor.u32 %v5101_v53, %v4074_v52  ;;  %v4082_v60 = vld [vmem:[%s5895_s7 + $0x20] sm:$0xf]  ;;  %v5104_v61 = vld [vmem:[%s5895_s7 + $0x2c] sm:$0xf0] }
  0xa6   : > { %1421 = vmatpush.bf16.msra.mxu1 %v5174_v29  ;;  %v4079_v59 = vor.u32 %v5099_v54, %v4076_v55  ;;  %v5102_v62 = vld [vmem:[%s5895_s7 + $0x24] sm:$0xf]  ;;  %v4084_v63 = vld [vmem:[%s5895_s7 + $0x30] sm:$0xf0]  ;;  %v4090_v0 = vld [vmem:[%s5895_s7 + $0x28] sm:$0xf]  ;;  %v4083_v4 = vor.u32 %v5104_v61, %v4082_v60 }
  0xa7   : > { %1510 = vmatpush.bf16.msra.mxu2 %v5182_v30  ;;  %v5105_v1 = vld [vmem:[%s5895_s7 + $0x34] sm:$0xf0]  ;;  %v5103_v2 = vld [vmem:[%s5895_s7 + $0x2c] sm:$0xf]  ;;  %v4092_v3 = vld [vmem:[%s5895_s7 + $0x38] sm:$0xf0]  ;;  %v4087_v5 = vor.u32 %v5102_v62, %v4084_v63 }
  0xa8   : > { %1599 = vmatpush.bf16.msra.mxu3 %v5190_v31  ;;  %v4091_v6 = vor.u32 %v5105_v1, %v4090_v0  ;;  %v4095_v7 = vor.u32 %v5103_v2, %v4092_v3  ;;  %v4098_v8 = vld [vmem:[%s5895_s7 + $0x40] sm:$0xf]  ;;  %v5108_v9 = vld [vmem:[%s5895_s7 + $0x4c] sm:$0xf0]  ;;  %v5106_v10 = vld [vmem:[%s5895_s7 + $0x44] sm:$0xf] }
  0xa9   : > { %1333 = vmatpush.bf16.msra.mxu0 %v5165_v32  ;;  %v4100_v11 = vld [vmem:[%s5895_s7 + $0x50] sm:$0xf0]  ;;  %v4106_v12 = vld [vmem:[%s5895_s7 + $0x48] sm:$0xf]  ;;  %v5109_v13 = vld [vmem:[%s5895_s7 + $0x54] sm:$0xf0]  ;;  %v4099_v16 = vor.u32 %v5108_v9, %v4098_v8 }
  0xaa   : > { %1422 = vmatpush.bf16.msra.mxu1 %v5173_v33  ;;  %v5107_v14 = vld [vmem:[%s5895_s7 + $0x4c] sm:$0xf]  ;;  %v4108_v15 = vld [vmem:[%s5895_s7 + $0x58] sm:$0xf0]  ;;  %v4103_v17 = vor.u32 %v5106_v10, %v4100_v11  ;;  %v4107_v18 = vor.u32 %v5109_v13, %v4106_v12  ;;  %v4114_v20 = vld [vmem:[%s5895_s7 + $0x60] sm:$0xf] }
  0xab   : > { %1511 = vmatpush.bf16.msra.mxu2 %v5181_v34  ;;  %v4111_v19 = vor.u32 %v5107_v14, %v4108_v15  ;;  %v5112_v21 = vld [vmem:[%s5895_s7 + $0x6c] sm:$0xf0]  ;;  %v5110_v22 = vld [vmem:[%s5895_s7 + $0x64] sm:$0xf]  ;;  %v4116_v23 = vld [vmem:[%s5895_s7 + $0x70] sm:$0xf0] }
  0xac   : > { %1600 = vmatpush.bf16.msra.mxu3 %v5189_v35  ;;  %v4122_v24 = vld [vmem:[%s5895_s7 + $0x68] sm:$0xf]  ;;  %v5113_v25 = vld [vmem:[%s5895_s7 + $0x74] sm:$0xf0]  ;;  %v5111_v26 = vld [vmem:[%s5895_s7 + $0x6c] sm:$0xf]  ;;  %v4115_v28 = vor.u32 %v5112_v21, %v4114_v20  ;;  %v4119_v29 = vor.u32 %v5110_v22, %v4116_v23 }
  0xad   : > { %1334 = vmatpush.bf16.msra.mxu0 %v5164_v36  ;;  %v4124_v27 = vld [vmem:[%s5895_s7 + $0x78] sm:$0xf0]  ;;  %v4123_v30 = vor.u32 %v5113_v25, %v4122_v24  ;;  %v4130_v32 = vld [vmem:[%s5895_s7 + $0x80] sm:$0xf]  ;;  %v5116_v33 = vld [vmem:[%s5895_s7 + $0x8c] sm:$0xf0] }
  0xae   : > { %1423 = vmatpush.bf16.msra.mxu1 %v5172_v37  ;;  %v4127_v31 = vor.u32 %v5111_v26, %v4124_v27  ;;  %v5114_v34 = vld [vmem:[%s5895_s7 + $0x84] sm:$0xf]  ;;  %v4132_v35 = vld [vmem:[%s5895_s7 + $0x90] sm:$0xf0]  ;;  %v4138_v36 = vld [vmem:[%s5895_s7 + $0x88] sm:$0xf] }
  0xaf   : > { %1512 = vmatpush.bf16.msra.mxu2 %v5180_v38  ;;  %v5117_v37 = vld [vmem:[%s5895_s7 + $0x94] sm:$0xf0]  ;;  %v5115_v38 = vld [vmem:[%s5895_s7 + $0x8c] sm:$0xf]  ;;  %v4154_v48 = vld [vmem:[%s5895_s7 + $0xa8] sm:$0xf] }
  0xb0   : > { %1601 = vmatpush.bf16.msra.mxu3 %v5188_v39  ;;  %v4140_v39 = vld [vmem:[%s5895_s7 + $0x98] sm:$0xf0]  ;;  %v5121_v49 = vld [vmem:[%s5895_s7 + $0xb4] sm:$0xf0]  ;;  %v5119_v50 = vld [vmem:[%s5895_s7 + $0xac] sm:$0xf] }
  0xb1   : > { %1335 = vmatpush.bf16.msra.mxu0 %v5163_v40  ;;  %v4131_v40 = vor.u32 %v5116_v33, %v4130_v32  ;;  %v4156_v51 = vld [vmem:[%s5895_s7 + $0xb8] sm:$0xf0]  ;;  %v4155_v54 = vor.u32 %v5121_v49, %v4154_v48  ;;  %v4170_v60 = vld [vmem:[%s5895_s7 + $0xc8] sm:$0xf]  ;;  %v5125_v61 = vld [vmem:[%s5895_s7 + $0xd4] sm:$0xf0] }
  0xb2   : > { %1424 = vmatpush.bf16.msra.mxu1 %v5171_v41  ;;  %v4135_v41 = vor.u32 %v5114_v34, %v4132_v35  ;;  %v4159_v55 = vor.u32 %v5119_v50, %v4156_v51  ;;  %v5123_v62 = vld [vmem:[%s5895_s7 + $0xcc] sm:$0xf]  ;;  %v4172_v63 = vld [vmem:[%s5895_s7 + $0xd8] sm:$0xf0]  ;;  %v4171_v2 = vor.u32 %v5125_v61, %v4170_v60  ;;  %v4186_v8 = vld [vmem:[%s5895_s7 + $0xe8] sm:$0xf] }
  0xb3   : > { %1513 = vmatpush.bf16.msra.mxu2 %v5179_v42  ;;  %v4139_v42 = vor.u32 %v5117_v37, %v4138_v36  ;;  %v4175_v3 = vor.u32 %v5123_v62, %v4172_v63  ;;  %v5129_v9 = vld [vmem:[%s5895_s7 + $0xf4] sm:$0xf0]  ;;  %v5127_v10 = vld [vmem:[%s5895_s7 + $0xec] sm:$0xf]  ;;  %v4188_v11 = vld [vmem:[%s5895_s7 + $0xf8] sm:$0xf0] }
  0xb4   : > { %1602 = vmatpush.bf16.msra.mxu3 %v5187_v43  ;;  %v4143_v43 = vor.u32 %v5115_v38, %v4140_v39  ;;  %v4187_v14 = vor.u32 %v5129_v9, %v4186_v8  ;;  %v4191_v15 = vor.u32 %v5127_v10, %v4188_v11  ;;  %v4202_v20 = vld [vmem:[%s5895_s7 + $0x108] sm:$0xf]  ;;  %v5133_v21 = vld [vmem:[%s5895_s7 + $0x114] sm:$0xf0]  ;;  %v5131_v22 = vld [vmem:[%s5895_s7 + $0x10c] sm:$0xf] }
  0xb5   : > { %1336 = vmatpush.bf16.msra.mxu0 %v5162_v44  ;;  %v4146_v44 = vld [vmem:[%s5895_s7 + $0xa0] sm:$0xf]  ;;  %v4204_v23 = vld [vmem:[%s5895_s7 + $0x118] sm:$0xf0]  ;;  %v5136_v36 = vld [vmem:[%s5895_s7 + $0x12c] sm:$0xf0] }
  0xb6   : > { %1425 = vmatpush.bf16.msra.mxu1 %v5170_v45  ;;  %v5120_v45 = vld [vmem:[%s5895_s7 + $0xac] sm:$0xf0]  ;;  %v4210_v35 = vld [vmem:[%s5895_s7 + $0x120] sm:$0xf]  ;;  %v5134_v37 = vld [vmem:[%s5895_s7 + $0x124] sm:$0xf] }
  0xb7   : > { %1514 = vmatpush.bf16.msra.mxu2 %v5178_v46  ;;  %v5118_v46 = vld [vmem:[%s5895_s7 + $0xa4] sm:$0xf]  ;;  %v4147_v52 = vor.u32 %v5120_v45, %v4146_v44  ;;  %v4212_v38 = vld [vmem:[%s5895_s7 + $0x130] sm:$0xf0]  ;;  %v4218_v39 = vld [vmem:[%s5895_s7 + $0x128] sm:$0xf] }
  0xb8   : > { %1603 = vmatpush.bf16.msra.mxu3 %v5186_v47  ;;  %1337 = vmatmul.bf16.vlgmr.msra.gmra.mxu0 %v4067_v56  ;;  %v4148_v47 = vld [vmem:[%s5895_s7 + $0xb0] sm:$0xf0]  ;;  %v4162_v56 = vld [vmem:[%s5895_s7 + $0xc0] sm:$0xf]  ;;  %v4215_v48 = vor.u32 %v5134_v37, %v4212_v38  ;;  %v5140_v63 = vld [vmem:[%s5895_s7 + $0x14c] sm:$0xf0] }
  0xb9   : > { %1426 = vmatmul.bf16.vlgmr.msra.gmra.mxu1 %v4071_v57  ;;  %v4151_v53 = vor.u32 %v5118_v46, %v4148_v47  ;;  %v5124_v57 = vld [vmem:[%s5895_s7 + $0xcc] sm:$0xf0]  ;;  %v4211_v47 = vor.u32 %v5136_v36, %v4210_v35  ;;  %v4226_v62 = vld [vmem:[%s5895_s7 + $0x140] sm:$0xf] }
  0xba   : > { %1515 = vmatmul.bf16.vlgmr.msra.gmra.mxu2 %v4075_v58  ;;  %v5122_v58 = vld [vmem:[%s5895_s7 + $0xc4] sm:$0xf]  ;;  %v4163_v0 = vor.u32 %v5124_v57, %v4162_v56  ;;  %v4227_v10 = vor.u32 %v5140_v63, %v4226_v62 }
  0xbb   : > { %1604 = vmatmul.bf16.vlgmr.msra.gmra.mxu3 %v4079_v59  ;;  %v4164_v59 = vld [vmem:[%s5895_s7 + $0xd0] sm:$0xf0] }
  0xbc   : > { %v4167_v1 = vor.u32 %v5122_v58, %v4164_v59 }
  0xc8   : > { %1342 = vmatmul.bf16.gmra.mxu0 %v4083_v4  ;;  %v4178_v4 = vld [vmem:[%s5895_s7 + $0xe0] sm:$0xf] }
  0xc9   : > { %1431 = vmatmul.bf16.gmra.mxu1 %v4087_v5  ;;  %v5128_v5 = vld [vmem:[%s5895_s7 + $0xec] sm:$0xf0] }
  0xca   : > { %1520 = vmatmul.bf16.gmra.mxu2 %v4091_v6  ;;  %v5126_v6 = vld [vmem:[%s5895_s7 + $0xe4] sm:$0xf]  ;;  %v4179_v12 = vor.u32 %v5128_v5, %v4178_v4  ;;  %v5139_v4 = vld [vmem:[%s5895_s7 + $0x14c] sm:$0xf]  ;;  %v4236_v5 = vld [vmem:[%s5895_s7 + $0x158] sm:$0xf0] }
  0xcb   : > { %1609 = vmatmul.bf16.gmra.mxu3 %v4095_v7  ;;  %v4180_v7 = vld [vmem:[%s5895_s7 + $0xf0] sm:$0xf0] }
  0xcc   : > { %v4183_v13 = vor.u32 %v5126_v6, %v4180_v7 }
  0xd8   : > { %1347 = vmatmul.bf16.gmra.mxu0 %v4099_v16  ;;  %v4194_v16 = vld [vmem:[%s5895_s7 + $0x100] sm:$0xf] }
  0xd9   : > { %1436 = vmatmul.bf16.gmra.mxu1 %v4103_v17  ;;  %v5132_v17 = vld [vmem:[%s5895_s7 + $0x10c] sm:$0xf0] }
  0xda   : > { %1525 = vmatmul.bf16.gmra.mxu2 %v4107_v18  ;;  %v5130_v18 = vld [vmem:[%s5895_s7 + $0x104] sm:$0xf]  ;;  %v4195_v24 = vor.u32 %v5132_v17, %v4194_v16  ;;  %v4239_v16 = vor.u32 %v5139_v4, %v4236_v5 }
  0xdb   : > { %1614 = vmatmul.bf16.gmra.mxu3 %v4111_v19  ;;  %v4196_v19 = vld [vmem:[%s5895_s7 + $0x110] sm:$0xf0] }
  0xdc   : > { %v4199_v25 = vor.u32 %v5130_v18, %v4196_v19 }
  0xe8   : > { %1352 = vmatmul.bf16.gmra.mxu0 %v4115_v28  ;;  %v4203_v28 = vor.u32 %v5133_v21, %v4202_v20 }
  0xe9   : > { %1441 = vmatmul.bf16.gmra.mxu1 %v4119_v29  ;;  %v4207_v29 = vor.u32 %v5131_v22, %v4204_v23 }
  0xea   : > { %1530 = vmatmul.bf16.gmra.mxu2 %v4123_v30 }
  0xeb   : > { %1619 = vmatmul.bf16.gmra.mxu3 %v4127_v31 }
  0xf8   : > { %1357 = vmatmul.bf16.gmra.mxu0 %v4131_v40  ;;  %v5137_v40 = vld [vmem:[%s5895_s7 + $0x134] sm:$0xf0] }
  0xf9   : > { %1446 = vmatmul.bf16.gmra.mxu1 %v4135_v41  ;;  %v5135_v41 = vld [vmem:[%s5895_s7 + $0x12c] sm:$0xf] }
  0xfa   : > { %1535 = vmatmul.bf16.gmra.mxu2 %v4139_v42  ;;  %v4220_v42 = vld [vmem:[%s5895_s7 + $0x138] sm:$0xf0] }
  0xfb   : > { %1624 = vmatmul.bf16.gmra.mxu3 %v4143_v43 }
 0x108   : > { %1362 = vmatmul.bf16.gmra.mxu0 %v4147_v52  ;;  %v4219_v52 = vor.u32 %v5137_v40, %v4218_v39 }
 0x109   : > { %1451 = vmatmul.bf16.gmra.mxu1 %v4151_v53  ;;  %v4223_v53 = vor.u32 %v5135_v41, %v4220_v42 }
 0x10a   : > { %1540 = vmatmul.bf16.gmra.mxu2 %v4155_v54 }
 0x10b   : > { %1629 = vmatmul.bf16.gmra.mxu3 %v4159_v55 }
 0x118   : > { %1367 = vmatmul.bf16.gmra.mxu0 %v4163_v0  ;;  %v5138_v0 = vld [vmem:[%s5895_s7 + $0x144] sm:$0xf] }
 0x119   : > { %1456 = vmatmul.bf16.gmra.mxu1 %v4167_v1  ;;  %v4228_v1 = vld [vmem:[%s5895_s7 + $0x150] sm:$0xf0] }
 0x11a   : > { %1545 = vmatmul.bf16.gmra.mxu2 %v4171_v2  ;;  %v4234_v2 = vld [vmem:[%s5895_s7 + $0x148] sm:$0xf]  ;;  %v4231_v11 = vor.u32 %v5138_v0, %v4228_v1 }
 0x11b   : > { %1634 = vmatmul.bf16.gmra.mxu3 %v4175_v3  ;;  %v5141_v3 = vld [vmem:[%s5895_s7 + $0x154] sm:$0xf0] }
 0x128   : > { %1372 = vmatmul.bf16.gmra.mxu0 %v4179_v12 }
 0x129   : > { %1461 = vmatmul.bf16.gmra.mxu1 %v4183_v13 }
 0x12a   : > { %1550 = vmatmul.bf16.gmra.mxu2 %v4187_v14 }
 0x12b   : > { %1639 = vmatmul.bf16.gmra.mxu3 %v4191_v15  ;;  %v4235_v15 = vor.u32 %v5141_v3, %v4234_v2 }
 0x135   : > { %v1338_v26 = vpop.f32.mrf.mxu0 }
 0x136   : > { %v1427_v27 = vpop.f32.mrf.mxu1 }
 0x137   : > { %v1428_v34 = vadd.f32 %v1427_v27, %v1338_v26  ;;  %v5144_v26 = vld [vmem:[%s5895_s7 + $0x16c] sm:$0xf0]  ;;  %v5142_v27 = vld [vmem:[%s5895_s7 + $0x164] sm:$0xf] }
 0x138   : > { %1377 = vmatmul.bf16.gmra.mxu0 %v4195_v24 }
 0x139   : > { %1466 = vmatmul.bf16.gmra.mxu1 %v4199_v25  ;;  %v4242_v25 = vld [vmem:[%s5895_s7 + $0x160] sm:$0xf] }
 0x13a   : > { %1555 = vmatmul.bf16.gmra.mxu2 %v4203_v28  ;;  %v4244_v28 = vld [vmem:[%s5895_s7 + $0x170] sm:$0xf0]  ;;  %v4243_v37 = vor.u32 %v5144_v26, %v4242_v25 }
 0x13b   : > { %1644 = vmatmul.bf16.gmra.mxu3 %v4207_v29  ;;  %v4250_v29 = vld [vmem:[%s5895_s7 + $0x168] sm:$0xf]  ;;  %v4247_v38 = vor.u32 %v5142_v27, %v4244_v28 }
 0x13d   : > { %v1516_v30 = vpop.f32.mrf.mxu2  ;;  %v1340_v32 = vpop.f32.mrf.mxu0 }
 0x13e   : > { %v1605_v31 = vpop.f32.mrf.mxu3  ;;  %v1429_v33 = vpop.f32.mrf.mxu1  ;;  %v1517_v43 = vadd.f32 %v1516_v30, %v1428_v34  ;;  %v5145_v30 = vld [vmem:[%s5895_s7 + $0x174] sm:$0xf0] }
 0x13f   : > { %v1430_v44 = vadd.f32 %v1429_v33, %v1340_v32  ;;  %v4252_v32 = vld [vmem:[%s5895_s7 + $0x178] sm:$0xf0]  ;;  %v4251_v42 = vor.u32 %v5145_v30, %v4250_v29 }
 0x140   : > { %v1606_v54 = vadd.f32 %v1605_v31, %v1517_v43  ;;  %v5143_v31 = vld [vmem:[%s5895_s7 + $0x16c] sm:$0xf] }
 0x141   : > { %v4255_v43 = vor.u32 %v5143_v31, %v4252_v32 }
 0x145   : > { %v1518_v45 = vpop.f32.mrf.mxu2  ;;  %v1343_v50 = vpop.f32.mrf.mxu0 }
 0x146   : > { %v1607_v46 = vpop.f32.mrf.mxu3  ;;  %v1519_v49 = vadd.f32 %v1518_v45, %v1430_v44  ;;  %v1432_v51 = vpop.f32.mrf.mxu1 }
 0x147   : > { %v1433_v61 = vadd.f32 %v1432_v51, %v1343_v50 }
 0x148   : > { %v1608_v55 = vadd.f32 %v1607_v46, %v1519_v49  ;;  %1382 = vmatmul.bf16.gmra.mxu0 %v4211_v47 }
 0x149   : > { %1471 = vmatmul.bf16.gmra.mxu1 %v4215_v48 }
 0x14a   : > { %v5358_v56 = vpack.c.bf16 %v1608_v55, %v1606_v54  ;;  %1560 = vmatmul.bf16.gmra.mxu2 %v4219_v52  ;;  %v4258_v52 = vld [vmem:[%s5895_s7 + $0x180] sm:$0xf]  ;;  %v5146_v54 = vld [vmem:[%s5895_s7 + $0x184] sm:$0xf]  ;;  %v4260_v55 = vld [vmem:[%s5895_s7 + $0x190] sm:$0xf0] }
 0x14b   : > { %1649 = vmatmul.bf16.gmra.mxu3 %v4223_v53  ;;  %v5148_v53 = vld [vmem:[%s5895_s7 + $0x18c] sm:$0xf0]  ;;  %v4263_v1 = vor.u32 %v5146_v54, %v4260_v55 }
 0x14c   : > { %5359 = vst [vmem:[#allocation2 + $0x30] sm:$0xff] %v5358_v56   ;;  %v4266_v56 = vld [vmem:[%s5895_s7 + $0x188] sm:$0xf]  ;;  %v4259_v0 = vor.u32 %v5148_v53, %v4258_v52 }
 0x14d   : > { %v1521_v57 = vpop.f32.mrf.mxu2  ;;  %v1345_v59 = vpop.f32.mrf.mxu0 }
 0x14e   : > { %v1610_v58 = vpop.f32.mrf.mxu3  ;;  %v1434_v60 = vpop.f32.mrf.mxu1  ;;  %v1522_v6 = vadd.f32 %v1521_v57, %v1433_v61  ;;  %v5149_v57 = vld [vmem:[%s5895_s7 + $0x194] sm:$0xf0] }
 0x14f   : > { %v1435_v7 = vadd.f32 %v1434_v60, %v1345_v59  ;;  %v4268_v59 = vld [vmem:[%s5895_s7 + $0x198] sm:$0xf0]  ;;  %v4267_v5 = vor.u32 %v5149_v57, %v4266_v56 }
 0x150   : > { %v1611_v17 = vadd.f32 %v1610_v58, %v1522_v6  ;;  %v5147_v58 = vld [vmem:[%s5895_s7 + $0x18c] sm:$0xf] }
 0x151   : > { %v4271_v6 = vor.u32 %v5147_v58, %v4268_v59 }
 0x155   : > { %v1523_v8 = vpop.f32.mrf.mxu2  ;;  %v1348_v13 = vpop.f32.mrf.mxu0 }
 0x156   : > { %v1612_v9 = vpop.f32.mrf.mxu3  ;;  %v1524_v12 = vadd.f32 %v1523_v8, %v1435_v7  ;;  %v1437_v14 = vpop.f32.mrf.mxu1 }
 0x157   : > { %v1438_v24 = vadd.f32 %v1437_v14, %v1348_v13 }
 0x158   : > { %v1613_v18 = vadd.f32 %v1612_v9, %v1524_v12  ;;  %1387 = vmatmul.bf16.gmra.mxu0 %v4227_v10 }
 0x159   : > { %1476 = vmatmul.bf16.gmra.mxu1 %v4231_v11 }
 0x15a   : > { %v5363_v19 = vpack.c.bf16 %v1613_v18, %v1611_v17  ;;  %1565 = vmatmul.bf16.gmra.mxu2 %v4235_v15  ;;  %v4274_v15 = vld [vmem:[%s5895_s7 + $0x1a0] sm:$0xf]  ;;  %v5150_v17 = vld [vmem:[%s5895_s7 + $0x1a4] sm:$0xf]  ;;  %v4276_v18 = vld [vmem:[%s5895_s7 + $0x1b0] sm:$0xf0] }
 0x15b   : > { %1654 = vmatmul.bf16.gmra.mxu3 %v4239_v16  ;;  %v5152_v16 = vld [vmem:[%s5895_s7 + $0x1ac] sm:$0xf0]  ;;  %v4279_v28 = vor.u32 %v5150_v17, %v4276_v18 }
 0x15c   : > { %5435 = vst [vmem:[#allocation2] sm:$0xff] %v5363_v19   ;;  %v4282_v19 = vld [vmem:[%s5895_s7 + $0x1a8] sm:$0xf]  ;;  %v4275_v27 = vor.u32 %v5152_v16, %v4274_v15 }
 0x15d   : > { %v1526_v20 = vpop.f32.mrf.mxu2  ;;  %v1350_v22 = vpop.f32.mrf.mxu0 }
 0x15e   : > { %v1615_v21 = vpop.f32.mrf.mxu3  ;;  %v1439_v23 = vpop.f32.mrf.mxu1  ;;  %v1527_v33 = vadd.f32 %v1526_v20, %v1438_v24  ;;  %v5153_v20 = vld [vmem:[%s5895_s7 + $0x1b4] sm:$0xf0] }
 0x15f   : > { %v1440_v34 = vadd.f32 %v1439_v23, %v1350_v22  ;;  %v4284_v22 = vld [vmem:[%s5895_s7 + $0x1b8] sm:$0xf0]  ;;  %v4283_v32 = vor.u32 %v5153_v20, %v4282_v19 }
 0x160   : > { %v1616_v44 = vadd.f32 %v1615_v21, %v1527_v33  ;;  %v5151_v21 = vld [vmem:[%s5895_s7 + $0x1ac] sm:$0xf] }
 0x161   : > { %v4287_v33 = vor.u32 %v5151_v21, %v4284_v22 }
 0x165   : > { %v1528_v35 = vpop.f32.mrf.mxu2  ;;  %v1353_v40 = vpop.f32.mrf.mxu0 }
 0x166   : > { %v1617_v36 = vpop.f32.mrf.mxu3  ;;  %v1529_v39 = vadd.f32 %v1528_v35, %v1440_v34  ;;  %v1442_v41 = vpop.f32.mrf.mxu1 }
 0x167   : > { %v1443_v51 = vadd.f32 %v1442_v41, %v1353_v40 }
 0x168   : > { %v1618_v45 = vadd.f32 %v1617_v36, %v1529_v39  ;;  %1392 = vmatmul.bf16.gmra.mxu0 %v4243_v37 }
 0x169   : > { %1481 = vmatmul.bf16.gmra.mxu1 %v4247_v38 }
 0x16a   : > { %v5368_v46 = vpack.c.bf16 %v1618_v45, %v1616_v44  ;;  %1570 = vmatmul.bf16.gmra.mxu2 %v4251_v42  ;;  %v4290_v42 = vld [vmem:[%s5895_s7 + $0x1c0] sm:$0xf]  ;;  %v5154_v44 = vld [vmem:[%s5895_s7 + $0x1c4] sm:$0xf]  ;;  %v4292_v45 = vld [vmem:[%s5895_s7 + $0x1d0] sm:$0xf0] }
 0x16b   : > { %1659 = vmatmul.bf16.gmra.mxu3 %v4255_v43  ;;  %v5156_v43 = vld [vmem:[%s5895_s7 + $0x1cc] sm:$0xf0]  ;;  %v4295_v55 = vor.u32 %v5154_v44, %v4292_v45 }
 0x16c   : > { %5436 = vst [vmem:[#allocation2 + $0x58] sm:$0xff] %v5368_v46   ;;  %v4298_v46 = vld [vmem:[%s5895_s7 + $0x1c8] sm:$0xf]  ;;  %v4291_v54 = vor.u32 %v5156_v43, %v4290_v42 }
 0x16d   : > { %v1531_v47 = vpop.f32.mrf.mxu2  ;;  %v1355_v49 = vpop.f32.mrf.mxu0 }
 0x16e   : > { %v1620_v48 = vpop.f32.mrf.mxu3  ;;  %v1444_v50 = vpop.f32.mrf.mxu1  ;;  %v1532_v60 = vadd.f32 %v1531_v47, %v1443_v51  ;;  %v5157_v47 = vld [vmem:[%s5895_s7 + $0x1d4] sm:$0xf0] }
 0x16f   : > { %v1445_v61 = vadd.f32 %v1444_v50, %v1355_v49  ;;  %v4300_v49 = vld [vmem:[%s5895_s7 + $0x1d8] sm:$0xf0]  ;;  %v4299_v59 = vor.u32 %v5157_v47, %v4298_v46 }
 0x170   : > { %v1621_v7 = vadd.f32 %v1620_v48, %v1532_v60  ;;  %v5155_v48 = vld [vmem:[%s5895_s7 + $0x1cc] sm:$0xf] }
 0x171   : > { %v4303_v60 = vor.u32 %v5155_v48, %v4300_v49 }
 0x175   : > { %v1533_v62 = vpop.f32.mrf.mxu2  ;;  %v1358_v3 = vpop.f32.mrf.mxu0 }
 0x176   : > { %v1622_v63 = vpop.f32.mrf.mxu3  ;;  %v1534_v2 = vadd.f32 %v1533_v62, %v1445_v61  ;;  %v1447_v4 = vpop.f32.mrf.mxu1 }
 0x177   : > { %v1448_v14 = vadd.f32 %v1447_v4, %v1358_v3 }
 0x178   : > { %v1623_v8 = vadd.f32 %v1622_v63, %v1534_v2  ;;  %1397 = vmatmul.bf16.gmra.mxu0 %v4259_v0 }
 0x179   : > { %1486 = vmatmul.bf16.gmra.mxu1 %v4263_v1 }
 0x17a   : > { %v5373_v9 = vpack.c.bf16 %v1623_v8, %v1621_v7  ;;  %1575 = vmatmul.bf16.gmra.mxu2 %v4267_v5  ;;  %v4306_v5 = vld [vmem:[%s5895_s7 + $0x1e0] sm:$0xf]  ;;  %v5158_v7 = vld [vmem:[%s5895_s7 + $0x1e4] sm:$0xf]  ;;  %v4308_v8 = vld [vmem:[%s5895_s7 + $0x1f0] sm:$0xf0] }
 0x17b   : > { %1664 = vmatmul.bf16.gmra.mxu3 %v4271_v6  ;;  %v5160_v6 = vld [vmem:[%s5895_s7 + $0x1ec] sm:$0xf0]  ;;  %v4311_v18 = vor.u32 %v5158_v7, %v4308_v8 }
 0x17c   : > { %5437 = vst [vmem:[#allocation2 + $0x18] sm:$0xff] %v5373_v9   ;;  %v4314_v9 = vld [vmem:[%s5895_s7 + $0x1e8] sm:$0xf]  ;;  %v4307_v17 = vor.u32 %v5160_v6, %v4306_v5 }
 0x17d   : > { %v1536_v10 = vpop.f32.mrf.mxu2  ;;  %v1360_v12 = vpop.f32.mrf.mxu0 }
 0x17e   : > { %v1625_v11 = vpop.f32.mrf.mxu3  ;;  %v1449_v13 = vpop.f32.mrf.mxu1  ;;  %v1537_v23 = vadd.f32 %v1536_v10, %v1448_v14  ;;  %v5161_v10 = vld [vmem:[%s5895_s7 + $0x1f4] sm:$0xf0] }
 0x17f   : > { %v1450_v24 = vadd.f32 %v1449_v13, %v1360_v12  ;;  %v4316_v12 = vld [vmem:[%s5895_s7 + $0x1f8] sm:$0xf0]  ;;  %v4315_v22 = vor.u32 %v5161_v10, %v4314_v9 }
 0x180   : > { %v1626_v34 = vadd.f32 %v1625_v11, %v1537_v23  ;;  %v5159_v11 = vld [vmem:[%s5895_s7 + $0x1ec] sm:$0xf] }
 0x181   : > { %v4319_v23 = vor.u32 %v5159_v11, %v4316_v12 }
 0x185   : > { %v1538_v25 = vpop.f32.mrf.mxu2  ;;  %v1363_v30 = vpop.f32.mrf.mxu0 }
 0x186   : > { %v1627_v26 = vpop.f32.mrf.mxu3  ;;  %v1539_v29 = vadd.f32 %v1538_v25, %v1450_v24  ;;  %v1452_v31 = vpop.f32.mrf.mxu1 }
 0x187   : > { %v1453_v41 = vadd.f32 %v1452_v31, %v1363_v30 }
 0x188   : > { %v1628_v35 = vadd.f32 %v1627_v26, %v1539_v29  ;;  %1402 = vmatmul.bf16.gmra.mxu0 %v4275_v27 }
 0x189   : > { %1491 = vmatmul.bf16.gmra.mxu1 %v4279_v28 }
 0x18a   : > { %v5378_v36 = vpack.c.bf16 %v1628_v35, %v1626_v34  ;;  %1580 = vmatmul.bf16.gmra.mxu2 %v4283_v32 }
 0x18b   : > { %1669 = vmatmul.bf16.gmra.mxu3 %v4287_v33 }
 0x18c   : > { %5438 = vst [vmem:[#allocation2 + $0x50] sm:$0xff] %v5378_v36  }
 0x18d   : > { %v1541_v37 = vpop.f32.mrf.mxu2  ;;  %v1365_v39 = vpop.f32.mrf.mxu0 }
 0x18e   : > { %v1630_v38 = vpop.f32.mrf.mxu3  ;;  %v1454_v40 = vpop.f32.mrf.mxu1  ;;  %v1542_v50 = vadd.f32 %v1541_v37, %v1453_v41 }
 0x18f   : > { %v1455_v51 = vadd.f32 %v1454_v40, %v1365_v39 }
 0x190   : > { %v1631_v61 = vadd.f32 %v1630_v38, %v1542_v50 }
 0x195   : > { %v1543_v52 = vpop.f32.mrf.mxu2  ;;  %v1368_v57 = vpop.f32.mrf.mxu0 }
 0x196   : > { %v1632_v53 = vpop.f32.mrf.mxu3  ;;  %v1544_v56 = vadd.f32 %v1543_v52, %v1455_v51  ;;  %v1457_v58 = vpop.f32.mrf.mxu1 }
 0x197   : > { %v1458_v4 = vadd.f32 %v1457_v58, %v1368_v57 }
 0x198   : > { %v1633_v62 = vadd.f32 %v1632_v53, %v1544_v56  ;;  %1407 = vmatmul.bf16.gmra.mxu0 %v4291_v54 }
 0x199   : > { %1496 = vmatmul.bf16.gmra.mxu1 %v4295_v55 }
 0x19a   : > { %v5383_v63 = vpack.c.bf16 %v1633_v62, %v1631_v61  ;;  %1585 = vmatmul.bf16.gmra.mxu2 %v4299_v59 }
 0x19b   : > { %1674 = vmatmul.bf16.gmra.mxu3 %v4303_v60 }
 0x19c   : > { %5439 = vst [vmem:[#allocation2 + $0x68] sm:$0xff] %v5383_v63  }
 0x19d   : > { %v1546_v0 = vpop.f32.mrf.mxu2  ;;  %v1370_v2 = vpop.f32.mrf.mxu0 }
 0x19e   : > { %v1635_v1 = vpop.f32.mrf.mxu3  ;;  %v1459_v3 = vpop.f32.mrf.mxu1  ;;  %v1547_v13 = vadd.f32 %v1546_v0, %v1458_v4 }
 0x19f   : > { %v1460_v14 = vadd.f32 %v1459_v3, %v1370_v2 }
 0x1a0   : > { %v1636_v24 = vadd.f32 %v1635_v1, %v1547_v13 }
 0x1a5   : > { %v1548_v15 = vpop.f32.mrf.mxu2  ;;  %v1373_v20 = vpop.f32.mrf.mxu0 }
 0x1a6   : > { %v1637_v16 = vpop.f32.mrf.mxu3  ;;  %v1549_v19 = vadd.f32 %v1548_v15, %v1460_v14  ;;  %v1462_v21 = vpop.f32.mrf.mxu1 }
 0x1a7   : > { %v1463_v31 = vadd.f32 %v1462_v21, %v1373_v20 }
 0x1a8   : > { %v1638_v25 = vadd.f32 %v1637_v16, %v1549_v19  ;;  %1412 = vmatmul.bf16.gmra.mxu0 %v4307_v17 }
 0x1a9   : > { %1501 = vmatmul.bf16.gmra.mxu1 %v4311_v18 }
 0x1aa   : > { %v5388_v26 = vpack.c.bf16 %v1638_v25, %v1636_v24  ;;  %1590 = vmatmul.bf16.gmra.mxu2 %v4315_v22 }
 0x1ab   : > { %1679 = vmatmul.bf16.gmra.mxu3 %v4319_v23 }
 0x1ac   : > { %5440 = vst [vmem:[#allocation2 + $0x8] sm:$0xff] %v5388_v26  }
 0x1ad   : > { %v1551_v27 = vpop.f32.mrf.mxu2  ;;  %v1375_v29 = vpop.f32.mrf.mxu0 }
 0x1ae   : > { %v1640_v28 = vpop.f32.mrf.mxu3  ;;  %v1464_v30 = vpop.f32.mrf.mxu1  ;;  %v1552_v32 = vadd.f32 %v1551_v27, %v1463_v31 }
 0x1af   : > { %v1465_v33 = vadd.f32 %v1464_v30, %v1375_v29 }
 0x1b0   : > { %v1641_v39 = vadd.f32 %v1640_v28, %v1552_v32 }
 0x1b5   : > { %v1553_v34 = vpop.f32.mrf.mxu2  ;;  %v1378_v37 = vpop.f32.mrf.mxu0 }
 0x1b6   : > { %v1642_v35 = vpop.f32.mrf.mxu3  ;;  %v1554_v36 = vadd.f32 %v1553_v34, %v1465_v33  ;;  %v1467_v38 = vpop.f32.mrf.mxu1 }
 0x1b7   : > { %v1468_v46 = vadd.f32 %v1467_v38, %v1378_v37 }
 0x1b8   : > { %v1643_v40 = vadd.f32 %v1642_v35, %v1554_v36 }
 0x1ba   : > { %v5393_v41 = vpack.c.bf16 %v1643_v40, %v1641_v39 }
 0x1bc   : > { %5441 = vst [vmem:[#allocation2 + $0x48] sm:$0xff] %v5393_v41  }
 0x1bd   : > { %v1556_v42 = vpop.f32.mrf.mxu2  ;;  %v1380_v44 = vpop.f32.mrf.mxu0 }
 0x1be   : > { %v1645_v43 = vpop.f32.mrf.mxu3  ;;  %v1469_v45 = vpop.f32.mrf.mxu1  ;;  %v1557_v47 = vadd.f32 %v1556_v42, %v1468_v46 }
 0x1bf   : > { %v1470_v48 = vadd.f32 %v1469_v45, %v1380_v44 }
 0x1c0   : > { %v1646_v54 = vadd.f32 %v1645_v43, %v1557_v47 }
 0x1c5   : > { %v1558_v49 = vpop.f32.mrf.mxu2  ;;  %v1383_v52 = vpop.f32.mrf.mxu0 }
 0x1c6   : > { %v1647_v50 = vpop.f32.mrf.mxu3  ;;  %v1559_v51 = vadd.f32 %v1558_v49, %v1470_v48  ;;  %v1472_v53 = vpop.f32.mrf.mxu1 }
 0x1c7   : > { %v1473_v61 = vadd.f32 %v1472_v53, %v1383_v52 }
 0x1c8   : > { %v1648_v55 = vadd.f32 %v1647_v50, %v1559_v51 }
 0x1ca   : > { %v5398_v56 = vpack.c.bf16 %v1648_v55, %v1646_v54 }
 0x1cc   : > { %5442 = vst [vmem:[#allocation2 + $0x40] sm:$0xff] %v5398_v56  }
 0x1cd   : > { %v1561_v57 = vpop.f32.mrf.mxu2  ;;  %v1385_v59 = vpop.f32.mrf.mxu0 }
 0x1ce   : > { %v1650_v58 = vpop.f32.mrf.mxu3  ;;  %v1474_v60 = vpop.f32.mrf.mxu1  ;;  %v1562_v62 = vadd.f32 %v1561_v57, %v1473_v61 }
 0x1cf   : > { %v1475_v63 = vadd.f32 %v1474_v60, %v1385_v59 }
 0x1d0   : > { %v1651_v5 = vadd.f32 %v1650_v58, %v1562_v62 }
 0x1d5   : > { %v1563_v0 = vpop.f32.mrf.mxu2  ;;  %v1388_v3 = vpop.f32.mrf.mxu0 }
 0x1d6   : > { %v1652_v1 = vpop.f32.mrf.mxu3  ;;  %v1564_v2 = vadd.f32 %v1563_v0, %v1475_v63  ;;  %v1477_v4 = vpop.f32.mrf.mxu1 }
 0x1d7   : > { %v1478_v12 = vadd.f32 %v1477_v4, %v1388_v3 }
 0x1d8   : > { %v1653_v6 = vadd.f32 %v1652_v1, %v1564_v2 }
 0x1da   : > { %v5403_v7 = vpack.c.bf16 %v1653_v6, %v1651_v5 }
 0x1dc   : > { %5443 = vst [vmem:[#allocation2 + $0x20] sm:$0xff] %v5403_v7  }
 0x1dd   : > { %v1566_v8 = vpop.f32.mrf.mxu2  ;;  %v1390_v10 = vpop.f32.mrf.mxu0 }
 0x1de   : > { %v1655_v9 = vpop.f32.mrf.mxu3  ;;  %v1479_v11 = vpop.f32.mrf.mxu1  ;;  %v1567_v13 = vadd.f32 %v1566_v8, %v1478_v12 }
 0x1df   : > { %v1480_v14 = vadd.f32 %v1479_v11, %v1390_v10 }
 0x1e0   : > { %v1656_v20 = vadd.f32 %v1655_v9, %v1567_v13 }
 0x1e5   : > { %v1568_v15 = vpop.f32.mrf.mxu2  ;;  %v1393_v18 = vpop.f32.mrf.mxu0 }
 0x1e6   : > { %v1657_v16 = vpop.f32.mrf.mxu3  ;;  %v1569_v17 = vadd.f32 %v1568_v15, %v1480_v14  ;;  %v1482_v19 = vpop.f32.mrf.mxu1 }
 0x1e7   : > { %v1483_v27 = vadd.f32 %v1482_v19, %v1393_v18 }
 0x1e8   : > { %v1658_v21 = vadd.f32 %v1657_v16, %v1569_v17 }
 0x1ea   : > { %v5408_v22 = vpack.c.bf16 %v1658_v21, %v1656_v20 }
 0x1ec   : > { %5444 = vst [vmem:[#allocation2 + $0x10] sm:$0xff] %v5408_v22  }
 0x1ed   : > { %v1571_v23 = vpop.f32.mrf.mxu2  ;;  %v1395_v25 = vpop.f32.mrf.mxu0 }
 0x1ee   : > { %v1660_v24 = vpop.f32.mrf.mxu3  ;;  %v1484_v26 = vpop.f32.mrf.mxu1  ;;  %v1572_v28 = vadd.f32 %v1571_v23, %v1483_v27 }
 0x1ef   : > { %v1485_v29 = vadd.f32 %v1484_v26, %v1395_v25 }
 0x1f0   : > { %v1661_v35 = vadd.f32 %v1660_v24, %v1572_v28 }
 0x1f5   : > { %v1573_v30 = vpop.f32.mrf.mxu2  ;;  %v1398_v33 = vpop.f32.mrf.mxu0 }
 0x1f6   : > { %v1662_v31 = vpop.f32.mrf.mxu3  ;;  %v1574_v32 = vadd.f32 %v1573_v30, %v1485_v29  ;;  %v1487_v34 = vpop.f32.mrf.mxu1 }
 0x1f7   : > { %v1488_v42 = vadd.f32 %v1487_v34, %v1398_v33 }
 0x1f8   : > { %v1663_v36 = vadd.f32 %v1662_v31, %v1574_v32 }
 0x1fa   : > { %v5413_v37 = vpack.c.bf16 %v1663_v36, %v1661_v35 }
 0x1fc   : > { %5445 = vst [vmem:[#allocation2 + $0x38] sm:$0xff] %v5413_v37  }
 0x1fd   : > { %v1576_v38 = vpop.f32.mrf.mxu2  ;;  %v1400_v40 = vpop.f32.mrf.mxu0 }
 0x1fe   : > { %v1665_v39 = vpop.f32.mrf.mxu3  ;;  %v1489_v41 = vpop.f32.mrf.mxu1  ;;  %v1577_v43 = vadd.f32 %v1576_v38, %v1488_v42 }
 0x1ff   : > { %v1490_v44 = vadd.f32 %v1489_v41, %v1400_v40 }
 0x200   : > { %v1666_v50 = vadd.f32 %v1665_v39, %v1577_v43 }
 0x205   : > { %v1578_v45 = vpop.f32.mrf.mxu2  ;;  %v1403_v48 = vpop.f32.mrf.mxu0 }
 0x206   : > { %v1667_v46 = vpop.f32.mrf.mxu3  ;;  %v1579_v47 = vadd.f32 %v1578_v45, %v1490_v44  ;;  %v1492_v49 = vpop.f32.mrf.mxu1 }
 0x207   : > { %v1493_v57 = vadd.f32 %v1492_v49, %v1403_v48 }
 0x208   : > { %v1668_v51 = vadd.f32 %v1667_v46, %v1579_v47 }
 0x20a   : > { %v5418_v52 = vpack.c.bf16 %v1668_v51, %v1666_v50 }
 0x20c   : > { %5446 = vst [vmem:[#allocation2 + $0x60] sm:$0xff] %v5418_v52  }
 0x20d   : > { %v1581_v53 = vpop.f32.mrf.mxu2  ;;  %v1405_v55 = vpop.f32.mrf.mxu0 }
 0x20e   : > { %v1670_v54 = vpop.f32.mrf.mxu3  ;;  %v1494_v56 = vpop.f32.mrf.mxu1  ;;  %v1582_v58 = vadd.f32 %v1581_v53, %v1493_v57 }
 0x20f   : > { %v1495_v59 = vadd.f32 %v1494_v56, %v1405_v55 }
 0x210   : > { %v1671_v1 = vadd.f32 %v1670_v54, %v1582_v58 }
 0x215   : > { %v1583_v60 = vpop.f32.mrf.mxu2  ;;  %v1408_v63 = vpop.f32.mrf.mxu0 }
 0x216   : > { %v1672_v61 = vpop.f32.mrf.mxu3  ;;  %v1584_v62 = vadd.f32 %v1583_v60, %v1495_v59  ;;  %v1497_v0 = vpop.f32.mrf.mxu1 }
 0x217   : > { %v1498_v8 = vadd.f32 %v1497_v0, %v1408_v63 }
 0x218   : > { %v1673_v2 = vadd.f32 %v1672_v61, %v1584_v62 }
 0x21a   : > { %v5423_v3 = vpack.c.bf16 %v1673_v2, %v1671_v1 }
 0x21c   : > { %5447 = vst [vmem:[#allocation2 + $0x70] sm:$0xff] %v5423_v3  }
 0x21d   : > { %v1586_v4 = vpop.f32.mrf.mxu2  ;;  %v1410_v6 = vpop.f32.mrf.mxu0 }
 0x21e   : > { %v1675_v5 = vpop.f32.mrf.mxu3  ;;  %v1499_v7 = vpop.f32.mrf.mxu1  ;;  %v1587_v9 = vadd.f32 %v1586_v4, %v1498_v8 }
 0x21f   : > { %v1500_v10 = vadd.f32 %v1499_v7, %v1410_v6 }
 0x220   : > { %v1676_v16 = vadd.f32 %v1675_v5, %v1587_v9 }
 0x225   : > { %v1588_v11 = vpop.f32.mrf.mxu2  ;;  %v1413_v14 = vpop.f32.mrf.mxu0 }
 0x226   : > { %v1677_v12 = vpop.f32.mrf.mxu3  ;;  %v1589_v13 = vadd.f32 %v1588_v11, %v1500_v10  ;;  %v1502_v15 = vpop.f32.mrf.mxu1 }
 0x227   : > { %v1503_v21 = vadd.f32 %v1502_v15, %v1413_v14 }
 0x228   : > { %v1678_v17 = vadd.f32 %v1677_v12, %v1589_v13 }
 0x22a   : > { %v5428_v18 = vpack.c.bf16 %v1678_v17, %v1676_v16 }
 0x22c   : > { %5448 = vst [vmem:[#allocation2 + $0x78] sm:$0xff] %v5428_v18  }
 0x22d   : > { %v1591_v19 = vpop.f32.mrf.mxu2  ;;  %v1415_v22 = vpop.f32.mrf.mxu0 }
 0x22e   : > { %v1680_v20 = vpop.f32.mrf.mxu3  ;;  %v1504_v23 = vpop.f32.mrf.mxu1  ;;  %v1592_v24 = vadd.f32 %v1591_v19, %v1503_v21 }
 0x22f   : > { %v1505_v25 = vadd.f32 %v1504_v23, %v1415_v22 }
 0x230   : > { %v1681_v29 = vadd.f32 %v1680_v20, %v1592_v24 }
 0x235   : > { %v1593_v26 = vpop.f32.mrf.mxu2 }
 0x236   : > { %v1594_v27 = vadd.f32 %v1593_v26, %v1505_v25  ;;  %v1682_v28 = vpop.f32.mrf.mxu3 }
 0x238   : > { %v1683_v30 = vadd.f32 %v1682_v28, %v1594_v27 }
 0x23a   : > { %v5433_v31 = vpack.c.bf16 %v1683_v30, %v1681_v29 }
 0x23c   : > { %5449 = vst [vmem:[#allocation2 + $0x28] sm:$0xff] %v5433_v31  }
 0x23d PF: > { %v4762_v32 = vld [vmem:[%s5904_s27 + $0x70] sm:$0xf]  ;;  %v5273_v33 = vld [vmem:[%s5904_s27 + $0x74] sm:$0xf0]  ;;  %v4754_v37 = vld [vmem:[%s5904_s27 + $0x60] sm:$0xf] }
 0x23e   : > { %v4826_v34 = vld [vmem:[%s5904_s27 + $0xf0] sm:$0xf]  ;;  %v4763_v35 = vor.u32 %v5273_v33, %v4762_v32  ;;  %v5289_v36 = vld [vmem:[%s5904_s27 + $0xf4] sm:$0xf0]  ;;  %v5271_v38 = vld [vmem:[%s5904_s27 + $0x64] sm:$0xf0] }
 0x23f   : > { %v4827_v39 = vor.u32 %v5289_v36, %v4826_v34  ;;  %v4818_v40 = vld [vmem:[%s5904_s27 + $0xe0] sm:$0xf]  ;;  %v5287_v41 = vld [vmem:[%s5904_s27 + $0xe4] sm:$0xf0]  ;;  %v4755_v42 = vor.u32 %v5271_v38, %v4754_v37  ;;  %v4746_v44 = vld [vmem:[%s5904_s27 + $0x50] sm:$0xf] }
 0x240   : > { %2523 = vmatpush.bf16.msra.mxu0 %v4763_v35  ;;  %5450 = vmatpush.bf16.msra.mxu2 %v4763_v35  ;;  %v4819_v43 = vor.u32 %v5287_v41, %v4818_v40  ;;  %v5269_v45 = vld [vmem:[%s5904_s27 + $0x54] sm:$0xf0]  ;;  %v4810_v46 = vld [vmem:[%s5904_s27 + $0xd0] sm:$0xf]  ;;  %v4738_v50 = vld [vmem:[%s5904_s27 + $0x40] sm:$0xf] }
 0x241   : > { %5458 = vmatpush.bf16.msra.mxu3 %v4827_v39  ;;  %2612 = vmatpush.bf16.msra.mxu1 %v4827_v39  ;;  %v5285_v47 = vld [vmem:[%s5904_s27 + $0xd4] sm:$0xf0]  ;;  %v4747_v48 = vor.u32 %v5269_v45, %v4746_v44  ;;  %v5267_v51 = vld [vmem:[%s5904_s27 + $0x44] sm:$0xf0]  ;;  %v4802_v52 = vld [vmem:[%s5904_s27 + $0xc0] sm:$0xf] }
 0x242   : > { %v4811_v49 = vor.u32 %v5285_v47, %v4810_v46  ;;  %v5283_v53 = vld [vmem:[%s5904_s27 + $0xc4] sm:$0xf0]  ;;  %v4739_v54 = vor.u32 %v5267_v51, %v4738_v50  ;;  %v4730_v56 = vld [vmem:[%s5904_s27 + $0x30] sm:$0xf]  ;;  %v5265_v57 = vld [vmem:[%s5904_s27 + $0x34] sm:$0xf0] }
 0x243   : > { %v4803_v55 = vor.u32 %v5283_v53, %v4802_v52  ;;  %v4794_v58 = vld [vmem:[%s5904_s27 + $0xb0] sm:$0xf]  ;;  %v5281_v59 = vld [vmem:[%s5904_s27 + $0xb4] sm:$0xf0]  ;;  %v4731_v60 = vor.u32 %v5265_v57, %v4730_v56  ;;  %v4722_v62 = vld [vmem:[%s5904_s27 + $0x20] sm:$0xf] }
 0x244   : > { %2524 = vmatpush.bf16.msra.mxu0 %v4755_v42  ;;  %5451 = vmatpush.bf16.msra.mxu2 %v4755_v42  ;;  %v4795_v61 = vor.u32 %v5281_v59, %v4794_v58  ;;  %v5263_v63 = vld [vmem:[%s5904_s27 + $0x24] sm:$0xf0]  ;;  %v4786_v0 = vld [vmem:[%s5904_s27 + $0xa0] sm:$0xf]  ;;  %v4714_v4 = vld [vmem:[%s5904_s27 + $0x10] sm:$0xf] }
 0x245   : > { %5459 = vmatpush.bf16.msra.mxu3 %v4819_v43  ;;  %2613 = vmatpush.bf16.msra.mxu1 %v4819_v43  ;;  %v5279_v1 = vld [vmem:[%s5904_s27 + $0xa4] sm:$0xf0]  ;;  %v4723_v2 = vor.u32 %v5263_v63, %v4722_v62  ;;  %v5261_v5 = vld [vmem:[%s5904_s27 + $0x14] sm:$0xf0]  ;;  %v4778_v6 = vld [vmem:[%s5904_s27 + $0x90] sm:$0xf] }
 0x246   : > { %v4787_v3 = vor.u32 %v5279_v1, %v4786_v0  ;;  %v5277_v7 = vld [vmem:[%s5904_s27 + $0x94] sm:$0xf0]  ;;  %v4715_v8 = vor.u32 %v5261_v5, %v4714_v4  ;;  %v4706_v9 = vld [vmem:[%s5904_s27] sm:$0xf]  ;;  %v5259_v11 = vld [vmem:[%s5904_s27 + $0x4] sm:$0xf0] }
 0x247   : > { %v4779_v10 = vor.u32 %v5277_v7, %v4778_v6  ;;  %v4770_v12 = vld [vmem:[%s5904_s27 + $0x80] sm:$0xf]  ;;  %v5275_v13 = vld [vmem:[%s5904_s27 + $0x84] sm:$0xf0]  ;;  %v5196_v15 = vld [vmem:[%s5895_s7 + $0xc] sm:$0xf0]  ;;  %v4707_v22 = vor.u32 %v5259_v11, %v4706_v9 }
 0x248   : > { %2525 = vmatpush.bf16.msra.mxu0 %v4747_v48  ;;  %5452 = vmatpush.bf16.msra.mxu2 %v4747_v48  ;;  %v4450_v14 = vld [vmem:[%s5895_s7] sm:$0xf]  ;;  %v5228_v17 = vld [vmem:[%s5895_s7 + $0x10c] sm:$0xf0]  ;;  %v5305_v19 = vld [vmem:[%s5904_s27 + $0x174] sm:$0xf0]  ;;  %v4771_v26 = vor.u32 %v5275_v13, %v4770_v12 }
 0x249   : > { %5460 = vmatpush.bf16.msra.mxu3 %v4811_v49  ;;  %2614 = vmatpush.bf16.msra.mxu1 %v4811_v49  ;;  %v4578_v16 = vld [vmem:[%s5895_s7 + $0x100] sm:$0xf]  ;;  %v4890_v18 = vld [vmem:[%s5904_s27 + $0x170] sm:$0xf]  ;;  %v5321_v21 = vld [vmem:[%s5904_s27 + $0x1f4] sm:$0xf0]  ;;  %v6184_v35 = vor.u32 %v5196_v15, %v4450_v14 }
 0x24a   : > { %v4954_v20 = vld [vmem:[%s5904_s27 + $0x1f0] sm:$0xf]  ;;  %v5226_v23 = vld [vmem:[%s5895_s7 + $0x104] sm:$0xf]  ;;  %v4580_v24 = vld [vmem:[%s5895_s7 + $0x110] sm:$0xf0]  ;;  %v4891_v30 = vor.u32 %v5305_v19, %v4890_v18  ;;  %v6186_v36 = vor.u32 %v5228_v17, %v4578_v16 }
 0x24b   : > { %v5194_v25 = vld [vmem:[%s5895_s7 + $0x4] sm:$0xf]  ;;  %v4452_v27 = vld [vmem:[%s5895_s7 + $0x10] sm:$0xf0]  ;;  %v4764_v29 = vld [vmem:[%s5904_s27 + $0x78] sm:$0xf0]  ;;  %v4955_v31 = vor.u32 %v5321_v21, %v4954_v20  ;;  %v6191_v40 = vor.u32 %v5226_v23, %v4580_v24 }
 0x24c   : > { %2526 = vmatpush.bf16.msra.mxu0 %v4739_v54  ;;  %5453 = vmatpush.bf16.msra.mxu2 %v4739_v54  ;;  %v5272_v28 = vld [vmem:[%s5904_s27 + $0x74] sm:$0xf]  ;;  %v4828_v33 = vld [vmem:[%s5904_s27 + $0xf8] sm:$0xf0]  ;;  %v4882_v34 = vld [vmem:[%s5904_s27 + $0x160] sm:$0xf]  ;;  %v6193_v41 = vor.u32 %v5194_v25, %v4452_v27 }
 0x24d   : > { %5461 = vmatpush.bf16.msra.mxu3 %v4803_v55  ;;  %2615 = vmatpush.bf16.msra.mxu1 %v4803_v55  ;;  %v5288_v32 = vld [vmem:[%s5904_s27 + $0xf4] sm:$0xf]  ;;  %v5303_v37 = vld [vmem:[%s5904_s27 + $0x164] sm:$0xf0]  ;;  %v4946_v38 = vld [vmem:[%s5904_s27 + $0x1e0] sm:$0xf]  ;;  %v4767_v42 = vor.u32 %v5272_v28, %v4764_v29 }
 0x24e   : > { %v5319_v39 = vld [vmem:[%s5904_s27 + $0x1e4] sm:$0xf0]  ;;  %v4831_v43 = vor.u32 %v5288_v32, %v4828_v33  ;;  %v5270_v44 = vld [vmem:[%s5904_s27 + $0x64] sm:$0xf]  ;;  %v4883_v45 = vor.u32 %v5303_v37, %v4882_v34  ;;  %v4756_v47 = vld [vmem:[%s5904_s27 + $0x68] sm:$0xf0] }
 0x24f   : > { %v4947_v46 = vor.u32 %v5319_v39, %v4946_v38  ;;  %v5286_v48 = vld [vmem:[%s5904_s27 + $0xe4] sm:$0xf]  ;;  %v4820_v49 = vld [vmem:[%s5904_s27 + $0xe8] sm:$0xf0]  ;;  %v4874_v50 = vld [vmem:[%s5904_s27 + $0x150] sm:$0xf]  ;;  %v4759_v53 = vor.u32 %v5270_v44, %v4756_v47 }
 0x250   : > { %2527 = vmatpush.bf16.msra.mxu0 %v4731_v60  ;;  %5454 = vmatpush.bf16.msra.mxu2 %v4731_v60  ;;  %v5301_v51 = vld [vmem:[%s5904_s27 + $0x154] sm:$0xf0]  ;;  %v4938_v52 = vld [vmem:[%s5904_s27 + $0x1d0] sm:$0xf]  ;;  %v4823_v54 = vor.u32 %v5286_v48, %v4820_v49  ;;  %v5268_v56 = vld [vmem:[%s5904_s27 + $0x54] sm:$0xf] }
 0x251   : > { %5462 = vmatpush.bf16.msra.mxu3 %v4795_v61  ;;  %2616 = vmatpush.bf16.msra.mxu1 %v4795_v61  ;;  %v5317_v55 = vld [vmem:[%s5904_s27 + $0x1d4] sm:$0xf0]  ;;  %v4875_v57 = vor.u32 %v5301_v51, %v4874_v50  ;;  %v4748_v59 = vld [vmem:[%s5904_s27 + $0x58] sm:$0xf0]  ;;  %v5284_v60 = vld [vmem:[%s5904_s27 + $0xd4] sm:$0xf] }
 0x252   : > { %v4939_v58 = vor.u32 %v5317_v55, %v4938_v52  ;;  %v4812_v61 = vld [vmem:[%s5904_s27 + $0xd8] sm:$0xf0]  ;;  %v4751_v62 = vor.u32 %v5268_v56, %v4748_v59  ;;  %v4466_v0 = vld [vmem:[%s5895_s7 + $0x20] sm:$0xf]  ;;  %v5200_v1 = vld [vmem:[%s5895_s7 + $0x2c] sm:$0xf0] }
 0x253   : > { %v4815_v63 = vor.u32 %v5284_v60, %v4812_v61  ;;  %v5230_v4 = vld [vmem:[%s5895_s7 + $0x124] sm:$0xf]  ;;  %v4596_v5 = vld [vmem:[%s5895_s7 + $0x130] sm:$0xf0]  ;;  %v4866_v12 = vld [vmem:[%s5904_s27 + $0x140] sm:$0xf] }
 0x254   : > { %2528 = vmatpush.bf16.msra.mxu0 %v4723_v2  ;;  %5455 = vmatpush.bf16.msra.mxu2 %v4723_v2  ;;  %v4594_v2 = vld [vmem:[%s5895_s7 + $0x120] sm:$0xf]  ;;  %v5198_v6 = vld [vmem:[%s5895_s7 + $0x24] sm:$0xf]  ;;  %v4468_v7 = vld [vmem:[%s5895_s7 + $0x30] sm:$0xf0] }
 0x255   : > { %5463 = vmatpush.bf16.msra.mxu3 %v4787_v3  ;;  %2617 = vmatpush.bf16.msra.mxu1 %v4787_v3  ;;  %v5232_v3 = vld [vmem:[%s5895_s7 + $0x12c] sm:$0xf0]  ;;  %v6225_v11 = vor.u32 %v5198_v6, %v4468_v7  ;;  %v5299_v13 = vld [vmem:[%s5904_s27 + $0x144] sm:$0xf0]  ;;  %v4930_v14 = vld [vmem:[%s5904_s27 + $0x1c0] sm:$0xf] }
 0x256   : > { %v6221_v9 = vor.u32 %v5232_v3, %v4594_v2  ;;  %v4867_v15 = vor.u32 %v5299_v13, %v4866_v12  ;;  %v5315_v16 = vld [vmem:[%s5904_s27 + $0x1c4] sm:$0xf0]  ;;  %v5266_v17 = vld [vmem:[%s5904_s27 + $0x44] sm:$0xf]  ;;  %v4740_v18 = vld [vmem:[%s5904_s27 + $0x48] sm:$0xf0] }
 0x257   : > { %v4931_v19 = vor.u32 %v5315_v16, %v4930_v14  ;;  %v4743_v20 = vor.u32 %v5266_v17, %v4740_v18  ;;  %v5282_v21 = vld [vmem:[%s5904_s27 + $0xc4] sm:$0xf]  ;;  %v4482_v24 = vld [vmem:[%s5895_s7 + $0x40] sm:$0xf]  ;;  %v5204_v25 = vld [vmem:[%s5895_s7 + $0x4c] sm:$0xf0] }
 0x258   : > { %2529 = vmatpush.bf16.msra.mxu0 %v4715_v8  ;;  %5456 = vmatpush.bf16.msra.mxu2 %v4715_v8  ;;  %v6219_v8 = vor.u32 %v5200_v1, %v4466_v0  ;;  %v5236_v27 = vld [vmem:[%s5895_s7 + $0x14c] sm:$0xf0]  ;;  %v5234_v28 = vld [vmem:[%s5895_s7 + $0x144] sm:$0xf]  ;;  %v4612_v29 = vld [vmem:[%s5895_s7 + $0x150] sm:$0xf0]  ;;  %v6247_v32 = vor.u32 %v5204_v25, %v4482_v24 }
 0x259   : > { %5464 = vmatpush.bf16.msra.mxu3 %v4779_v10  ;;  %2618 = vmatpush.bf16.msra.mxu1 %v4779_v10  ;;  %v6223_v10 = vor.u32 %v5230_v4, %v4596_v5  ;;  %v6251_v34 = vor.u32 %v5234_v28, %v4612_v29  ;;  %v4858_v38 = vld [vmem:[%s5904_s27 + $0x130] sm:$0xf]  ;;  %v5297_v39 = vld [vmem:[%s5904_s27 + $0x134] sm:$0xf0]  ;;  %v5280_v49 = vld [vmem:[%s5904_s27 + $0xb4] sm:$0xf] }
 0x25a   : > { %v5313_v44 = vld [vmem:[%s5904_s27 + $0x1b4] sm:$0xf0]  ;;  %v4796_v50 = vld [vmem:[%s5904_s27 + $0xb8] sm:$0xf0]  ;;  %v4498_v52 = vld [vmem:[%s5895_s7 + $0x60] sm:$0xf] }
 0x25b   : > { %v4799_v51 = vor.u32 %v5280_v49, %v4796_v50  ;;  %v5240_v55 = vld [vmem:[%s5895_s7 + $0x16c] sm:$0xf0]  ;;  %v5238_v56 = vld [vmem:[%s5895_s7 + $0x164] sm:$0xf]  ;;  %v4500_v59 = vld [vmem:[%s5895_s7 + $0x70] sm:$0xf0] }
 0x25c   : > { %2530 = vmatpush.bf16.msra.mxu0 %v4707_v22  ;;  %5457 = vmatpush.bf16.msra.mxu2 %v4707_v22  ;;  %v4804_v22 = vld [vmem:[%s5904_s27 + $0xc8] sm:$0xf0]  ;;  %v4850_v0 = vld [vmem:[%s5904_s27 + $0x120] sm:$0xf]  ;;  %v5295_v1 = vld [vmem:[%s5904_s27 + $0x124] sm:$0xf0] }
 0x25d   : > { %5465 = vmatpush.bf16.msra.mxu3 %v4771_v26  ;;  %2619 = vmatpush.bf16.msra.mxu1 %v4771_v26  ;;  %v4807_v23 = vor.u32 %v5282_v21, %v4804_v22  ;;  %v4610_v26 = vld [vmem:[%s5895_s7 + $0x140] sm:$0xf]  ;;  %v4851_v3 = vor.u32 %v5295_v1, %v4850_v0  ;;  %v5311_v4 = vld [vmem:[%s5904_s27 + $0x1a4] sm:$0xf0]  ;;  %v5262_v5 = vld [vmem:[%s5904_s27 + $0x24] sm:$0xf] }
 0x25e   : > { %v6249_v33 = vor.u32 %v5236_v27, %v4610_v26  ;;  %v4914_v2 = vld [vmem:[%s5904_s27 + $0x1a0] sm:$0xf]  ;;  %v4724_v6 = vld [vmem:[%s5904_s27 + $0x28] sm:$0xf0]  ;;  %v5278_v13 = vld [vmem:[%s5904_s27 + $0xa4] sm:$0xf] }
 0x25f   : > { %2531 = vmatmul.bf16.vlgmr.msra.gmra.mxu0 %v6184_v35  ;;  %2571 = vmatmul.bf16.vlgmr.msra.gmra.mxu2 %v6186_v36  ;;  %v4915_v7 = vor.u32 %v5311_v4, %v4914_v2  ;;  %v4727_v12 = vor.u32 %v5262_v5, %v4724_v6  ;;  %v4788_v14 = vld [vmem:[%s5904_s27 + $0xa8] sm:$0xf0]  ;;  %v4514_v16 = vld [vmem:[%s5895_s7 + $0x80] sm:$0xf]  ;;  %v5212_v17 = vld [vmem:[%s5895_s7 + $0x8c] sm:$0xf0] }
 0x260   : > { %2701 = vmatpush.bf16.msrb.mxu2 %v4891_v30  ;;  %2660 = vmatmul.bf16.vlgmr.msra.gmra.mxu3 %v6191_v40  ;;  %v5202_v30 = vld [vmem:[%s5895_s7 + $0x44] sm:$0xf]  ;;  %v4642_v18 = vld [vmem:[%s5895_s7 + $0x180] sm:$0xf]  ;;  %v4644_v21 = vld [vmem:[%s5895_s7 + $0x190] sm:$0xf0]  ;;  %v6303_v24 = vor.u32 %v5212_v17, %v4514_v16 }
 0x261   : > { %2790 = vmatpush.bf16.msrb.mxu3 %v4955_v31  ;;  %2620 = vmatmul.bf16.vlgmr.msra.gmra.mxu1 %v6193_v41  ;;  %v4484_v31 = vld [vmem:[%s5895_s7 + $0x50] sm:$0xf0]  ;;  %v5210_v22 = vld [vmem:[%s5895_s7 + $0x84] sm:$0xf]  ;;  %v4842_v28 = vld [vmem:[%s5904_s27 + $0x110] sm:$0xf] }
 0x262   : > { %2879 = vmatpush.bf16.msrb.mxu0 %v4767_v42  ;;  %2968 = vmatpush.bf16.msrb.mxu1 %v4831_v43  ;;  %v6253_v37 = vor.u32 %v5202_v30, %v4484_v31  ;;  %v4922_v42 = vld [vmem:[%s5904_s27 + $0x1b0] sm:$0xf]  ;;  %v4859_v43 = vor.u32 %v5297_v39, %v4858_v38  ;;  %v5293_v29 = vld [vmem:[%s5904_s27 + $0x114] sm:$0xf0]  ;;  %v5260_v39 = vld [vmem:[%s5904_s27 + $0x14] sm:$0xf] }
 0x263   : > { %v4923_v47 = vor.u32 %v5313_v44, %v4922_v42  ;;  %v4906_v30 = vld [vmem:[%s5904_s27 + $0x190] sm:$0xf]  ;;  %v4843_v31 = vor.u32 %v5293_v29, %v4842_v28  ;;  %v5309_v38 = vld [vmem:[%s5904_s27 + $0x194] sm:$0xf0]  ;;  %v4716_v42 = vld [vmem:[%s5904_s27 + $0x18] sm:$0xf0] }
 0x264   : > { %2702 = vmatpush.bf16.msrb.mxu2 %v4883_v45  ;;  %v5264_v45 = vld [vmem:[%s5904_s27 + $0x34] sm:$0xf]  ;;  %v4719_v44 = vor.u32 %v5260_v39, %v4716_v42  ;;  %v5216_v49 = vld [vmem:[%s5895_s7 + $0xac] sm:$0xf0]  ;;  %v4658_v50 = vld [vmem:[%s5895_s7 + $0x1a0] sm:$0xf] }
 0x265   : > { %2791 = vmatpush.bf16.msrb.mxu3 %v4947_v46  ;;  %v4732_v46 = vld [vmem:[%s5904_s27 + $0x38] sm:$0xf0]  ;;  %v4834_v0 = vld [vmem:[%s5904_s27 + $0x100] sm:$0xf]  ;;  %v5291_v1 = vld [vmem:[%s5904_s27 + $0x104] sm:$0xf0] }
 0x266   : > { %2880 = vmatpush.bf16.msrb.mxu0 %v4759_v53  ;;  %2969 = vmatpush.bf16.msrb.mxu1 %v4823_v54  ;;  %v4735_v48 = vor.u32 %v5264_v45, %v4732_v46  ;;  %v5208_v53 = vld [vmem:[%s5895_s7 + $0x6c] sm:$0xf0]  ;;  %v4626_v54 = vld [vmem:[%s5895_s7 + $0x160] sm:$0xf]  ;;  %v5276_v45 = vld [vmem:[%s5904_s27 + $0x94] sm:$0xf] }
 0x267   : > { %v6275_v60 = vor.u32 %v5208_v53, %v4498_v52  ;;  %v6277_v61 = vor.u32 %v5240_v55, %v4626_v54  ;;  %v4780_v46 = vld [vmem:[%s5904_s27 + $0x98] sm:$0xf0]  ;;  %v5246_v52 = vld [vmem:[%s5895_s7 + $0x1a4] sm:$0xf]  ;;  %v4660_v53 = vld [vmem:[%s5895_s7 + $0x1b0] sm:$0xf0] }
 0x268   : > { %2703 = vmatpush.bf16.msrb.mxu2 %v4875_v57  ;;  %v4628_v57 = vld [vmem:[%s5895_s7 + $0x170] sm:$0xf0]  ;;  %v5214_v54 = vld [vmem:[%s5895_s7 + $0xa4] sm:$0xf]  ;;  %v4898_v2 = vld [vmem:[%s5904_s27 + $0x180] sm:$0xf] }
 0x269   : > { %2792 = vmatpush.bf16.msrb.mxu3 %v4939_v58  ;;  %v5206_v58 = vld [vmem:[%s5895_s7 + $0x64] sm:$0xf]  ;;  %v4532_v55 = vld [vmem:[%s5895_s7 + $0xb0] sm:$0xf0]  ;;  %v5307_v4 = vld [vmem:[%s5904_s27 + $0x184] sm:$0xf0] }
 0x26a   : > { %2881 = vmatpush.bf16.msrb.mxu0 %v4751_v62  ;;  %2970 = vmatpush.bf16.msrb.mxu1 %v4815_v63  ;;  %v6279_v62 = vor.u32 %v5238_v56, %v4628_v57  ;;  %v6281_v63 = vor.u32 %v5206_v58, %v4500_v59  ;;  %v6335_v58 = vor.u32 %v5246_v52, %v4660_v53  ;;  %v5258_v5 = vld [vmem:[%s5904_s27 + $0x4] sm:$0xf]  ;;  %v4708_v6 = vld [vmem:[%s5904_s27 + $0x8] sm:$0xf0]  ;;  %v4546_v16 = vld [vmem:[%s5895_s7 + $0xc0] sm:$0xf] }
 0x26b   : > { %v6337_v59 = vor.u32 %v5214_v54, %v4532_v55  ;;  %v5220_v17 = vld [vmem:[%s5895_s7 + $0xcc] sm:$0xf0]  ;;  %v4892_v39 = vld [vmem:[%s5904_s27 + $0x178] sm:$0xf0]  ;;  %v5320_v42 = vld [vmem:[%s5904_s27 + $0x1f4] sm:$0xf] }
 0x26c   : > { %2704 = vmatpush.bf16.msrb.mxu2 %v4867_v15  ;;  %v4791_v15 = vor.u32 %v5278_v13, %v4788_v14  ;;  %v5274_v13 = vld [vmem:[%s5904_s27 + $0x84] sm:$0xf]  ;;  %v4772_v14 = vld [vmem:[%s5904_s27 + $0x88] sm:$0xf0]  ;;  %v6359_v28 = vor.u32 %v5220_v17, %v4546_v16  ;;  %v5256_v52 = vld [vmem:[%s5895_s7 + $0x1ec] sm:$0xf0] }
 0x26d   : > { %2793 = vmatpush.bf16.msrb.mxu3 %v4931_v19  ;;  %v5244_v19 = vld [vmem:[%s5895_s7 + $0x18c] sm:$0xf0]  ;;  %v5254_v53 = vld [vmem:[%s5895_s7 + $0x1e4] sm:$0xf]  ;;  %v5084_v55 = vld [vmem:[%s5906_s4 + $0x78] sm:$0xf0] }
 0x26e   : > { %2882 = vmatpush.bf16.msrb.mxu0 %v4743_v20  ;;  %2971 = vmatpush.bf16.msrb.mxu1 %v4807_v23  ;;  %v5242_v20 = vld [vmem:[%s5895_s7 + $0x184] sm:$0xf]  ;;  %v4516_v23 = vld [vmem:[%s5895_s7 + $0x90] sm:$0xf0]  ;;  %v6305_v25 = vor.u32 %v5244_v19, %v4642_v18  ;;  %v4674_v18 = vld [vmem:[%s5895_s7 + $0x1c0] sm:$0xf] }
 0x26f   : > { %2536 = vmatmul.bf16.gmra.mxu0 %v6219_v8  ;;  %2576 = vmatmul.bf16.gmra.mxu2 %v6221_v9  ;;  %v6307_v26 = vor.u32 %v5242_v20, %v4644_v21  ;;  %v6309_v27 = vor.u32 %v5210_v22, %v4516_v23  ;;  %v5252_v19 = vld [vmem:[%s5895_s7 + $0x1cc] sm:$0xf0]  ;;  %v5250_v20 = vld [vmem:[%s5895_s7 + $0x1c4] sm:$0xf]  ;;  %v4676_v21 = vld [vmem:[%s5895_s7 + $0x1d0] sm:$0xf0] }
 0x270   : > { %2665 = vmatmul.bf16.gmra.mxu3 %v6223_v10  ;;  %2705 = vmatpush.bf16.msrb.mxu2 %v4859_v43  ;;  %v4907_v43 = vor.u32 %v5309_v38, %v4906_v30  ;;  %v5218_v22 = vld [vmem:[%s5895_s7 + $0xc4] sm:$0xf]  ;;  %v4548_v23 = vld [vmem:[%s5895_s7 + $0xd0] sm:$0xf0]  ;;  %v6361_v29 = vor.u32 %v5252_v19, %v4674_v18  ;;  %v6363_v30 = vor.u32 %v5250_v20, %v4676_v21  ;;  %v4460_v16 = vld [vmem:[%s5895_s7 + $0x18] sm:$0xf0] }
 0x271   : > { %2625 = vmatmul.bf16.gmra.mxu1 %v6225_v11  ;;  %2794 = vmatpush.bf16.msrb.mxu3 %v4923_v47  ;;  %v4783_v47 = vor.u32 %v5276_v45, %v4780_v46  ;;  %v5304_v38 = vld [vmem:[%s5904_s27 + $0x174] sm:$0xf]  ;;  %v4562_v46 = vld [vmem:[%s5895_s7 + $0xe0] sm:$0xf]  ;;  %s5354_s1 = sshll.u32 (%p5711_p9), %s5596_s23, 7 }
 0x272   : > { %2883 = vmatpush.bf16.msrb.mxu0 %v4735_v48  ;;  %2972 = vmatpush.bf16.msrb.mxu1 %v4799_v51  ;;  %v4530_v48 = vld [vmem:[%s5895_s7 + $0xa0] sm:$0xf]  ;;  %v5248_v51 = vld [vmem:[%s5895_s7 + $0x1ac] sm:$0xf0] }
 0x273   : > { %v6331_v56 = vor.u32 %v5216_v49, %v4530_v48  ;;  %v6333_v57 = vor.u32 %v5248_v51, %v4658_v50  ;;  %v4690_v48 = vld [vmem:[%s5895_s7 + $0x1e0] sm:$0xf]  ;;  %v5082_v49 = vld [vmem:[%s5906_s4 + $0x70] sm:$0xf]  ;;  %v5353_v50 = vld [vmem:[%s5906_s4 + $0x74] sm:$0xf0] }
 0x274   : > { %2706 = vmatpush.bf16.msrb.mxu2 %v4851_v3  ;;  %v4835_v3 = vor.u32 %v5291_v1, %v4834_v0  ;;  %v5352_v51 = vld [vmem:[%s5906_s4 + $0x74] sm:$0xf]  ;;  %v5083_v54 = vor.u32 %v5353_v50, %v5082_v49  ;;  %v5222_v1 = vld [vmem:[%s5895_s7 + $0xe4] sm:$0xf] }
 0x275   : > { %2795 = vmatpush.bf16.msrb.mxu3 %v4915_v7  ;;  %v4899_v7 = vor.u32 %v5307_v4, %v4898_v2  ;;  %v4692_v0 = vld [vmem:[%s5895_s7 + $0x1f0] sm:$0xf0] }
 0x276   : > { %2884 = vmatpush.bf16.msrb.mxu0 %v4727_v12  ;;  %2973 = vmatpush.bf16.msrb.mxu1 %v4791_v15  ;;  %v4711_v12 = vor.u32 %v5258_v5, %v4708_v6  ;;  %v4775_v15 = vor.u32 %v5274_v13, %v4772_v14  ;;  %v4564_v2 = vld [vmem:[%s5895_s7 + $0xf0] sm:$0xf0]  ;;  %v6389_v5 = vor.u32 %v5256_v52, %v4690_v48  ;;  %v4458_v13 = vld [vmem:[%s5895_s7 + $0x8] sm:$0xf]  ;;  %v5197_v14 = vld [vmem:[%s5895_s7 + $0x14] sm:$0xf0] }
 0x277   : > { %v6391_v6 = vor.u32 %v5254_v53, %v4692_v0  ;;  %v6413_v18 = vor.u32 %v5197_v14, %v4458_v13  ;;  %v5074_v52 = vld [vmem:[%s5906_s4 + $0x60] sm:$0xf]  ;;  %v5351_v53 = vld [vmem:[%s5906_s4 + $0x64] sm:$0xf0]  ;;  %v5201_v0 = vld [vmem:[%s5895_s7 + $0x34] sm:$0xf0] }
 0x278   : > { %2707 = vmatpush.bf16.msrb.mxu2 %v4843_v31  ;;  %v6365_v31 = vor.u32 %v5218_v22, %v4548_v23  ;;  %v4476_v13 = vld [vmem:[%s5895_s7 + $0x38] sm:$0xf0] }
 0x279   : > { %2796 = vmatpush.bf16.msrb.mxu3 %v4907_v43  ;;  %v4895_v43 = vor.u32 %v5304_v38, %v4892_v39  ;;  %v5302_v38 = vld [vmem:[%s5904_s27 + $0x164] sm:$0xf]  ;;  %v4884_v39 = vld [vmem:[%s5904_s27 + $0x168] sm:$0xf0] }
 0x27a   : > { %2885 = vmatpush.bf16.msrb.mxu0 %v4719_v44  ;;  %2974 = vmatpush.bf16.msrb.mxu1 %v4783_v47  ;;  %v4956_v44 = vld [vmem:[%s5904_s27 + $0x1f8] sm:$0xf0]  ;;  %v5224_v47 = vld [vmem:[%s5895_s7 + $0xec] sm:$0xf0] }
 0x27b   : > { %v4959_v45 = vor.u32 %v5320_v42, %v4956_v44  ;;  %v6387_v4 = vor.u32 %v5224_v47, %v4562_v46  ;;  %v5318_v42 = vld [vmem:[%s5904_s27 + $0x1e4] sm:$0xf]  ;;  %v4948_v44 = vld [vmem:[%s5904_s27 + $0x1e8] sm:$0xf0] }
 0x27c   : > { %2708 = vmatpush.bf16.msrb.mxu2 %v4835_v3  ;;  %v5087_v3 = vor.u32 %v5352_v51, %v5084_v55  ;;  %v4951_v46 = vor.u32 %v5318_v42, %v4948_v44  ;;  %v4474_v55 = vld [vmem:[%s5895_s7 + $0x28] sm:$0xf] }
 0x27d   : > { %2797 = vmatpush.bf16.msrb.mxu3 %v4899_v7  ;;  %v6393_v7 = vor.u32 %v5222_v1, %v4564_v2  ;;  %v5075_v1 = vor.u32 %v5351_v53, %v5074_v52  ;;  %v5076_v2 = vld [vmem:[%s5906_s4 + $0x68] sm:$0xf0]  ;;  %v4490_v53 = vld [vmem:[%s5895_s7 + $0x48] sm:$0xf] }
 0x27e   : > { %2886 = vmatpush.bf16.msrb.mxu0 %v4711_v12  ;;  %2975 = vmatpush.bf16.msrb.mxu1 %v4775_v15  ;;  %v6404_v12 = vld [vmem:[%s680_s17] sm:$0x3]  ;;  %v5195_v15 = vld [vmem:[%s5895_s7 + $0xc] sm:$0xf] }
 0x27f   : > { %2541 = vmatmul.bf16.gmra.mxu0 %v6247_v32  ;;  %2581 = vmatmul.bf16.gmra.mxu2 %v6249_v33  ;;  %v6411_v17 = vperm.slane %v6404_v12, 0  ;;  %v6415_v20 = vor.u32 %v5195_v15, %v4460_v16 }
 0x280   : > { %2670 = vmatmul.bf16.gmra.mxu3 %v6251_v34  ;;  %3057 = vmatpush.bf16.msra.mxu2 %v4895_v43  ;;  %v4887_v43 = vor.u32 %v5302_v38, %v4884_v39 }
 0x281   : > { %2630 = vmatmul.bf16.gmra.mxu1 %v6253_v37  ;;  %3146 = vmatpush.bf16.msra.mxu3 %v4959_v45 }
 0x282   : > { %3459 = vmatpush.bf16.msra.mxu0 %v5083_v54  ;;  %3548 = vmatpush.bf16.msra.mxu1 %v5087_v3  ;;  %v5350_v54 = vld [vmem:[%s5906_s4 + $0x64] sm:$0xf]  ;;  %v5199_v3 = vld [vmem:[%s5895_s7 + $0x2c] sm:$0xf] }
 0x283   : > { %v5079_v14 = vor.u32 %v5350_v54, %v5076_v2  ;;  %v6445_v38 = vor.u32 %v5199_v3, %v4476_v13  ;;  %v5205_v54 = vld [vmem:[%s5895_s7 + $0x54] sm:$0xf0] }
 0x284   : > { %3058 = vmatpush.bf16.msra.mxu2 %v4887_v43  ;;  %v6467_v2 = vor.u32 %v5205_v54, %v4490_v53 }
 0x285   : > { %3147 = vmatpush.bf16.msra.mxu3 %v4951_v46 }
 0x286   : > { %3460 = vmatpush.bf16.msra.mxu0 %v5075_v1  ;;  %3549 = vmatpush.bf16.msra.mxu1 %v5079_v14 }
 0x28f   : > { %2546 = vmatmul.bf16.gmra.mxu0 %v6275_v60  ;;  %2586 = vmatmul.bf16.gmra.mxu2 %v6277_v61 }
 0x290   : > { %2675 = vmatmul.bf16.gmra.mxu3 %v6279_v62 }
 0x291   : > { %2635 = vmatmul.bf16.gmra.mxu1 %v6281_v63 }
 0x29f   : > { %2551 = vmatmul.bf16.gmra.mxu0 %v6303_v24  ;;  %2591 = vmatmul.bf16.gmra.mxu2 %v6305_v25 }
 0x2a0   : > { %2680 = vmatmul.bf16.gmra.mxu3 %v6307_v26 }
 0x2a1   : > { %2640 = vmatmul.bf16.gmra.mxu1 %v6309_v27 }
 0x2af   : > { %2556 = vmatmul.bf16.gmra.mxu0 %v6331_v56  ;;  %2596 = vmatmul.bf16.gmra.mxu2 %v6333_v57 }
 0x2b0   : > { %2685 = vmatmul.bf16.gmra.mxu3 %v6335_v58 }
 0x2b1   : > { %2645 = vmatmul.bf16.gmra.mxu1 %v6337_v59 }
 0x2bf   : > { %2561 = vmatmul.bf16.gmra.mxu0 %v6359_v28  ;;  %2601 = vmatmul.bf16.gmra.mxu2 %v6361_v29 }
 0x2c0   : > { %2690 = vmatmul.bf16.gmra.mxu3 %v6363_v30 }
 0x2c1   : > { %2650 = vmatmul.bf16.gmra.mxu1 %v6365_v31 }
 0x2cf   : > { %2566 = vmatmul.bf16.gmra.mxu0 %v6387_v4  ;;  %2606 = vmatmul.bf16.gmra.mxu2 %v6389_v5 }
 0x2d0   : > { %2695 = vmatmul.bf16.gmra.mxu3 %v6391_v6 }
 0x2d1   : > { %2655 = vmatmul.bf16.gmra.mxu1 %v6393_v7 }
 0x2dc   : > { %v2532_v19 = vpop.f32.mrf.mxu0 }
 0x2dd   : > { %v2533_v21 = vadd.f32 %v2532_v19, %v6411_v17 }
 0x2de   : > { %v2621_v22 = vpop.f32.mrf.mxu1 }
 0x2df   : > { %v6418_v23 = vadd.f32 %v2621_v22, %v2533_v21  ;;  %2709 = vmatmul.bf16.vlgmr.msrb.gmra.mxu2 %v6413_v18  ;;  %2887 = vmatmul.bf16.vlgmr.msrb.gmra.mxu0 %v6184_v35  ;;  %v6443_v21 = vor.u32 %v5201_v0, %v4474_v55  ;;  %v5203_v55 = vld [vmem:[%s5895_s7 + $0x4c] sm:$0xf] }
 0x2e0   : > { %2798 = vmatmul.bf16.vlgmr.msrb.gmra.mxu3 %v6415_v20 }
 0x2e1   : > { %2976 = vmatmul.bf16.vlgmr.msrb.gmra.mxu1 %v6193_v41 }
 0x2e2   : > { %v2572_v45 = vpop.f32.mrf.mxu2 }
 0x2e3   : > { %v2573_v47 = vadd.f32 %v2572_v45, %v6411_v17  ;;  %v2661_v35 = vpop.f32.mrf.mxu3 }
 0x2e4   : > { %v2534_v41 = vpop.f32.mrf.mxu0 }
 0x2e5   : > { %v6429_v48 = vadd.f32 %v2661_v35, %v2573_v47  ;;  %v2535_v49 = vadd.f32 %v2534_v41, %v6411_v17 }
 0x2e6   : > { %v2623_v50 = vpop.f32.mrf.mxu1 }
 0x2e7   : > { %v6432_v51 = vadd.f32 %v2623_v50, %v2535_v49 }
 0x2ea   : > { %v2574_v15 = vpop.f32.mrf.mxu2 }
 0x2eb   : > { %v2575_v16 = vadd.f32 %v2574_v15, %v6411_v17  ;;  %v2663_v19 = vpop.f32.mrf.mxu3 }
 0x2ec   : > { %v2537_v22 = vpop.f32.mrf.mxu0 }
 0x2ed   : > { %v6447_v39 = vadd.f32 %v2663_v19, %v2575_v16  ;;  %v2538_v42 = vadd.f32 %v2537_v22, %v6411_v17  ;;  %v5300_v22 = vld [vmem:[%s5904_s27 + $0x154] sm:$0xf] }
 0x2ee   : > { %v2626_v43 = vpop.f32.mrf.mxu1 }
 0x2ef   : > { %v6450_v44 = vadd.f32 %v2626_v43, %v2538_v42  ;;  %2714 = vmatmul.bf16.gmra.mxu2 %v6443_v21  ;;  %2892 = vmatmul.bf16.gmra.mxu0 %v6219_v8  ;;  %v4492_v8 = vld [vmem:[%s5895_s7 + $0x58] sm:$0xf0]  ;;  %v5316_v43 = vld [vmem:[%s5904_s27 + $0x1d4] sm:$0xf] }
 0x2f0   : > { %2803 = vmatmul.bf16.gmra.mxu3 %v6445_v38  ;;  %v6469_v13 = vor.u32 %v5203_v55, %v4492_v8  ;;  %v4876_v42 = vld [vmem:[%s5904_s27 + $0x158] sm:$0xf0]  ;;  %v5066_v8 = vld [vmem:[%s5906_s4 + $0x50] sm:$0xf] }
 0x2f1   : > { %2981 = vmatmul.bf16.gmra.mxu1 %v6225_v11 }
 0x2f2   : > { %v2577_v45 = vpop.f32.mrf.mxu2 }
 0x2f3   : > { %v2578_v46 = vadd.f32 %v2577_v45, %v6411_v17  ;;  %v2666_v47 = vpop.f32.mrf.mxu3  ;;  %v4879_v45 = vor.u32 %v5300_v22, %v4876_v42  ;;  %v5207_v22 = vld [vmem:[%s5895_s7 + $0x6c] sm:$0xf]  ;;  %v4508_v42 = vld [vmem:[%s5895_s7 + $0x78] sm:$0xf0] }
 0x2f4   : > { %v2539_v35 = vpop.f32.mrf.mxu0 }
 0x2f5   : > { %v6457_v41 = vadd.f32 %v2666_v47, %v2578_v46  ;;  %v2540_v49 = vadd.f32 %v2539_v35, %v6411_v17  ;;  %v4940_v46 = vld [vmem:[%s5904_s27 + $0x1d8] sm:$0xf0]  ;;  %3059 = vmatpush.bf16.msra.mxu2 %v4879_v45 }
 0x2f6   : > { %v2628_v50 = vpop.f32.mrf.mxu1  ;;  %v4943_v35 = vor.u32 %v5316_v43, %v4940_v46 }
 0x2f7   : > { %v6460_v52 = vadd.f32 %v2628_v50, %v2540_v49 }
 0x2f8   : > { %3148 = vmatpush.bf16.msra.mxu3 %v4943_v35 }
 0x2fa   : > { %v2579_v0 = vpop.f32.mrf.mxu2 }
 0x2fb   : > { %v2580_v11 = vadd.f32 %v2579_v0, %v6411_v17  ;;  %v2668_v1 = vpop.f32.mrf.mxu3  ;;  %v5349_v0 = vld [vmem:[%s5906_s4 + $0x54] sm:$0xf0] }
 0x2fc   : > { %v2542_v3 = vpop.f32.mrf.mxu0 }
 0x2fd   : > { %v6471_v14 = vadd.f32 %v2668_v1, %v2580_v11  ;;  %v2543_v15 = vadd.f32 %v2542_v3, %v6411_v17  ;;  %v5348_v11 = vld [vmem:[%s5906_s4 + $0x54] sm:$0xf]  ;;  %v4506_v1 = vld [vmem:[%s5895_s7 + $0x68] sm:$0xf]  ;;  %v5209_v3 = vld [vmem:[%s5895_s7 + $0x74] sm:$0xf0] }
 0x2fe   : > { %v2631_v16 = vpop.f32.mrf.mxu1  ;;  %v6499_v35 = vor.u32 %v5209_v3, %v4506_v1 }
 0x2ff   : > { %v6474_v19 = vadd.f32 %v2631_v16, %v2543_v15  ;;  %2719 = vmatmul.bf16.gmra.mxu2 %v6467_v2  ;;  %2897 = vmatmul.bf16.gmra.mxu0 %v6247_v32  ;;  %v5067_v15 = vor.u32 %v5349_v0, %v5066_v8  ;;  %v5068_v16 = vld [vmem:[%s5906_s4 + $0x58] sm:$0xf0] }
 0x300   : > { %2808 = vmatmul.bf16.gmra.mxu3 %v6469_v13  ;;  %v5071_v43 = vor.u32 %v5348_v11, %v5068_v16  ;;  %7207 = vst [vmem:[#allocation7_spill] sm:$0xff] %v6499_v35 }
 0x301   : > { %2986 = vmatmul.bf16.gmra.mxu1 %v6253_v37  ;;  %3461 = vmatpush.bf16.msra.mxu0 %v5067_v15 }
 0x302   : > { %v2582_v47 = vpop.f32.mrf.mxu2  ;;  %3550 = vmatpush.bf16.msra.mxu1 %v5071_v43  ;;  %v4522_v43 = vld [vmem:[%s5895_s7 + $0x88] sm:$0xf] }
 0x303   : > { %v2583_v49 = vadd.f32 %v2582_v47, %v6411_v17  ;;  %v2671_v32 = vpop.f32.mrf.mxu3 }
 0x304   : > { %v2544_v37 = vpop.f32.mrf.mxu0 }
 0x305   : > { %v6485_v50 = vadd.f32 %v2671_v32, %v2583_v49  ;;  %v2545_v53 = vadd.f32 %v2544_v37, %v6411_v17  ;;  %v6501_v32 = vor.u32 %v5207_v22, %v4508_v42 }
 0x306   : > { %v2633_v54 = vpop.f32.mrf.mxu1 }
 0x307   : > { %v6488_v55 = vadd.f32 %v2633_v54, %v2545_v53  ;;  %7208 = vst [vmem:[#allocation8_spill] sm:$0xff] %v6501_v32 }
 0x30a   : > { %v2584_v45 = vpop.f32.mrf.mxu2 }
 0x30b   : > { %v2585_v46 = vadd.f32 %v2584_v45, %v6411_v17  ;;  %v2673_v47 = vpop.f32.mrf.mxu3  ;;  %v5213_v45 = vld [vmem:[%s5895_s7 + $0x94] sm:$0xf0] }
 0x30c   : > { %v2547_v49 = vpop.f32.mrf.mxu0 }
 0x30d   : > { %v6503_v37 = vadd.f32 %v2673_v47, %v2585_v46  ;;  %v2548_v53 = vadd.f32 %v2547_v49, %v6411_v17  ;;  %v5211_v46 = vld [vmem:[%s5895_s7 + $0x8c] sm:$0xf] }
 0x30e   : > { %v2636_v54 = vpop.f32.mrf.mxu1 }
 0x30f   : > { %v6506_v8 = vadd.f32 %v2636_v54, %v2548_v53  ;;  %2724 = vmatmul.bf16.gmra.mxu2 %v6499_v35  ;;  %2902 = vmatmul.bf16.gmra.mxu0 %v6275_v60  ;;  %v4524_v60 = vld [vmem:[%s5895_s7 + $0x98] sm:$0xf0]  ;;  %v6523_v53 = vor.u32 %v5213_v45, %v4522_v43  ;;  %v4868_v43 = vld [vmem:[%s5904_s27 + $0x148] sm:$0xf0]  ;;  %v5314_v45 = vld [vmem:[%s5904_s27 + $0x1c4] sm:$0xf] }
 0x310   : > { %2813 = vmatmul.bf16.gmra.mxu3 %v6501_v32  ;;  %v4540_v32 = vld [vmem:[%s5895_s7 + $0xb8] sm:$0xf0] }
 0x311   : > { %2991 = vmatmul.bf16.gmra.mxu1 %v6281_v63  ;;  %7210 = vst [vmem:[#allocation10_spill] sm:$0xff] %v6523_v53 }
 0x312   : > { %v2587_v0 = vpop.f32.mrf.mxu2 }
 0x313   : > { %v2588_v11 = vadd.f32 %v2587_v0, %v6411_v17  ;;  %v2676_v1 = vpop.f32.mrf.mxu3  ;;  %v6525_v0 = vor.u32 %v5211_v46, %v4524_v60  ;;  %v4932_v60 = vld [vmem:[%s5904_s27 + $0x1c8] sm:$0xf0] }
 0x314   : > { %v2549_v3 = vpop.f32.mrf.mxu0 }
 0x315   : > { %v6513_v15 = vadd.f32 %v2676_v1, %v2588_v11  ;;  %v2550_v16 = vadd.f32 %v2549_v3, %v6411_v17  ;;  %7211 = vst [vmem:[#allocation11_spill] sm:$0xff] %v6525_v0 }
 0x316   : > { %v2638_v22 = vpop.f32.mrf.mxu1 }
 0x317   : > { %7209 = vst [vmem:[#allocation9_spill] sm:$0xff] %v6513_v15  ;;  %v6516_v42 = vadd.f32 %v2638_v22, %v2550_v16  ;;  %v5298_v22 = vld [vmem:[%s5904_s27 + $0x144] sm:$0xf]  ;;  %v5215_v15 = vld [vmem:[%s5895_s7 + $0xac] sm:$0xf] }
 0x318   : > { %v4871_v46 = vor.u32 %v5298_v22, %v4868_v43  ;;  %v5058_v43 = vld [vmem:[%s5906_s4 + $0x40] sm:$0xf] }
 0x31a   : > { %v2589_v47 = vpop.f32.mrf.mxu2  ;;  %3060 = vmatpush.bf16.msra.mxu2 %v4871_v46 }
 0x31b   : > { %v2590_v63 = vadd.f32 %v2589_v47, %v6411_v17  ;;  %v2678_v49 = vpop.f32.mrf.mxu3 }
 0x31c   : > { %v2552_v54 = vpop.f32.mrf.mxu0 }
 0x31d   : > { %v6527_v11 = vadd.f32 %v2678_v49, %v2590_v63  ;;  %v2553_v1 = vadd.f32 %v2552_v54, %v6411_v17  ;;  %v4935_v63 = vor.u32 %v5314_v45, %v4932_v60  ;;  %v4538_v45 = vld [vmem:[%s5895_s7 + $0xa8] sm:$0xf]  ;;  %v5217_v60 = vld [vmem:[%s5895_s7 + $0xb4] sm:$0xf0] }
 0x31e   : > { %v2641_v3 = vpop.f32.mrf.mxu1 }
 0x31f   : > { %7212 = vst [vmem:[#allocation12_spill] sm:$0xff] %v6527_v11  ;;  %v6530_v16 = vadd.f32 %v2641_v3, %v2553_v1  ;;  %2729 = vmatmul.bf16.gmra.mxu2 %v6523_v53  ;;  %2907 = vmatmul.bf16.gmra.mxu0 %v6303_v24  ;;  %v5346_v53 = vld [vmem:[%s5906_s4 + $0x44] sm:$0xf] }
 0x320   : > { %2818 = vmatmul.bf16.gmra.mxu3 %v6525_v0  ;;  %v5347_v0 = vld [vmem:[%s5906_s4 + $0x44] sm:$0xf0] }
 0x321   : > { %2996 = vmatmul.bf16.gmra.mxu1 %v6309_v27  ;;  %3149 = vmatpush.bf16.msra.mxu3 %v4935_v63  ;;  %v5059_v11 = vor.u32 %v5347_v0, %v5058_v43 }
 0x322   : > { %v2592_v47 = vpop.f32.mrf.mxu2 }
 0x323   : > { %v2593_v49 = vadd.f32 %v2592_v47, %v6411_v17  ;;  %v2681_v24 = vpop.f32.mrf.mxu3  ;;  %v5060_v47 = vld [vmem:[%s5906_s4 + $0x48] sm:$0xf0]  ;;  %3462 = vmatpush.bf16.msra.mxu0 %v5059_v11 }
 0x324   : > { %v2554_v27 = vpop.f32.mrf.mxu0  ;;  %v5063_v35 = vor.u32 %v5346_v53, %v5060_v47 }
 0x325   : > { %v6541_v54 = vadd.f32 %v2681_v24, %v2593_v49  ;;  %v2555_v1 = vadd.f32 %v2554_v27, %v6411_v17  ;;  %v6555_v24 = vor.u32 %v5217_v60, %v4538_v45 }
 0x326   : > { %v2643_v3 = vpop.f32.mrf.mxu1  ;;  %3551 = vmatpush.bf16.msra.mxu1 %v5063_v35 }
 0x327   : > { %7213 = vst [vmem:[#allocation13_spill] sm:$0xff] %v6541_v54  ;;  %v6544_v22 = vadd.f32 %v2643_v3, %v2555_v1  ;;  %v6557_v1 = vor.u32 %v5215_v15, %v4540_v32 }
 0x328   : > { %7214 = vst [vmem:[#allocation14_spill] sm:$0xff] %v6555_v24 }
 0x329   : > { %7215 = vst [vmem:[#allocation15_spill] sm:$0xff] %v6557_v1 }
 0x32a   : > { %v2594_v46 = vpop.f32.mrf.mxu2 }
 0x32b   : > { %v2595_v63 = vadd.f32 %v2594_v46, %v6411_v17  ;;  %v2683_v49 = vpop.f32.mrf.mxu3 }
 0x32c   : > { %v2557_v27 = vpop.f32.mrf.mxu0 }
 0x32d   : > { %v6559_v3 = vadd.f32 %v2683_v49, %v2595_v63  ;;  %v2558_v0 = vadd.f32 %v2557_v27, %v6411_v17  ;;  %v4554_v63 = vld [vmem:[%s5895_s7 + $0xc8] sm:$0xf]  ;;  %v5221_v49 = vld [vmem:[%s5895_s7 + $0xd4] sm:$0xf0]  ;;  %v5219_v27 = vld [vmem:[%s5895_s7 + $0xcc] sm:$0xf] }
 0x32e   : > { %v2646_v43 = vpop.f32.mrf.mxu1 }
 0x32f   : > { %7216 = vst [vmem:[#allocation16_spill] sm:$0xff] %v6559_v3  ;;  %v6562_v53 = vadd.f32 %v2646_v43, %v2558_v0  ;;  %2734 = vmatmul.bf16.gmra.mxu2 %v6555_v24  ;;  %2912 = vmatmul.bf16.gmra.mxu0 %v6331_v56  ;;  %v4556_v56 = vld [vmem:[%s5895_s7 + $0xd8] sm:$0xf0]  ;;  %v5223_v24 = vld [vmem:[%s5895_s7 + $0xec] sm:$0xf] }
 0x330   : > { %2823 = vmatmul.bf16.gmra.mxu3 %v6557_v1  ;;  %v4572_v3 = vld [vmem:[%s5895_s7 + $0xf8] sm:$0xf0] }
 0x331   : > { %3001 = vmatmul.bf16.gmra.mxu1 %v6337_v59 }
 0x332   : > { %v2597_v35 = vpop.f32.mrf.mxu2 }
 0x333   : > { %v2598_v32 = vadd.f32 %v2597_v35, %v6411_v17  ;;  %v2686_v15 = vpop.f32.mrf.mxu3  ;;  %v6579_v35 = vor.u32 %v5221_v49, %v4554_v63  ;;  %v5296_v63 = vld [vmem:[%s5904_s27 + $0x134] sm:$0xf]  ;;  %v4860_v49 = vld [vmem:[%s5904_s27 + $0x138] sm:$0xf0] }
 0x334   : > { %v2559_v11 = vpop.f32.mrf.mxu0 }
 0x335   : > { %v6569_v45 = vadd.f32 %v2686_v15, %v2598_v32  ;;  %v2560_v60 = vadd.f32 %v2559_v11, %v6411_v17  ;;  %7218 = vst [vmem:[#allocation18_spill] sm:$0xff] %v6579_v35  ;;  %v6581_v15 = vor.u32 %v5219_v27, %v4556_v56  ;;  %v5312_v27 = vld [vmem:[%s5904_s27 + $0x1b4] sm:$0xf]  ;;  %v4863_v56 = vor.u32 %v5296_v63, %v4860_v49  ;;  %v5050_v49 = vld [vmem:[%s5906_s4 + $0x30] sm:$0xf] }
 0x336   : > { %v2648_v47 = vpop.f32.mrf.mxu1 }
 0x337   : > { %7217 = vst [vmem:[#allocation17_spill] sm:$0xff] %v6569_v45  ;;  %v6572_v46 = vadd.f32 %v2648_v47, %v2560_v60  ;;  %3061 = vmatpush.bf16.msra.mxu2 %v4863_v56 }
 0x338   : > { %7219 = vst [vmem:[#allocation19_spill] sm:$0xff] %v6581_v15 }
 0x33a   : > { %v2599_v0 = vpop.f32.mrf.mxu2 }
 0x33b   : > { %v2600_v59 = vadd.f32 %v2599_v0, %v6411_v17  ;;  %v2688_v43 = vpop.f32.mrf.mxu3  ;;  %v4924_v0 = vld [vmem:[%s5904_s27 + $0x1b8] sm:$0xf0] }
 0x33c   : > { %v2562_v32 = vpop.f32.mrf.mxu0 }
 0x33d   : > { %v6583_v11 = vadd.f32 %v2688_v43, %v2600_v59  ;;  %v2563_v60 = vadd.f32 %v2562_v32, %v6411_v17  ;;  %v4927_v43 = vor.u32 %v5312_v27, %v4924_v0  ;;  %v4570_v27 = vld [vmem:[%s5895_s7 + $0xe8] sm:$0xf]  ;;  %v5225_v0 = vld [vmem:[%s5895_s7 + $0xf4] sm:$0xf0] }
 0x33e   : > { %v2651_v47 = vpop.f32.mrf.mxu1 }
 0x33f   : > { %7220 = vst [vmem:[#allocation20_spill] sm:$0xff] %v6583_v11  ;;  %v6586_v45 = vadd.f32 %v2651_v47, %v2563_v60  ;;  %2739 = vmatmul.bf16.gmra.mxu2 %v6579_v35  ;;  %2917 = vmatmul.bf16.gmra.mxu0 %v6359_v28  ;;  %v5345_v35 = vld [vmem:[%s5906_s4 + $0x34] sm:$0xf0]  ;;  %v5344_v11 = vld [vmem:[%s5906_s4 + $0x34] sm:$0xf] }
 0x340   : > { %2828 = vmatmul.bf16.gmra.mxu3 %v6581_v15  ;;  %v5051_v1 = vor.u32 %v5345_v35, %v5050_v49 }
 0x341   : > { %3006 = vmatmul.bf16.gmra.mxu1 %v6365_v31  ;;  %3150 = vmatpush.bf16.msra.mxu3 %v4927_v43 }
 0x342   : > { %v2602_v59 = vpop.f32.mrf.mxu2  ;;  %3463 = vmatpush.bf16.msra.mxu0 %v5051_v1 }
 0x343   : > { %v2603_v32 = vadd.f32 %v2602_v59, %v6411_v17  ;;  %v2691_v28 = vpop.f32.mrf.mxu3  ;;  %v5052_v59 = vld [vmem:[%s5906_s4 + $0x38] sm:$0xf0] }
 0x344   : > { %v2564_v31 = vpop.f32.mrf.mxu0  ;;  %v5055_v54 = vor.u32 %v5344_v11, %v5052_v59 }
 0x345   : > { %v6597_v60 = vadd.f32 %v2691_v28, %v2603_v32  ;;  %v2565_v47 = vadd.f32 %v2564_v31, %v6411_v17  ;;  %v6611_v28 = vor.u32 %v5225_v0, %v4570_v27  ;;  %v6613_v31 = vor.u32 %v5223_v24, %v4572_v3 }
 0x346   : > { %v2653_v15 = vpop.f32.mrf.mxu1  ;;  %3552 = vmatpush.bf16.msra.mxu1 %v5055_v54 }
 0x347   : > { %7221 = vst [vmem:[#allocation21_spill] sm:$0xff] %v6597_v60  ;;  %v6600_v63 = vadd.f32 %v2653_v15, %v2565_v47 }
 0x34a   : > { %v2604_v56 = vpop.f32.mrf.mxu2 }
 0x34b   : > { %v2605_v43 = vadd.f32 %v2604_v56, %v6411_v17  ;;  %v2693_v32 = vpop.f32.mrf.mxu3  ;;  %v4586_v56 = vld [vmem:[%s5895_s7 + $0x108] sm:$0xf] }
 0x34c   : > { %v2567_v15 = vpop.f32.mrf.mxu0 }
 0x34d   : > { %v6615_v47 = vadd.f32 %v2693_v32, %v2605_v43  ;;  %v2568_v35 = vadd.f32 %v2567_v15, %v6411_v17  ;;  %v5229_v43 = vld [vmem:[%s5895_s7 + $0x114] sm:$0xf0]  ;;  %v5227_v32 = vld [vmem:[%s5895_s7 + $0x10c] sm:$0xf] }
 0x34e   : > { %v2656_v49 = vpop.f32.mrf.mxu1 }
 0x34f   : > { %v6618_v60 = vadd.f32 %v2656_v49, %v2568_v35  ;;  %2744 = vmatmul.bf16.gmra.mxu2 %v6611_v28  ;;  %2922 = vmatmul.bf16.gmra.mxu0 %v6387_v4  ;;  %v6633_v4 = vperm.slane %v6404_v12, 1 }
 0x350   : > { %2833 = vmatmul.bf16.gmra.mxu3 %v6613_v31 }
 0x351   : > { %3011 = vmatmul.bf16.gmra.mxu1 %v6393_v7  ;;  %v4588_v7 = vld [vmem:[%s5895_s7 + $0x118] sm:$0xf0] }
 0x352   : > { %v2607_v54 = vpop.f32.mrf.mxu2 }
 0x353   : > { %v2608_v24 = vadd.f32 %v2607_v54, %v6411_v17  ;;  %v2696_v1 = vpop.f32.mrf.mxu3  ;;  %v6638_v54 = vor.u32 %v5229_v43, %v4586_v56  ;;  %v4852_v56 = vld [vmem:[%s5904_s27 + $0x128] sm:$0xf0]  ;;  %v5310_v43 = vld [vmem:[%s5904_s27 + $0x1a4] sm:$0xf] }
 0x354   : > { %v2569_v3 = vpop.f32.mrf.mxu0 }
 0x355   : > { %v6625_v11 = vadd.f32 %v2696_v1, %v2608_v24  ;;  %v2570_v27 = vadd.f32 %v2569_v3, %v6411_v17  ;;  %7223 = vst [vmem:[#allocation23_spill] sm:$0xff] %v6638_v54  ;;  %v6640_v1 = vor.u32 %v5227_v32, %v4588_v7  ;;  %v4916_v7 = vld [vmem:[%s5904_s27 + $0x1a8] sm:$0xf0] }
 0x356   : > { %v2658_v0 = vpop.f32.mrf.mxu1 }
 0x357   : > { %7222 = vst [vmem:[#allocation22_spill] sm:$0xff] %v6625_v11  ;;  %v6628_v59 = vadd.f32 %v2658_v0, %v2570_v27 }
 0x358   : > { %7224 = vst [vmem:[#allocation24_spill] sm:$0xff] %v6640_v1 }
 0x35a   : > { %v2609_v15 = vpop.f32.mrf.mxu2 }
 0x35b   : > { %v2610_v35 = vadd.f32 %v2609_v15, %v6411_v17  ;;  %v2698_v49 = vpop.f32.mrf.mxu3  ;;  %v5294_v17 = vld [vmem:[%s5904_s27 + $0x124] sm:$0xf] }
 0x35c   : > { %v2888_v24 = vpop.f32.mrf.mxu0  ;;  %v4855_v32 = vor.u32 %v5294_v17, %v4852_v56  ;;  %v5042_v56 = vld [vmem:[%s5906_s4 + $0x20] sm:$0xf] }
 0x35d   : > { %v6642_v3 = vadd.f32 %v2698_v49, %v2610_v35  ;;  %v2889_v12 = vadd.f32 %v2888_v24, %v6633_v4  ;;  %v4919_v35 = vor.u32 %v5310_v43, %v4916_v7  ;;  %v4602_v43 = vld [vmem:[%s5895_s7 + $0x128] sm:$0xf]  ;;  %v5233_v7 = vld [vmem:[%s5895_s7 + $0x134] sm:$0xf0] }
 0x35e   : > { %v2977_v27 = vpop.f32.mrf.mxu1  ;;  %3062 = vmatpush.bf16.msra.mxu2 %v4855_v32 }
 0x35f   : > { %7225 = vst [vmem:[#allocation25_spill] sm:$0xff] %v6642_v3  ;;  %v6645_v0 = vadd.f32 %v2977_v27, %v2889_v12  ;;  %2749 = vmatmul.bf16.gmra.mxu2 %v6638_v54  ;;  %2927 = vmatmul.bf16.gmra.mxu0 %v6186_v36  ;;  %v4604_v3 = vld [vmem:[%s5895_s7 + $0x138] sm:$0xf0] }
 0x360   : > { %2838 = vmatmul.bf16.gmra.mxu3 %v6640_v1  ;;  %v5342_v1 = vld [vmem:[%s5906_s4 + $0x24] sm:$0xf] }
 0x361   : > { %7226 = vst [vmem:[#allocation26_spill] sm:$0xff] %v6645_v0  ;;  %3016 = vmatmul.bf16.gmra.mxu1 %v6191_v40  ;;  %3151 = vmatpush.bf16.msra.mxu3 %v4919_v35  ;;  %v5343_v0 = vld [vmem:[%s5906_s4 + $0x24] sm:$0xf0] }
 0x362   : > { %v2710_v15 = vpop.f32.mrf.mxu2  ;;  %v5043_v54 = vor.u32 %v5343_v0, %v5042_v56 }
 0x363   : > { %v2711_v49 = vadd.f32 %v2710_v15, %v6418_v23  ;;  %v2799_v36 = vpop.f32.mrf.mxu3  ;;  %v5044_v23 = vld [vmem:[%s5906_s4 + $0x28] sm:$0xf0] }
 0x364   : > { %v2890_v40 = vpop.f32.mrf.mxu0  ;;  %v5231_v15 = vld [vmem:[%s5895_s7 + $0x12c] sm:$0xf]  ;;  %v5047_v11 = vor.u32 %v5342_v1, %v5044_v23  ;;  %3464 = vmatpush.bf16.msra.mxu0 %v5043_v54 }
 0x365   : > { %v6656_v24 = vadd.f32 %v2799_v36, %v2711_v49  ;;  %v2891_v12 = vadd.f32 %v2890_v40, %v6633_v4  ;;  %v6670_v36 = vor.u32 %v5233_v7, %v4602_v43 }
 0x366   : > { %v2979_v27 = vpop.f32.mrf.mxu1  ;;  %3553 = vmatpush.bf16.msra.mxu1 %v5047_v11 }
 0x367   : > { %v6659_v17 = vadd.f32 %v2979_v27, %v2891_v12  ;;  %v6672_v12 = vor.u32 %v5231_v15, %v4604_v3 }
 0x36a   : > { %v2712_v32 = vpop.f32.mrf.mxu2 }
 0x36b   : > { %v2713_v35 = vadd.f32 %v2712_v32, %v6432_v51  ;;  %v2801_v49 = vpop.f32.mrf.mxu3  ;;  %v4618_v32 = vld [vmem:[%s5895_s7 + $0x148] sm:$0xf] }
 0x36c   : > { %v2893_v40 = vpop.f32.mrf.mxu0 }
 0x36d   : > { %v6674_v27 = vadd.f32 %v2801_v49, %v2713_v35  ;;  %v2894_v0 = vadd.f32 %v2893_v40, %v6633_v4  ;;  %v5237_v35 = vld [vmem:[%s5895_s7 + $0x154] sm:$0xf0]  ;;  %v5235_v49 = vld [vmem:[%s5895_s7 + $0x14c] sm:$0xf] }
 0x36e   : > { %v2982_v56 = vpop.f32.mrf.mxu1 }
 0x36f   : > { %v6677_v1 = vadd.f32 %v2982_v56, %v2894_v0  ;;  %2754 = vmatmul.bf16.gmra.mxu2 %v6670_v36  ;;  %2932 = vmatmul.bf16.gmra.mxu0 %v6221_v9  ;;  %v4620_v9 = vld [vmem:[%s5895_s7 + $0x158] sm:$0xf0]  ;;  %v6694_v0 = vor.u32 %v5237_v35, %v4618_v32  ;;  %v5308_v32 = vld [vmem:[%s5904_s27 + $0x194] sm:$0xf] }
 0x370   : > { %2843 = vmatmul.bf16.gmra.mxu3 %v6672_v12 }
 0x371   : > { %3021 = vmatmul.bf16.gmra.mxu1 %v6223_v10  ;;  %7227 = vst [vmem:[#allocation27_spill] sm:$0xff] %v6694_v0 }
 0x372   : > { %v2715_v51 = vpop.f32.mrf.mxu2 }
 0x373   : > { %v2716_v11 = vadd.f32 %v2715_v51, %v6450_v44  ;;  %v2804_v54 = vpop.f32.mrf.mxu3  ;;  %v6696_v51 = vor.u32 %v5235_v49, %v4620_v9  ;;  %v4908_v49 = vld [vmem:[%s5904_s27 + $0x198] sm:$0xf0] }
 0x374   : > { %v2895_v3 = vpop.f32.mrf.mxu0 }
 0x375   : > { %v6684_v43 = vadd.f32 %v2804_v54, %v2716_v11  ;;  %v2896_v7 = vadd.f32 %v2895_v3, %v6633_v4  ;;  %7228 = vst [vmem:[#allocation28_spill] sm:$0xff] %v6696_v51 }
 0x376   : > { %v2984_v23 = vpop.f32.mrf.mxu1 }
 0x377   : > { %v6687_v15 = vadd.f32 %v2984_v23, %v2896_v7  ;;  %v4844_v23 = vld [vmem:[%s5904_s27 + $0x118] sm:$0xf0] }
 0x37a   : > { %v2717_v40 = vpop.f32.mrf.mxu2 }
 0x37b   : > { %v2718_v10 = vadd.f32 %v2717_v40, %v6460_v52  ;;  %v2806_v44 = vpop.f32.mrf.mxu3  ;;  %v5292_v52 = vld [vmem:[%s5904_s27 + $0x114] sm:$0xf]  ;;  %v4911_v40 = vor.u32 %v5308_v32, %v4908_v49  ;;  %v4634_v32 = vld [vmem:[%s5895_s7 + $0x168] sm:$0xf]  ;;  %v5241_v49 = vld [vmem:[%s5895_s7 + $0x174] sm:$0xf0] }
 0x37c   : > { %v2898_v56 = vpop.f32.mrf.mxu0  ;;  %v4847_v35 = vor.u32 %v5292_v52, %v4844_v23  ;;  %v5034_v52 = vld [vmem:[%s5906_s4 + $0x10] sm:$0xf]  ;;  %v5341_v23 = vld [vmem:[%s5906_s4 + $0x14] sm:$0xf0] }
 0x37d   : > { %v6698_v11 = vadd.f32 %v2806_v44, %v2718_v10  ;;  %v2899_v54 = vadd.f32 %v2898_v56, %v6633_v4  ;;  %3152 = vmatpush.bf16.msra.mxu3 %v4911_v40 }
 0x37e   : > { %v2987_v3 = vpop.f32.mrf.mxu1  ;;  %3063 = vmatpush.bf16.msra.mxu2 %v4847_v35 }
 0x37f   : > { %7229 = vst [vmem:[#allocation29_spill] sm:$0xff] %v6698_v11  ;;  %v6701_v7 = vadd.f32 %v2987_v3, %v2899_v54  ;;  %2759 = vmatmul.bf16.gmra.mxu2 %v6694_v0  ;;  %2937 = vmatmul.bf16.gmra.mxu0 %v6249_v33  ;;  %v4636_v0 = vld [vmem:[%s5895_s7 + $0x178] sm:$0xf0] }
 0x380   : > { %2848 = vmatmul.bf16.gmra.mxu3 %v6696_v51  ;;  %v5035_v51 = vor.u32 %v5341_v23, %v5034_v52 }
 0x381   : > { %7230 = vst [vmem:[#allocation30_spill] sm:$0xff] %v6701_v7  ;;  %3026 = vmatmul.bf16.gmra.mxu1 %v6251_v34  ;;  %v5340_v7 = vld [vmem:[%s5906_s4 + $0x14] sm:$0xf] }
 0x382   : > { %v2720_v9 = vpop.f32.mrf.mxu2  ;;  %3465 = vmatpush.bf16.msra.mxu0 %v5035_v51 }
 0x383   : > { %v2721_v10 = vadd.f32 %v2720_v9, %v6474_v19  ;;  %v2809_v33 = vpop.f32.mrf.mxu3  ;;  %v5036_v19 = vld [vmem:[%s5906_s4 + $0x18] sm:$0xf0]  ;;  %v5239_v9 = vld [vmem:[%s5895_s7 + $0x16c] sm:$0xf] }
 0x384   : > { %v2900_v34 = vpop.f32.mrf.mxu0  ;;  %v5039_v11 = vor.u32 %v5340_v7, %v5036_v19 }
 0x385   : > { %v6712_v44 = vadd.f32 %v2809_v33, %v2721_v10  ;;  %v2901_v56 = vadd.f32 %v2900_v34, %v6633_v4  ;;  %v6726_v33 = vor.u32 %v5241_v49, %v4634_v32 }
 0x386   : > { %v2989_v54 = vpop.f32.mrf.mxu1  ;;  %3554 = vmatpush.bf16.msra.mxu1 %v5039_v11 }
 0x387   : > { %v6715_v3 = vadd.f32 %v2989_v54, %v2901_v56  ;;  %v6728_v56 = vor.u32 %v5239_v9, %v4636_v0 }
 0x38a   : > { %v2722_v35 = vpop.f32.mrf.mxu2 }
 0x38b   : > { %v2723_v40 = vadd.f32 %v2722_v35, %v6488_v55  ;;  %v2811_v10 = vpop.f32.mrf.mxu3  ;;  %v4650_v35 = vld [vmem:[%s5895_s7 + $0x188] sm:$0xf] }
 0x38c   : > { %v2903_v34 = vpop.f32.mrf.mxu0 }
 0x38d   : > { %v6730_v54 = vadd.f32 %v2811_v10, %v2723_v40  ;;  %v2904_v52 = vadd.f32 %v2903_v34, %v6633_v4  ;;  %v5245_v40 = vld [vmem:[%s5895_s7 + $0x194] sm:$0xf0]  ;;  %v5243_v10 = vld [vmem:[%s5895_s7 + $0x18c] sm:$0xf] }
 0x38e   : > { %v2992_v23 = vpop.f32.mrf.mxu1 }
 0x38f   : > { %v6733_v7 = vadd.f32 %v2992_v23, %v2904_v52  ;;  %2764 = vmatmul.bf16.gmra.mxu2 %v6726_v33  ;;  %2942 = vmatmul.bf16.gmra.mxu0 %v6277_v61  ;;  %v4652_v61 = vld [vmem:[%s5895_s7 + $0x198] sm:$0xf0]  ;;  %v6750_v52 = vor.u32 %v5245_v40, %v4650_v35  ;;  %v5306_v35 = vld [vmem:[%s5904_s27 + $0x184] sm:$0xf] }
 0x390   : > { %2853 = vmatmul.bf16.gmra.mxu3 %v6728_v56 }
 0x391   : > { %3031 = vmatmul.bf16.gmra.mxu1 %v6279_v62  ;;  %7231 = vst [vmem:[#allocation31_spill] sm:$0xff] %v6750_v52 }
 0x392   : > { %v2725_v55 = vpop.f32.mrf.mxu2 }
 0x393   : > { %v2726_v0 = vadd.f32 %v2725_v55, %v6506_v8  ;;  %v2814_v51 = vpop.f32.mrf.mxu3  ;;  %v6752_v55 = vor.u32 %v5243_v10, %v4652_v61  ;;  %v4900_v10 = vld [vmem:[%s5904_s27 + $0x188] sm:$0xf0] }
 0x394   : > { %v2905_v11 = vpop.f32.mrf.mxu0 }
 0x395   : > { %v6740_v32 = vadd.f32 %v2814_v51, %v2726_v0  ;;  %v2906_v49 = vadd.f32 %v2905_v11, %v6633_v4  ;;  %7232 = vst [vmem:[#allocation32_spill] sm:$0xff] %v6752_v55 }
 0x396   : > { %v2994_v19 = vpop.f32.mrf.mxu1 }
 0x397   : > { %v6743_v9 = vadd.f32 %v2994_v19, %v2906_v49  ;;  %v4836_v19 = vld [vmem:[%s5904_s27 + $0x108] sm:$0xf0] }
 0x39a   : > { %v2727_v34 = vpop.f32.mrf.mxu2 }
 0x39b   : > { %v2728_v62 = vadd.f32 %v2727_v34, %v6516_v42  ;;  %v2816_v8 = vpop.f32.mrf.mxu3  ;;  %v5290_v42 = vld [vmem:[%s5904_s27 + $0x104] sm:$0xf]  ;;  %v4903_v34 = vor.u32 %v5306_v35, %v4900_v10  ;;  %v4666_v35 = vld [vmem:[%s5895_s7 + $0x1a8] sm:$0xf]  ;;  %v5249_v10 = vld [vmem:[%s5895_s7 + $0x1b4] sm:$0xf0] }
 0x39c   : > { %v2908_v23 = vpop.f32.mrf.mxu0  ;;  %v4839_v40 = vor.u32 %v5290_v42, %v4836_v19  ;;  %v5026_v42 = vld [vmem:[%s5906_s4] sm:$0xf]  ;;  %v5339_v19 = vld [vmem:[%s5906_s4 + $0x4] sm:$0xf0] }
 0x39d   : > { %v6754_v0 = vadd.f32 %v2816_v8, %v2728_v62  ;;  %v2909_v51 = vadd.f32 %v2908_v23, %v6633_v4  ;;  %3153 = vmatpush.bf16.msra.mxu3 %v4903_v34 }
 0x39e   : > { %v2997_v11 = vpop.f32.mrf.mxu1  ;;  %3064 = vmatpush.bf16.msra.mxu2 %v4839_v40 }
 0x39f   : > { %7233 = vst [vmem:[#allocation33_spill] sm:$0xff] %v6754_v0  ;;  %v6757_v49 = vadd.f32 %v2997_v11, %v2909_v51  ;;  %2769 = vmatmul.bf16.gmra.mxu2 %v6750_v52  ;;  %2947 = vmatmul.bf16.gmra.mxu0 %v6305_v25  ;;  %v4668_v52 = vld [vmem:[%s5895_s7 + $0x1b8] sm:$0xf0] }
 0x3a0   : > { %2858 = vmatmul.bf16.gmra.mxu3 %v6752_v55  ;;  %v5027_v55 = vor.u32 %v5339_v19, %v5026_v42 }
 0x3a1   : > { %7234 = vst [vmem:[#allocation34_spill] sm:$0xff] %v6757_v49  ;;  %3036 = vmatmul.bf16.gmra.mxu1 %v6307_v26  ;;  %v5338_v49 = vld [vmem:[%s5906_s4 + $0x4] sm:$0xf] }
 0x3a2   : > { %v2730_v61 = vpop.f32.mrf.mxu2  ;;  %3466 = vmatpush.bf16.msra.mxu0 %v5027_v55 }
 0x3a3   : > { %v2731_v62 = vadd.f32 %v2730_v61, %v6530_v16  ;;  %v2819_v25 = vpop.f32.mrf.mxu3  ;;  %v5028_v16 = vld [vmem:[%s5906_s4 + $0x8] sm:$0xf0]  ;;  %s3775_s4 = sadd.s32 (%p5711_p9), %s5354_s1, %s5889_s11 }
 0x3a4   : > { %v2910_v26 = vpop.f32.mrf.mxu0  ;;  %v5247_v61 = vld [vmem:[%s5895_s7 + $0x1ac] sm:$0xf]  ;;  %v5031_v0 = vor.u32 %v5338_v49, %v5028_v16 }
 0x3a5   : > { %v6768_v8 = vadd.f32 %v2819_v25, %v2731_v62  ;;  %v2911_v23 = vadd.f32 %v2910_v26, %v6633_v4  ;;  %v6782_v25 = vor.u32 %v5249_v10, %v4666_v35 }
 0x3a6   : > { %v2999_v51 = vpop.f32.mrf.mxu1  ;;  %3555 = vmatpush.bf16.msra.mxu1 %v5031_v0 }
 0x3a7   : > { %v6771_v11 = vadd.f32 %v2999_v51, %v2911_v23  ;;  %v6784_v23 = vor.u32 %v5247_v61, %v4668_v52 }
 0x3aa   : > { %v2732_v40 = vpop.f32.mrf.mxu2 }
 0x3ab   : > { %v2733_v34 = vadd.f32 %v2732_v40, %v6544_v22  ;;  %v2821_v62 = vpop.f32.mrf.mxu3  ;;  %v4682_v40 = vld [vmem:[%s5895_s7 + $0x1c8] sm:$0xf] }
 0x3ac   : > { %v2913_v26 = vpop.f32.mrf.mxu0 }
 0x3ad   : > { %v6786_v51 = vadd.f32 %v2821_v62, %v2733_v34  ;;  %v2914_v42 = vadd.f32 %v2913_v26, %v6633_v4  ;;  %v5253_v34 = vld [vmem:[%s5895_s7 + $0x1d4] sm:$0xf0]  ;;  %v5251_v62 = vld [vmem:[%s5895_s7 + $0x1cc] sm:$0xf] }
 0x3ae   : > { %v3002_v19 = vpop.f32.mrf.mxu1 }
 0x3af   : > { %v6789_v49 = vadd.f32 %v3002_v19, %v2914_v42  ;;  %2774 = vmatmul.bf16.gmra.mxu2 %v6782_v25  ;;  %2952 = vmatmul.bf16.gmra.mxu0 %v6333_v57  ;;  %v4684_v57 = vld [vmem:[%s5895_s7 + $0x1d8] sm:$0xf0]  ;;  %v6806_v19 = vor.u32 %v5253_v34, %v4682_v40 }
 0x3b0   : > { %2863 = vmatmul.bf16.gmra.mxu3 %v6784_v23 }
 0x3b1   : > { %3041 = vmatmul.bf16.gmra.mxu1 %v6335_v58 }
 0x3b2   : > { %v2735_v22 = vpop.f32.mrf.mxu2 }
 0x3b3   : > { %v2736_v52 = vadd.f32 %v2735_v22, %v6562_v53  ;;  %v2824_v55 = vpop.f32.mrf.mxu3  ;;  %v6808_v22 = vor.u32 %v5251_v62, %v4684_v57 }
 0x3b4   : > { %v2915_v0 = vpop.f32.mrf.mxu0 }
 0x3b5   : > { %v6796_v35 = vadd.f32 %v2824_v55, %v2736_v52  ;;  %v2916_v10 = vadd.f32 %v2915_v0, %v6633_v4  ;;  %7235 = vst [vmem:[#allocation35_spill] sm:$0xff] %v6808_v22 }
 0x3b6   : > { %v3004_v16 = vpop.f32.mrf.mxu1 }
 0x3b7   : > { %v6799_v61 = vadd.f32 %v3004_v16, %v2916_v10 }
 0x3ba   : > { %v2737_v26 = vpop.f32.mrf.mxu2 }
 0x3bb   : > { %v2738_v42 = vadd.f32 %v2737_v26, %v6572_v46  ;;  %v2826_v58 = vpop.f32.mrf.mxu3 }
 0x3bc   : > { %v2918_v53 = vpop.f32.mrf.mxu0 }
 0x3bd   : > { %v6810_v52 = vadd.f32 %v2826_v58, %v2738_v42  ;;  %v2919_v55 = vadd.f32 %v2918_v53, %v6633_v4  ;;  %v4698_v58 = vld [vmem:[%s5895_s7 + $0x1e8] sm:$0xf]  ;;  %v5257_v53 = vld [vmem:[%s5895_s7 + $0x1f4] sm:$0xf0] }
 0x3be   : > { %v3007_v0 = vpop.f32.mrf.mxu1 }
 0x3bf   : > { %v6813_v10 = vadd.f32 %v3007_v0, %v2919_v55  ;;  %2779 = vmatmul.bf16.gmra.mxu2 %v6806_v19  ;;  %2957 = vmatmul.bf16.gmra.mxu0 %v6361_v29  ;;  %v5255_v55 = vld [vmem:[%s5895_s7 + $0x1ec] sm:$0xf]  ;;  %v4700_v29 = vld [vmem:[%s5895_s7 + $0x1f8] sm:$0xf0]  ;;  %s5092_s7 = sshll.u32 (%p5711_p9), %s3775_s4, 2 }
 0x3c0   : > { %2868 = vmatmul.bf16.gmra.mxu3 %v6808_v22  ;;  %v6830_v22 = vor.u32 %v5257_v53, %v4698_v58  ;;  %s7085_s12 = scalar_lea.vmem (%p5711_p9), %s7181_s5, %s5092_s7 }
 0x3c1   : > { %7236 = vst [vmem:[#allocation36_spill] sm:$0xff] %v6813_v10  ;;  %3046 = vmatmul.bf16.gmra.mxu1 %v6363_v30 }
 0x3c2   : > { %v2740_v46 = vpop.f32.mrf.mxu2 }
 0x3c3   : > { %v2741_v16 = vadd.f32 %v2740_v46, %v6586_v45  ;;  %v2829_v40 = vpop.f32.mrf.mxu3  ;;  %v6832_v46 = vor.u32 %v5255_v55, %v4700_v29 }
 0x3c4   : > { %v2920_v34 = vpop.f32.mrf.mxu0 }
 0x3c5   : > { %v6820_v62 = vadd.f32 %v2829_v40, %v2741_v16  ;;  %v2921_v57 = vadd.f32 %v2920_v34, %v6633_v4 }
 0x3c6   : > { %v3009_v26 = vpop.f32.mrf.mxu1 }
 0x3c7   : > { %v6823_v42 = vadd.f32 %v3009_v26, %v2921_v57 }
 0x3ca   : > { %v2742_v0 = vpop.f32.mrf.mxu2 }
 0x3cb   : > { %v2743_v10 = vadd.f32 %v2742_v0, %v6600_v63  ;;  %v2831_v30 = vpop.f32.mrf.mxu3 }
 0x3cc   : > { %v2923_v45 = vpop.f32.mrf.mxu0 }
 0x3cd   : > { %v6834_v16 = vadd.f32 %v2831_v30, %v2743_v10  ;;  %v2924_v40 = vadd.f32 %v2923_v45, %v6633_v4 }
 0x3ce   : > { %v3012_v34 = vpop.f32.mrf.mxu1 }
 0x3cf   : > { %v6837_v57 = vadd.f32 %v3012_v34, %v2924_v40  ;;  %2784 = vmatmul.bf16.gmra.mxu2 %v6830_v22  ;;  %2962 = vmatmul.bf16.gmra.mxu0 %v6389_v5  ;;  %v5322_v40 = vld [vmem:[#allocation2 + $0x30] sm:$0xff] }
 0x3d0   : > { %2873 = vmatmul.bf16.gmra.mxu3 %v6832_v46 }
 0x3d1   : > { %7237 = vst [vmem:[#allocation37_spill] sm:$0xff] %v6837_v57  ;;  %3051 = vmatmul.bf16.gmra.mxu1 %v6391_v6 }
 0x3d2   : > { %v2745_v63 = vpop.f32.mrf.mxu2 }
 0x3d3   : > { %v2746_v26 = vadd.f32 %v2745_v63, %v6618_v60  ;;  %v2834_v58 = vpop.f32.mrf.mxu3 }
 0x3d4   : > { %v2925_v53 = vpop.f32.mrf.mxu0 }
 0x3d5   : > { %v6844_v10 = vadd.f32 %v2834_v58, %v2746_v26  ;;  %v2926_v55 = vadd.f32 %v2925_v53, %v6633_v4 }
 0x3d6   : > { %v3014_v29 = vpop.f32.mrf.mxu1 }
 0x3d7   : > { %v6847_v0 = vadd.f32 %v3014_v29, %v2926_v55 }
 0x3da   : > { %v2747_v30 = vpop.f32.mrf.mxu2 }
 0x3db   : > { %v2748_v45 = vadd.f32 %v2747_v30, %v6628_v59  ;;  %v2836_v5 = vpop.f32.mrf.mxu3 }
 0x3dc   : > { %v2928_v34 = vpop.f32.mrf.mxu0 }
 0x3dd   : > { %v6850_v57 = vadd.f32 %v2836_v5, %v2748_v45  ;;  %v2929_v6 = vadd.f32 %v2928_v34, %v6633_v4 }
 0x3de   : > { %v3017_v60 = vpop.f32.mrf.mxu1 }
 0x3df   : > { %v6853_v63 = vadd.f32 %v3017_v60, %v2929_v6  ;;  %3065 = vmatmul.bf16.vlgmr.msra.gmra.mxu2 %v6413_v18  ;;  %3467 = vmatmul.bf16.vlgmr.msra.gmra.mxu0 %v5322_v40  ;;  %v5323_v6 = vld [vmem:[#allocation2] sm:$0xff] }
 0x3e0   : > { %3154 = vmatmul.bf16.vlgmr.msra.gmra.mxu3 %v6415_v20 }
 0x3e1   : > { %3556 = vmatmul.bf16.vlgmr.msra.gmra.mxu1 %v5322_v40 }
 0x3e2   : > { %v2750_v26 = vpop.f32.mrf.mxu2 }
 0x3e3   : > { %v2751_v58 = vadd.f32 %v2750_v26, %v6429_v48  ;;  %v2839_v59 = vpop.f32.mrf.mxu3 }
 0x3e4   : > { %v2930_v53 = vpop.f32.mrf.mxu0 }
 0x3e5   : > { %v6858_v55 = vadd.f32 %v2839_v59, %v2751_v58  ;;  %v2931_v29 = vadd.f32 %v2930_v53, %v6633_v4 }
 0x3e6   : > { %v3019_v30 = vpop.f32.mrf.mxu1 }
 0x3e7   : > { %v6861_v45 = vadd.f32 %v3019_v30, %v2931_v29 }
 0x3ea   : > { %v2752_v5 = vpop.f32.mrf.mxu2 }
 0x3eb   : > { %v2753_v34 = vadd.f32 %v2752_v5, %v6447_v39  ;;  %v2841_v18 = vpop.f32.mrf.mxu3 }
 0x3ec   : > { %v2933_v60 = vpop.f32.mrf.mxu0 }
 0x3ed   : > { %v6864_v20 = vadd.f32 %v2841_v18, %v2753_v34  ;;  %v2934_v40 = vadd.f32 %v2933_v60, %v6633_v4 }
 0x3ee   : > { %v3022_v48 = vpop.f32.mrf.mxu1 }
 0x3ef   : > { %v6867_v26 = vadd.f32 %v3022_v48, %v2934_v40  ;;  %3070 = vmatmul.bf16.gmra.mxu2 %v6443_v21  ;;  %3472 = vmatmul.bf16.gmra.mxu0 %v5323_v6  ;;  %v5324_v40 = vld [vmem:[#allocation2 + $0x58] sm:$0xff] }
 0x3f0   : > { %3159 = vmatmul.bf16.gmra.mxu3 %v6445_v38 }
 0x3f1   : > { %3561 = vmatmul.bf16.gmra.mxu1 %v5323_v6 }
 0x3f2   : > { %v2755_v58 = vpop.f32.mrf.mxu2 }
 0x3f3   : > { %v2756_v59 = vadd.f32 %v2755_v58, %v6457_v41  ;;  %v2844_v39 = vpop.f32.mrf.mxu3 }
 0x3f4   : > { %v2935_v53 = vpop.f32.mrf.mxu0 }
 0x3f5   : > { %v6872_v29 = vadd.f32 %v2844_v39, %v2756_v59  ;;  %v2936_v30 = vadd.f32 %v2935_v53, %v6633_v4 }
 0x3f6   : > { %v3024_v5 = vpop.f32.mrf.mxu1 }
 0x3f7   : > { %v6875_v34 = vadd.f32 %v3024_v5, %v2936_v30 }
 0x3fa   : > { %v2757_v18 = vpop.f32.mrf.mxu2 }
 0x3fb   : > { %v2758_v60 = vadd.f32 %v2757_v18, %v6471_v14  ;;  %v2846_v21 = vpop.f32.mrf.mxu3 }
 0x3fc   : > { %v2938_v48 = vpop.f32.mrf.mxu0 }
 0x3fd   : > { %v6878_v38 = vadd.f32 %v2846_v21, %v2758_v60  ;;  %v2939_v6 = vadd.f32 %v2938_v48, %v6633_v4 }
 0x3fe   : > { %v3027_v41 = vpop.f32.mrf.mxu1 }
 0x3ff   : > { %v6881_v58 = vadd.f32 %v3027_v41, %v2939_v6  ;;  %3075 = vmatmul.bf16.gmra.mxu2 %v6467_v2  ;;  %3477 = vmatmul.bf16.gmra.mxu0 %v5324_v40  ;;  %v5325_v6 = vld [vmem:[#allocation2 + $0x18] sm:$0xff] }
 0x400   : > { %3164 = vmatmul.bf16.gmra.mxu3 %v6469_v13 }
 0x401   : > { %3566 = vmatmul.bf16.gmra.mxu1 %v5324_v40 }
 0x402   : > { %v2760_v59 = vpop.f32.mrf.mxu2 }
 0x403   : > { %v2761_v39 = vadd.f32 %v2760_v59, %v6485_v50  ;;  %v2849_v14 = vpop.f32.mrf.mxu3 }
 0x404   : > { %v2940_v53 = vpop.f32.mrf.mxu0 }
 0x405   : > { %v6886_v30 = vadd.f32 %v2849_v14, %v2761_v39  ;;  %v2941_v5 = vadd.f32 %v2940_v53, %v6633_v4  ;;  %v7242_v39 = vld [vmem:[#allocation7_spill] sm:$0xff]  ;;  %v7243_v14 = vld [vmem:[#allocation8_spill] sm:$0xff] }
 0x406   : > { %v3029_v18 = vpop.f32.mrf.mxu1 }
 0x407   : > { %7238 = vst [vmem:[#allocation38_spill] sm:$0xff] %v6886_v30  ;;  %v6889_v60 = vadd.f32 %v3029_v18, %v2941_v5  ;;  %v7244_v5 = vld [vmem:[#allocation9_spill] sm:$0xff] }
 0x409   : > { %7239 = vst [vmem:[#allocation39_spill] sm:$0xff] %v6889_v60 }
 0x40a   : > { %v2762_v21 = vpop.f32.mrf.mxu2 }
 0x40b   : > { %v2763_v48 = vadd.f32 %v2762_v21, %v6503_v37  ;;  %v2851_v2 = vpop.f32.mrf.mxu3 }
 0x40c   : > { %v2943_v41 = vpop.f32.mrf.mxu0 }
 0x40d   : > { %v6892_v13 = vadd.f32 %v2851_v2, %v2763_v48  ;;  %v2944_v40 = vadd.f32 %v2943_v41, %v6633_v4 }
 0x40e   : > { %v3032_v50 = vpop.f32.mrf.mxu1 }
 0x40f   : > { %7240 = vst [vmem:[#allocation40_spill] sm:$0xff] %v6892_v13  ;;  %v6895_v59 = vadd.f32 %v3032_v50, %v2944_v40  ;;  %3080 = vmatmul.bf16.gmra.mxu2 %v7242_v39  ;;  %3482 = vmatmul.bf16.gmra.mxu0 %v5325_v6  ;;  %v7247_v50 = vld [vmem:[#allocation12_spill] sm:$0xff]  ;;  %v5326_v13 = vld [vmem:[#allocation2 + $0x50] sm:$0xff] }
 0x410   : > { %3169 = vmatmul.bf16.gmra.mxu3 %v7243_v14 }
 0x411   : > { %7241 = vst [vmem:[#allocation41_spill] sm:$0xff] %v6895_v59  ;;  %3571 = vmatmul.bf16.gmra.mxu1 %v5325_v6 }
 0x412   : > { %v2765_v53 = vpop.f32.mrf.mxu2 }
 0x413   : > { %v2766_v18 = vadd.f32 %v2765_v53, %v7244_v5  ;;  %v2854_v37 = vpop.f32.mrf.mxu3 }
 0x414   : > { %v2945_v21 = vpop.f32.mrf.mxu0 }
 0x415   : > { %v6900_v60 = vadd.f32 %v2854_v37, %v2766_v18  ;;  %v2946_v48 = vadd.f32 %v2945_v21, %v6633_v4  ;;  %v7250_v18 = vld [vmem:[#allocation10_spill] sm:$0xff]  ;;  %v7251_v37 = vld [vmem:[#allocation11_spill] sm:$0xff] }
 0x416   : > { %v3034_v2 = vpop.f32.mrf.mxu1 }
 0x417   : > { %7245 = vst [vmem:[#allocation7_spill] sm:$0xff] %v6900_v60  ;;  %v6903_v41 = vadd.f32 %v3034_v2, %v2946_v48  ;;  %v7252_v48 = vld [vmem:[#allocation13_spill] sm:$0xff] }
 0x419   : > { %7246 = vst [vmem:[#allocation8_spill] sm:$0xff] %v6903_v41 }
 0x41a   : > { %v2767_v40 = vpop.f32.mrf.mxu2 }
 0x41b   : > { %v2768_v59 = vadd.f32 %v2767_v40, %v7247_v50  ;;  %v2856_v39 = vpop.f32.mrf.mxu3 }
 0x41c   : > { %v2948_v30 = vpop.f32.mrf.mxu0 }
 0x41d   : > { %v6906_v14 = vadd.f32 %v2856_v39, %v2768_v59  ;;  %v2949_v6 = vadd.f32 %v2948_v30, %v6633_v4 }
 0x41e   : > { %v3037_v53 = vpop.f32.mrf.mxu1 }
 0x41f   : > { %7248 = vst [vmem:[#allocation9_spill] sm:$0xff] %v6906_v14  ;;  %v6909_v5 = vadd.f32 %v3037_v53, %v2949_v6  ;;  %3085 = vmatmul.bf16.gmra.mxu2 %v7250_v18  ;;  %3487 = vmatmul.bf16.gmra.mxu0 %v5326_v13  ;;  %v7255_v53 = vld [vmem:[#allocation16_spill] sm:$0xff] }
 0x420   : > { %3174 = vmatmul.bf16.gmra.mxu3 %v7251_v37  ;;  %v5327_v14 = vld [vmem:[#allocation2 + $0x68] sm:$0xff] }
 0x421   : > { %7249 = vst [vmem:[#allocation12_spill] sm:$0xff] %v6909_v5  ;;  %3576 = vmatmul.bf16.gmra.mxu1 %v5326_v13 }
 0x422   : > { %v2770_v21 = vpop.f32.mrf.mxu2 }
 0x423   : > { %v2771_v2 = vadd.f32 %v2770_v21, %v7252_v48  ;;  %v2859_v40 = vpop.f32.mrf.mxu3 }
 0x424   : > { %v2950_v50 = vpop.f32.mrf.mxu0 }
 0x425   : > { %v6914_v41 = vadd.f32 %v2859_v40, %v2771_v2  ;;  %v2951_v59 = vadd.f32 %v2950_v50, %v6633_v4  ;;  %v7258_v2 = vld [vmem:[#allocation14_spill] sm:$0xff]  ;;  %v7259_v40 = vld [vmem:[#allocation15_spill] sm:$0xff] }
 0x426   : > { %v3039_v39 = vpop.f32.mrf.mxu1 }
 0x427   : > { %7253 = vst [vmem:[#allocation10_spill] sm:$0xff] %v6914_v41  ;;  %v6917_v30 = vadd.f32 %v3039_v39, %v2951_v59  ;;  %v7260_v59 = vld [vmem:[#allocation17_spill] sm:$0xff] }
 0x429   : > { %7254 = vst [vmem:[#allocation11_spill] sm:$0xff] %v6917_v30 }
 0x42a   : > { %v2772_v6 = vpop.f32.mrf.mxu2 }
 0x42b   : > { %v2773_v5 = vadd.f32 %v2772_v6, %v7255_v53  ;;  %v2861_v18 = vpop.f32.mrf.mxu3 }
 0x42c   : > { %v2953_v60 = vpop.f32.mrf.mxu0 }
 0x42d   : > { %v6920_v37 = vadd.f32 %v2861_v18, %v2773_v5  ;;  %v2954_v13 = vadd.f32 %v2953_v60, %v6633_v4 }
 0x42e   : > { %v3042_v21 = vpop.f32.mrf.mxu1 }
 0x42f   : > { %7256 = vst [vmem:[#allocation13_spill] sm:$0xff] %v6920_v37  ;;  %v6923_v48 = vadd.f32 %v3042_v21, %v2954_v13  ;;  %3090 = vmatmul.bf16.gmra.mxu2 %v7258_v2  ;;  %3492 = vmatmul.bf16.gmra.mxu0 %v5327_v14  ;;  %v7262_v21 = vld [vmem:[#allocation20_spill] sm:$0xff] }
 0x430   : > { %3179 = vmatmul.bf16.gmra.mxu3 %v7259_v40  ;;  %v5328_v37 = vld [vmem:[#allocation2 + $0x8] sm:$0xff] }
 0x431   : > { %7257 = vst [vmem:[#allocation16_spill] sm:$0xff] %v6923_v48  ;;  %3581 = vmatmul.bf16.gmra.mxu1 %v5327_v14 }
 0x432   : > { %v2775_v50 = vpop.f32.mrf.mxu2 }
 0x433   : > { %v2776_v39 = vadd.f32 %v2775_v50, %v7260_v59  ;;  %v2864_v6 = vpop.f32.mrf.mxu3 }
 0x434   : > { %v2955_v53 = vpop.f32.mrf.mxu0 }
 0x435   : > { %v6928_v30 = vadd.f32 %v2864_v6, %v2776_v39  ;;  %v2956_v5 = vadd.f32 %v2955_v53, %v6633_v4  ;;  %v7265_v39 = vld [vmem:[#allocation18_spill] sm:$0xff]  ;;  %v7266_v6 = vld [vmem:[#allocation19_spill] sm:$0xff] }
 0x436   : > { %v3044_v18 = vpop.f32.mrf.mxu1 }
 0x437   : > { %v6931_v60 = vadd.f32 %v3044_v18, %v2956_v5  ;;  %v7267_v5 = vld [vmem:[#allocation21_spill] sm:$0xff] }
 0x439   : > { %7261 = vst [vmem:[#allocation14_spill] sm:$0xff] %v6931_v60 }
 0x43a   : > { %v2777_v13 = vpop.f32.mrf.mxu2 }
 0x43b   : > { %v2778_v48 = vadd.f32 %v2777_v13, %v7262_v21  ;;  %v2866_v2 = vpop.f32.mrf.mxu3 }
 0x43c   : > { %v2958_v41 = vpop.f32.mrf.mxu0 }
 0x43d   : > { %v6934_v40 = vadd.f32 %v2866_v2, %v2778_v48  ;;  %v2959_v14 = vadd.f32 %v2958_v41, %v6633_v4 }
 0x43e   : > { %v3047_v50 = vpop.f32.mrf.mxu1 }
 0x43f   : > { %7263 = vst [vmem:[#allocation15_spill] sm:$0xff] %v6934_v40  ;;  %v6937_v59 = vadd.f32 %v3047_v50, %v2959_v14  ;;  %3095 = vmatmul.bf16.gmra.mxu2 %v7265_v39  ;;  %3497 = vmatmul.bf16.gmra.mxu0 %v5328_v37 }
 0x440   : > { %3184 = vmatmul.bf16.gmra.mxu3 %v7266_v6 }
 0x441   : > { %7264 = vst [vmem:[#allocation17_spill] sm:$0xff] %v6937_v59  ;;  %3586 = vmatmul.bf16.gmra.mxu1 %v5328_v37  ;;  %v5329_v59 = vld [vmem:[#allocation2 + $0x48] sm:$0xff] }
 0x442   : > { %v2780_v53 = vpop.f32.mrf.mxu2 }
 0x443   : > { %v2781_v18 = vadd.f32 %v2780_v53, %v7267_v5  ;;  %v2869_v13 = vpop.f32.mrf.mxu3 }
 0x444   : > { %v2960_v21 = vpop.f32.mrf.mxu0 }
 0x445   : > { %v6942_v60 = vadd.f32 %v2869_v13, %v2781_v18  ;;  %v2961_v48 = vadd.f32 %v2960_v21, %v6633_v4  ;;  %v7271_v13 = vld [vmem:[#allocation22_spill] sm:$0xff] }
 0x446   : > { %v3049_v2 = vpop.f32.mrf.mxu1 }
 0x447   : > { %v6945_v41 = vadd.f32 %v3049_v2, %v2961_v48 }
 0x449   : > { %7268 = vst [vmem:[#allocation20_spill] sm:$0xff] %v6945_v41 }
 0x44a   : > { %v2782_v14 = vpop.f32.mrf.mxu2 }
 0x44b   : > { %v2783_v50 = vadd.f32 %v2782_v14, %v6615_v47  ;;  %v2871_v39 = vpop.f32.mrf.mxu3 }
 0x44c   : > { %v2963_v40 = vpop.f32.mrf.mxu0 }
 0x44d   : > { %v6948_v6 = vadd.f32 %v2871_v39, %v2783_v50  ;;  %v2964_v37 = vadd.f32 %v2963_v40, %v6633_v4 }
 0x44e   : > { %v3052_v53 = vpop.f32.mrf.mxu1 }
 0x44f   : > { %7269 = vst [vmem:[#allocation18_spill] sm:$0xff] %v6948_v6  ;;  %v6951_v5 = vadd.f32 %v3052_v53, %v2964_v37  ;;  %3100 = vmatmul.bf16.gmra.mxu2 %v6611_v28  ;;  %3502 = vmatmul.bf16.gmra.mxu0 %v5329_v59  ;;  %v7274_v37 = vld [vmem:[#allocation25_spill] sm:$0xff] }
 0x450   : > { %3189 = vmatmul.bf16.gmra.mxu3 %v6613_v31 }
 0x451   : > { %7270 = vst [vmem:[#allocation19_spill] sm:$0xff] %v6951_v5  ;;  %3591 = vmatmul.bf16.gmra.mxu1 %v5329_v59  ;;  %v5330_v5 = vld [vmem:[#allocation2 + $0x40] sm:$0xff] }
 0x452   : > { %v2785_v18 = vpop.f32.mrf.mxu2 }
 0x453   : > { %v2786_v21 = vadd.f32 %v2785_v18, %v7271_v13  ;;  %v2874_v47 = vpop.f32.mrf.mxu3  ;;  %v7276_v18 = vld [vmem:[#allocation23_spill] sm:$0xff]  ;;  %v7277_v13 = vld [vmem:[#allocation24_spill] sm:$0xff] }
 0x454   : > { %v2965_v48 = vpop.f32.mrf.mxu0 }
 0x455   : > { %v6956_v2 = vadd.f32 %v2874_v47, %v2786_v21  ;;  %v2966_v14 = vadd.f32 %v2965_v48, %v6633_v4  ;;  %v7278_v21 = vld [vmem:[#allocation26_spill] sm:$0xff] }
 0x456   : > { %v3054_v50 = vpop.f32.mrf.mxu1 }
 0x457   : > { %7272 = vst [vmem:[#allocation21_spill] sm:$0xff] %v6956_v2  ;;  %v6959_v40 = vadd.f32 %v3054_v50, %v2966_v14  ;;  %v5331_v2 = vld [vmem:[#allocation2 + $0x20] sm:$0xff] }
 0x459   : > { %7273 = vst [vmem:[#allocation22_spill] sm:$0xff] %v6959_v40 }
 0x45a   : > { %v2787_v39 = vpop.f32.mrf.mxu2 }
 0x45b   : > { %v2788_v53 = vadd.f32 %v2787_v39, %v7274_v37  ;;  %v2876_v28 = vpop.f32.mrf.mxu3 }
 0x45c   : > { %v3468_v6 = vpop.f32.mrf.mxu0 }
 0x45d   : > { %v6962_v31 = vadd.f32 %v2876_v28, %v2788_v53  ;;  %v3637_v37 = vadd.f32 %v3468_v6, %v6656_v24 }
 0x45e   : > { %v3557_v59 = vpop.f32.mrf.mxu1 }
 0x45f   : > { %7275 = vst [vmem:[#allocation25_spill] sm:$0xff] %v6962_v31  ;;  %3105 = vmatmul.bf16.gmra.mxu2 %v7276_v18  ;;  %3507 = vmatmul.bf16.gmra.mxu0 %v5330_v5 }
 0x460   : > { %3194 = vmatmul.bf16.gmra.mxu3 %v7277_v13 }
 0x461   : > { %3596 = vmatmul.bf16.gmra.mxu1 %v5330_v5 }
 0x462   : > { %v3066_v4 = vpop.f32.mrf.mxu2 }
 0x463   : > { %v3067_v47 = vadd.f32 %v3066_v4, %v7278_v21  ;;  %v3155_v48 = vpop.f32.mrf.mxu3 }
 0x464   : > { %v3470_v14 = vpop.f32.mrf.mxu0 }
 0x465   : > { %v3156_v50 = vadd.f32 %v3155_v48, %v3067_v47  ;;  %v3639_v4 = vadd.f32 %v3470_v14, %v6674_v27 }
 0x466   : > { %v3559_v39 = vpop.f32.mrf.mxu1 }
 0x467   : > { %v3638_v40 = vadd.f32 %v3557_v59, %v3156_v50 }
 0x469   : > { %v3701_v53 = vpack.c.bf16 %v3638_v40, %v3637_v37 }
 0x46a   : > { %v3068_v28 = vpop.f32.mrf.mxu2 }
 0x46b   : > { %3733 = vst [vmem:[%s5908_s29] sm:$0xff] %v3701_v53  ;;  %v3069_v18 = vadd.f32 %v3068_v28, %v6659_v17  ;;  %v3157_v31 = vpop.f32.mrf.mxu3  ;;  %v7279_v28 = vld [vmem:[#allocation29_spill] sm:$0xff] }
 0x46c   : > { %v3473_v13 = vpop.f32.mrf.mxu0 }
 0x46d   : > { %v3158_v5 = vadd.f32 %v3157_v31, %v3069_v18  ;;  %v3641_v48 = vadd.f32 %v3473_v13, %v6684_v43  ;;  %v7281_v43 = vld [vmem:[#allocation28_spill] sm:$0xff] }
 0x46e   : > { %v3562_v41 = vpop.f32.mrf.mxu1 }
 0x46f   : > { %v3640_v21 = vadd.f32 %v3559_v39, %v3158_v5  ;;  %3110 = vmatmul.bf16.gmra.mxu2 %v6670_v36  ;;  %3512 = vmatmul.bf16.gmra.mxu0 %v5331_v2  ;;  %v7280_v5 = vld [vmem:[#allocation27_spill] sm:$0xff] }
 0x470   : > { %3199 = vmatmul.bf16.gmra.mxu3 %v6672_v12 }
 0x471   : > { %3601 = vmatmul.bf16.gmra.mxu1 %v5331_v2  ;;  %v3702_v24 = vpack.c.bf16 %v3640_v21, %v3639_v4  ;;  %v5332_v2 = vld [vmem:[#allocation2 + $0x10] sm:$0xff]  ;;  %v7282_v4 = vld [vmem:[#allocation30_spill] sm:$0xff] }
 0x472   : > { %v3071_v6 = vpop.f32.mrf.mxu2 }
 0x473   : > { %3734 = vst [vmem:[%s5908_s29 + $0x8] sm:$0xff] %v3702_v24  ;;  %v3072_v17 = vadd.f32 %v3071_v6, %v6677_v1  ;;  %v3160_v40 = vpop.f32.mrf.mxu3 }
 0x474   : > { %v3475_v59 = vpop.f32.mrf.mxu0 }
 0x475   : > { %v3161_v47 = vadd.f32 %v3160_v40, %v3072_v17  ;;  %v3643_v1 = vadd.f32 %v3475_v59, %v7279_v28 }
 0x476   : > { %v3564_v31 = vpop.f32.mrf.mxu1 }
 0x477   : > { %v3642_v27 = vadd.f32 %v3562_v41, %v3161_v47 }
 0x479   : > { %v3703_v14 = vpack.c.bf16 %v3642_v27, %v3641_v48 }
 0x47a   : > { %v3073_v50 = vpop.f32.mrf.mxu2 }
 0x47b   : > { %3735 = vst [vmem:[%s5908_s29 + $0x10] sm:$0xff] %v3703_v14  ;;  %v3074_v36 = vadd.f32 %v3073_v50, %v6687_v15  ;;  %v3162_v12 = vpop.f32.mrf.mxu3  ;;  %v5333_v14 = vld [vmem:[#allocation2 + $0x38] sm:$0xff] }
 0x47c   : > { %v3478_v39 = vpop.f32.mrf.mxu0 }
 0x47d   : > { %v3163_v37 = vadd.f32 %v3162_v12, %v3074_v36  ;;  %v3645_v40 = vadd.f32 %v3478_v39, %v6712_v44 }
 0x47e   : > { %v3567_v53 = vpop.f32.mrf.mxu1 }
 0x47f   : > { %v3644_v18 = vadd.f32 %v3564_v31, %v3163_v37  ;;  %3115 = vmatmul.bf16.gmra.mxu2 %v7280_v5  ;;  %3517 = vmatmul.bf16.gmra.mxu0 %v5332_v2 }
 0x480   : > { %3204 = vmatmul.bf16.gmra.mxu3 %v7281_v43 }
 0x481   : > { %3606 = vmatmul.bf16.gmra.mxu1 %v5332_v2  ;;  %v3704_v41 = vpack.c.bf16 %v3644_v18, %v3643_v1 }
 0x482   : > { %v3076_v13 = vpop.f32.mrf.mxu2 }
 0x483   : > { %3736 = vst [vmem:[%s5908_s29 + $0x18] sm:$0xff] %v3704_v41  ;;  %v3077_v15 = vadd.f32 %v3076_v13, %v7282_v4  ;;  %v3165_v21 = vpop.f32.mrf.mxu3  ;;  %v5334_v13 = vld [vmem:[#allocation2 + $0x60] sm:$0xff] }
 0x484   : > { %v3480_v24 = vpop.f32.mrf.mxu0 }
 0x485   : > { %v3166_v6 = vadd.f32 %v3165_v21, %v3077_v15  ;;  %v3647_v2 = vadd.f32 %v3480_v24, %v6730_v54  ;;  %v7283_v24 = vld [vmem:[#allocation33_spill] sm:$0xff] }
 0x486   : > { %v3569_v17 = vpop.f32.mrf.mxu1 }
 0x487   : > { %v3646_v59 = vadd.f32 %v3567_v53, %v3166_v6 }
 0x489   : > { %v3705_v47 = vpack.c.bf16 %v3646_v59, %v3645_v40 }
 0x48a   : > { %v3078_v31 = vpop.f32.mrf.mxu2 }
 0x48b   : > { %3737 = vst [vmem:[%s5908_s29 + $0x20] sm:$0xff] %v3705_v47  ;;  %v3079_v48 = vadd.f32 %v3078_v31, %v6715_v3  ;;  %v3167_v27 = vpop.f32.mrf.mxu3  ;;  %v7286_v47 = vld [vmem:[#allocation34_spill] sm:$0xff] }
 0x48c   : > { %v3483_v50 = vpop.f32.mrf.mxu0 }
 0x48d   : > { %v3168_v36 = vadd.f32 %v3167_v27, %v3079_v48  ;;  %v3649_v5 = vadd.f32 %v3483_v50, %v6740_v32  ;;  %v7285_v32 = vld [vmem:[#allocation32_spill] sm:$0xff] }
 0x48e   : > { %v3572_v12 = vpop.f32.mrf.mxu1 }
 0x48f   : > { %v3648_v37 = vadd.f32 %v3569_v17, %v3168_v36  ;;  %3120 = vmatmul.bf16.gmra.mxu2 %v6726_v33  ;;  %3522 = vmatmul.bf16.gmra.mxu0 %v5333_v14  ;;  %v7284_v17 = vld [vmem:[#allocation31_spill] sm:$0xff] }
 0x490   : > { %3209 = vmatmul.bf16.gmra.mxu3 %v6728_v56 }
 0x491   : > { %3611 = vmatmul.bf16.gmra.mxu1 %v5333_v14  ;;  %v3706_v44 = vpack.c.bf16 %v3648_v37, %v3647_v2 }
 0x492   : > { %v3081_v39 = vpop.f32.mrf.mxu2 }
 0x493   : > { %3738 = vst [vmem:[%s5908_s29 + $0x28] sm:$0xff] %v3706_v44  ;;  %v3082_v3 = vadd.f32 %v3081_v39, %v6733_v7  ;;  %v3170_v53 = vpop.f32.mrf.mxu3  ;;  %v5335_v39 = vld [vmem:[#allocation2 + $0x70] sm:$0xff] }
 0x494   : > { %v3485_v28 = vpop.f32.mrf.mxu0 }
 0x495   : > { %v3171_v1 = vadd.f32 %v3170_v53, %v3082_v3  ;;  %v3651_v7 = vadd.f32 %v3485_v28, %v7283_v24 }
 0x496   : > { %v3574_v18 = vpop.f32.mrf.mxu1 }
 0x497   : > { %v3650_v54 = vadd.f32 %v3572_v12, %v3171_v1 }
 0x499   : > { %v3707_v43 = vpack.c.bf16 %v3650_v54, %v3649_v5 }
 0x49a   : > { %v3083_v41 = vpop.f32.mrf.mxu2 }
 0x49b   : > { %3739 = vst [vmem:[%s5908_s29 + $0x30] sm:$0xff] %v3707_v43  ;;  %v3084_v33 = vadd.f32 %v3083_v41, %v6743_v9  ;;  %v3172_v56 = vpop.f32.mrf.mxu3 }
 0x49c   : > { %v3488_v4 = vpop.f32.mrf.mxu0 }
 0x49d   : > { %v3173_v15 = vadd.f32 %v3172_v56, %v3084_v33  ;;  %v3653_v50 = vadd.f32 %v3488_v4, %v6768_v8 }
 0x49e   : > { %v3577_v21 = vpop.f32.mrf.mxu1 }
 0x49f   : > { %v3652_v6 = vadd.f32 %v3574_v18, %v3173_v15  ;;  %3125 = vmatmul.bf16.gmra.mxu2 %v7284_v17  ;;  %3527 = vmatmul.bf16.gmra.mxu0 %v5334_v13  ;;  %v5336_v15 = vld [vmem:[#allocation2 + $0x78] sm:$0xff] }
 0x4a0   : > { %3214 = vmatmul.bf16.gmra.mxu3 %v7285_v32 }
 0x4a1   : > { %3616 = vmatmul.bf16.gmra.mxu1 %v5334_v13  ;;  %v3708_v40 = vpack.c.bf16 %v3652_v6, %v3651_v7 }
 0x4a2   : > { %v3086_v59 = vpop.f32.mrf.mxu2 }
 0x4a3   : > { %3740 = vst [vmem:[%s5908_s29 + $0x38] sm:$0xff] %v3708_v40  ;;  %v3087_v9 = vadd.f32 %v3086_v59, %v7286_v47  ;;  %v3175_v31 = vpop.f32.mrf.mxu3  ;;  %v7288_v40 = vld [vmem:[#allocation36_spill] sm:$0xff] }
 0x4a4   : > { %v3490_v48 = vpop.f32.mrf.mxu0 }
 0x4a5   : > { %v3176_v27 = vadd.f32 %v3175_v31, %v3087_v9  ;;  %v3655_v1 = vadd.f32 %v3490_v48, %v6786_v51 }
 0x4a6   : > { %v3579_v14 = vpop.f32.mrf.mxu1 }
 0x4a7   : > { %v3654_v36 = vadd.f32 %v3577_v21, %v3176_v27 }
 0x4a9   : > { %v3709_v12 = vpack.c.bf16 %v3654_v36, %v3653_v50  ;;  %v5337_v36 = vld [vmem:[#allocation2 + $0x28] sm:$0xff] }
 0x4aa   : > { %v3088_v2 = vpop.f32.mrf.mxu2 }
 0x4ab   : > { %3741 = vst [vmem:[%s5908_s29 + $0x40] sm:$0xff] %v3709_v12  ;;  %v3089_v37 = vadd.f32 %v3088_v2, %v6771_v11  ;;  %v3177_v44 = vpop.f32.mrf.mxu3 }
 0x4ac   : > { %v3493_v3 = vpop.f32.mrf.mxu0 }
 0x4ad   : > { %v3178_v53 = vadd.f32 %v3177_v44, %v3089_v37  ;;  %v3657_v56 = vadd.f32 %v3493_v3, %v6796_v35  ;;  %v7287_v35 = vld [vmem:[#allocation35_spill] sm:$0xff] }
 0x4ae   : > { %v3582_v28 = vpop.f32.mrf.mxu1 }
 0x4af   : > { %v3656_v18 = vadd.f32 %v3579_v14, %v3178_v53  ;;  %3130 = vmatmul.bf16.gmra.mxu2 %v6782_v25  ;;  %3532 = vmatmul.bf16.gmra.mxu0 %v5335_v39  ;;  %v7289_v53 = vld [vmem:[#allocation37_spill] sm:$0xff] }
 0x4b0   : > { %3219 = vmatmul.bf16.gmra.mxu3 %v6784_v23 }
 0x4b1   : > { %3621 = vmatmul.bf16.gmra.mxu1 %v5335_v39  ;;  %v3710_v8 = vpack.c.bf16 %v3656_v18, %v3655_v1 }
 0x4b2   : > { %v3091_v5 = vpop.f32.mrf.mxu2 }
 0x4b3   : > { %3742 = vst [vmem:[%s5908_s29 + $0x48] sm:$0xff] %v3710_v8  ;;  %v3092_v11 = vadd.f32 %v3091_v5, %v6789_v49  ;;  %v3180_v54 = vpop.f32.mrf.mxu3 }
 0x4b4   : > { %v3495_v43 = vpop.f32.mrf.mxu0 }
 0x4b5   : > { %v3181_v41 = vadd.f32 %v3180_v54, %v3092_v11  ;;  %v3659_v49 = vadd.f32 %v3495_v43, %v6810_v52 }
 0x4b6   : > { %v3584_v33 = vpop.f32.mrf.mxu1 }
 0x4b7   : > { %v3658_v51 = vadd.f32 %v3582_v28, %v3181_v41 }
 0x4b9   : > { %v3711_v13 = vpack.c.bf16 %v3658_v51, %v3657_v56 }
 0x4ba   : > { %v3093_v4 = vpop.f32.mrf.mxu2 }
 0x4bb   : > { %3743 = vst [vmem:[%s5908_s29 + $0x50] sm:$0xff] %v3711_v13  ;;  %v3094_v25 = vadd.f32 %v3093_v4, %v6799_v61  ;;  %v3182_v23 = vpop.f32.mrf.mxu3 }
 0x4bc   : > { %v3498_v21 = vpop.f32.mrf.mxu0 }
 0x4bd   : > { %v3183_v24 = vadd.f32 %v3182_v23, %v3094_v25  ;;  %v3661_v48 = vadd.f32 %v3498_v21, %v6820_v62 }
 0x4be   : > { %v3587_v7 = vpop.f32.mrf.mxu1 }
 0x4bf   : > { %v3660_v6 = vadd.f32 %v3584_v33, %v3183_v24  ;;  %3135 = vmatmul.bf16.gmra.mxu2 %v6806_v19  ;;  %3537 = vmatmul.bf16.gmra.mxu0 %v5336_v15 }
 0x4c0   : > { %3224 = vmatmul.bf16.gmra.mxu3 %v7287_v35 }
 0x4c1   : > { %3626 = vmatmul.bf16.gmra.mxu1 %v5336_v15  ;;  %v3712_v17 = vpack.c.bf16 %v3660_v6, %v3659_v49 }
 0x4c2   : > { %v3096_v32 = vpop.f32.mrf.mxu2 }
 0x4c3   : > { %3744 = vst [vmem:[%s5908_s29 + $0x58] sm:$0xff] %v3712_v17  ;;  %v3097_v61 = vadd.f32 %v3096_v32, %v7288_v40  ;;  %v3185_v59 = vpop.f32.mrf.mxu3 }
 0x4c4   : > { %v3500_v47 = vpop.f32.mrf.mxu0 }
 0x4c5   : > { %v3186_v9 = vadd.f32 %v3185_v59, %v3097_v61  ;;  %v3663_v44 = vadd.f32 %v3500_v47, %v6834_v16 }
 0x4c6   : > { %v3589_v31 = vpop.f32.mrf.mxu1 }
 0x4c7   : > { %v3662_v52 = vadd.f32 %v3587_v7, %v3186_v9 }
 0x4c9   : > { %v3713_v27 = vpack.c.bf16 %v3662_v52, %v3661_v48 }
 0x4ca   : > { %v3098_v14 = vpop.f32.mrf.mxu2 }
 0x4cb   : > { %3745 = vst [vmem:[%s5908_s29 + $0x60] sm:$0xff] %v3713_v27  ;;  %v3099_v19 = vadd.f32 %v3098_v14, %v6823_v42  ;;  %v3187_v50 = vpop.f32.mrf.mxu3 }
 0x4cc   : > { %v3503_v12 = vpop.f32.mrf.mxu0 }
 0x4cd   : > { %v3188_v2 = vadd.f32 %v3187_v50, %v3099_v19  ;;  %v3665_v16 = vadd.f32 %v3503_v12, %v6844_v10 }
 0x4ce   : > { %v3592_v37 = vpop.f32.mrf.mxu1 }
 0x4cf   : > { %v3664_v39 = vadd.f32 %v3589_v31, %v3188_v2  ;;  %3140 = vmatmul.bf16.gmra.mxu2 %v6830_v22  ;;  %3542 = vmatmul.bf16.gmra.mxu0 %v5337_v36 }
 0x4d0   : > { %3229 = vmatmul.bf16.gmra.mxu3 %v6832_v46 }
 0x4d1   : > { %3631 = vmatmul.bf16.gmra.mxu1 %v5337_v36  ;;  %v3714_v62 = vpack.c.bf16 %v3664_v39, %v3663_v44 }
 0x4d2   : > { %v3101_v3 = vpop.f32.mrf.mxu2 }
 0x4d3   : > { %3746 = vst [vmem:[%s5908_s29 + $0x68] sm:$0xff] %v3714_v62  ;;  %v3102_v42 = vadd.f32 %v3101_v3, %v7289_v53  ;;  %v3190_v28 = vpop.f32.mrf.mxu3 }
 0x4d4   : > { %v3505_v1 = vpop.f32.mrf.mxu0 }
 0x4d5   : > { %v3191_v18 = vadd.f32 %v3190_v28, %v3102_v42  ;;  %v3667_v56 = vadd.f32 %v3505_v1, %v6850_v57  ;;  %v7290_v42 = vld [vmem:[#allocation38_spill] sm:$0xff] }
 0x4d6   : > { %v3594_v8 = vpop.f32.mrf.mxu1 }
 0x4d7   : > { %v3666_v5 = vadd.f32 %v3592_v37, %v3191_v18 }
 0x4d9   : > { %v3715_v11 = vpack.c.bf16 %v3666_v5, %v3665_v16 }
 0x4da   : > { %v3103_v22 = vpop.f32.mrf.mxu2 }
 0x4db   : > { %3747 = vst [vmem:[%s5908_s29 + $0x70] sm:$0xff] %v3715_v11  ;;  %v3104_v54 = vadd.f32 %v3103_v22, %v6847_v0  ;;  %v3192_v46 = vpop.f32.mrf.mxu3 }
 0x4dc   : > { %v3508_v43 = vpop.f32.mrf.mxu0 }
 0x4dd   : > { %v3193_v41 = vadd.f32 %v3192_v46, %v3104_v54  ;;  %v3669_v0 = vadd.f32 %v3508_v43, %v6858_v55  ;;  %v7292_v54 = vld [vmem:[#allocation40_spill] sm:$0xff] }
 0x4de   : > { %v3597_v33 = vpop.f32.mrf.mxu1 }
 0x4df   : > { %v3668_v51 = vadd.f32 %v3594_v8, %v3193_v41  ;;  %v7291_v8 = vld [vmem:[#allocation39_spill] sm:$0xff] }
 0x4e1   : > { %v3716_v13 = vpack.c.bf16 %v3668_v51, %v3667_v56 }
 0x4e2   : > { %v3106_v4 = vpop.f32.mrf.mxu2 }
 0x4e3   : > { %3748 = vst [vmem:[%s5908_s29 + $0x78] sm:$0xff] %v3716_v13  ;;  %v3107_v25 = vadd.f32 %v3106_v4, %v6853_v63  ;;  %v3195_v10 = vpop.f32.mrf.mxu3 }
 0x4e4   : > { %v3510_v23 = vpop.f32.mrf.mxu0 }
 0x4e5   : > { %v3196_v15 = vadd.f32 %v3195_v10, %v3107_v25  ;;  %v3671_v63 = vadd.f32 %v3510_v23, %v6864_v20  ;;  %v7294_v10 = vld [vmem:[#allocation7_spill] sm:$0xff] }
 0x4e6   : > { %v3599_v21 = vpop.f32.mrf.mxu1 }
 0x4e7   : > { %v3670_v24 = vadd.f32 %v3597_v33, %v3196_v15  ;;  %v7293_v33 = vld [vmem:[#allocation41_spill] sm:$0xff] }
 0x4e9   : > { %v3717_v7 = vpack.c.bf16 %v3670_v24, %v3669_v0  ;;  %v7295_v24 = vld [vmem:[#allocation8_spill] sm:$0xff] }
 0x4ea   : > { %v3108_v49 = vpop.f32.mrf.mxu2 }
 0x4eb   : > { %3749 = vst [vmem:[%s5908_s29 + $0x80] sm:$0xff] %v3717_v7  ;;  %v3109_v6 = vadd.f32 %v3108_v49, %v6861_v45  ;;  %v3197_v57 = vpop.f32.mrf.mxu3 }
 0x4ec   : > { %v3513_v35 = vpop.f32.mrf.mxu0 }
 0x4ed   : > { %v3198_v17 = vadd.f32 %v3197_v57, %v3109_v6  ;;  %v3673_v45 = vadd.f32 %v3513_v35, %v6872_v29 }
 0x4ee   : > { %v3602_v32 = vpop.f32.mrf.mxu1 }
 0x4ef   : > { %v3672_v40 = vadd.f32 %v3599_v21, %v3198_v17  ;;  %v7296_v17 = vld [vmem:[#allocation9_spill] sm:$0xff] }
 0x4f1   : > { %v3718_v61 = vpack.c.bf16 %v3672_v40, %v3671_v63 }
 0x4f2   : > { %v3111_v59 = vpop.f32.mrf.mxu2 }
 0x4f3   : > { %3750 = vst [vmem:[%s5908_s29 + $0x88] sm:$0xff] %v3718_v61  ;;  %v3112_v47 = vadd.f32 %v3111_v59, %v6867_v26  ;;  %v3200_v55 = vpop.f32.mrf.mxu3  ;;  %v7297_v59 = vld [vmem:[#allocation12_spill] sm:$0xff] }
 0x4f4   : > { %v3515_v9 = vpop.f32.mrf.mxu0 }
 0x4f5   : > { %v3201_v31 = vadd.f32 %v3200_v55, %v3112_v47  ;;  %v3675_v26 = vadd.f32 %v3515_v9, %v6878_v38 }
 0x4f6   : > { %v3604_v48 = vpop.f32.mrf.mxu1 }
 0x4f7   : > { %v3674_v52 = vadd.f32 %v3602_v32, %v3201_v31 }
 0x4f9   : > { %v3719_v27 = vpack.c.bf16 %v3674_v52, %v3673_v45  ;;  %v7298_v45 = vld [vmem:[#allocation10_spill] sm:$0xff] }
 0x4fa   : > { %v3113_v14 = vpop.f32.mrf.mxu2 }
 0x4fb   : > { %3751 = vst [vmem:[%s5908_s29 + $0x90] sm:$0xff] %v3719_v27  ;;  %v3114_v19 = vadd.f32 %v3113_v14, %v6875_v34  ;;  %v3202_v20 = vpop.f32.mrf.mxu3 }
 0x4fc   : > { %v3518_v50 = vpop.f32.mrf.mxu0 }
 0x4fd   : > { %v3203_v36 = vadd.f32 %v3202_v20, %v3114_v19  ;;  %v3677_v34 = vadd.f32 %v3518_v50, %v7290_v42  ;;  %v7299_v20 = vld [vmem:[#allocation11_spill] sm:$0xff] }
 0x4fe   : > { %v3607_v12 = vpop.f32.mrf.mxu1 }
 0x4ff   : > { %v3676_v2 = vadd.f32 %v3604_v48, %v3203_v36 }
 0x501   : > { %v3720_v37 = vpack.c.bf16 %v3676_v2, %v3675_v26 }
 0x502   : > { %v3116_v44 = vpop.f32.mrf.mxu2 }
 0x503   : > { %3752 = vst [vmem:[%s5908_s29 + $0x98] sm:$0xff] %v3720_v37  ;;  %v3117_v39 = vadd.f32 %v3116_v44, %v6881_v58  ;;  %v3205_v29 = vpop.f32.mrf.mxu3  ;;  %v7300_v37 = vld [vmem:[#allocation13_spill] sm:$0xff] }
 0x504   : > { %v3520_v62 = vpop.f32.mrf.mxu0 }
 0x505   : > { %v3206_v3 = vadd.f32 %v3205_v29, %v3117_v39  ;;  %v3679_v58 = vadd.f32 %v3520_v62, %v7292_v54 }
 0x506   : > { %v3609_v53 = vpop.f32.mrf.mxu1 }
 0x507   : > { %v3678_v28 = vadd.f32 %v3607_v12, %v3206_v3  ;;  %v7301_v3 = vld [vmem:[#allocation16_spill] sm:$0xff] }
 0x509   : > { %v3721_v1 = vpack.c.bf16 %v3678_v28, %v3677_v34 }
 0x50a   : > { %v3118_v18 = vpop.f32.mrf.mxu2 }
 0x50b   : > { %3753 = vst [vmem:[%s5908_s29 + $0xa0] sm:$0xff] %v3721_v1  ;;  %v3119_v16 = vadd.f32 %v3118_v18, %v7291_v8  ;;  %v3207_v38 = vpop.f32.mrf.mxu3 }
 0x50c   : > { %v3523_v5 = vpop.f32.mrf.mxu0 }
 0x50d   : > { %v3208_v11 = vadd.f32 %v3207_v38, %v3119_v16  ;;  %v3681_v23 = vadd.f32 %v3523_v5, %v7294_v10  ;;  %v7302_v5 = vld [vmem:[#allocation14_spill] sm:$0xff] }
 0x50e   : > { %v3612_v22 = vpop.f32.mrf.mxu1 }
 0x50f   : > { %v3680_v46 = vadd.f32 %v3609_v53, %v3208_v11 }
 0x511   : > { %v3722_v43 = vpack.c.bf16 %v3680_v46, %v3679_v58  ;;  %v7303_v46 = vld [vmem:[#allocation15_spill] sm:$0xff] }
 0x512   : > { %v3121_v41 = vpop.f32.mrf.mxu2 }
 0x513   : > { %3754 = vst [vmem:[%s5908_s29 + $0xa8] sm:$0xff] %v3722_v43  ;;  %v3122_v56 = vadd.f32 %v3121_v41, %v7293_v33  ;;  %v3210_v51 = vpop.f32.mrf.mxu3 }
 0x514   : > { %v3525_v13 = vpop.f32.mrf.mxu0 }
 0x515   : > { %v3211_v4 = vadd.f32 %v3210_v51, %v3122_v56  ;;  %v3683_v32 = vadd.f32 %v3525_v13, %v7296_v17  ;;  %v7304_v13 = vld [vmem:[#allocation17_spill] sm:$0xff] }
 0x516   : > { %v3614_v25 = vpop.f32.mrf.mxu1 }
 0x517   : > { %v3682_v15 = vadd.f32 %v3612_v22, %v3211_v4 }
 0x519   : > { %v3723_v21 = vpack.c.bf16 %v3682_v15, %v3681_v23 }
 0x51a   : > { %v3123_v0 = vpop.f32.mrf.mxu2 }
 0x51b   : > { %3755 = vst [vmem:[%s5908_s29 + $0xb0] sm:$0xff] %v3723_v21  ;;  %v3124_v7 = vadd.f32 %v3123_v0, %v7295_v24  ;;  %v3212_v49 = vpop.f32.mrf.mxu3 }
 0x51c   : > { %v3528_v6 = vpop.f32.mrf.mxu0 }
 0x51d   : > { %v3213_v57 = vadd.f32 %v3212_v49, %v3124_v7  ;;  %v3685_v52 = vadd.f32 %v3528_v6, %v7298_v45  ;;  %v7305_v7 = vld [vmem:[#allocation20_spill] sm:$0xff] }
 0x51e   : > { %v3617_v35 = vpop.f32.mrf.mxu1 }
 0x51f   : > { %v3684_v63 = vadd.f32 %v3614_v25, %v3213_v57 }
 0x521   : > { %v3724_v40 = vpack.c.bf16 %v3684_v63, %v3683_v32 }
 0x522   : > { %v3126_v61 = vpop.f32.mrf.mxu2 }
 0x523   : > { %3756 = vst [vmem:[%s5908_s29 + $0xb8] sm:$0xff] %v3724_v40  ;;  %v3127_v47 = vadd.f32 %v3126_v61, %v7297_v59  ;;  %v3215_v55 = vpop.f32.mrf.mxu3  ;;  %v7307_v59 = vld [vmem:[#allocation19_spill] sm:$0xff] }
 0x524   : > { %v3530_v9 = vpop.f32.mrf.mxu0 }
 0x525   : > { %v3216_v31 = vadd.f32 %v3215_v55, %v3127_v47  ;;  %v3687_v44 = vadd.f32 %v3530_v9, %v7300_v37 }
 0x526   : > { %v3619_v48 = vpop.f32.mrf.mxu1 }
 0x527   : > { %v3686_v27 = vadd.f32 %v3617_v35, %v3216_v31  ;;  %v7306_v35 = vld [vmem:[#allocation18_spill] sm:$0xff]  ;;  %v7308_v31 = vld [vmem:[#allocation21_spill] sm:$0xff] }
 0x529   : > { %v3725_v14 = vpack.c.bf16 %v3686_v27, %v3685_v52 }
 0x52a   : > { %v3128_v19 = vpop.f32.mrf.mxu2 }
 0x52b   : > { %3757 = vst [vmem:[%s5908_s29 + $0xc0] sm:$0xff] %v3725_v14  ;;  %v3129_v50 = vadd.f32 %v3128_v19, %v7299_v20  ;;  %v3217_v36 = vpop.f32.mrf.mxu3  ;;  %v7309_v14 = vld [vmem:[#allocation22_spill] sm:$0xff] }
 0x52c   : > { %v3533_v12 = vpop.f32.mrf.mxu0 }
 0x52d   : > { %v3218_v26 = vadd.f32 %v3217_v36, %v3129_v50  ;;  %v3689_v18 = vadd.f32 %v3533_v12, %v6928_v30 }
 0x52e   : > { %v3622_v2 = vpop.f32.mrf.mxu1 }
 0x52f   : > { %v3688_v39 = vadd.f32 %v3619_v48, %v3218_v26  ;;  %v7310_v26 = vld [vmem:[#allocation25_spill] sm:$0xff] }
 0x531   : > { %v3726_v29 = vpack.c.bf16 %v3688_v39, %v3687_v44  ;;  %v3868_v39 = vld [vmem:[%s5908_s29] sm:$0xff] (%p5711_p9) }
 0x532   : > { %v3131_v62 = vpop.f32.mrf.mxu2  ;;  %3869 = vst [vmem:[%s7085_s12] sm:$0xff] (%p5711_p9), %v3868_v39 }
 0x533   : > { %3758 = vst [vmem:[%s5908_s29 + $0xc8] sm:$0xff] %v3726_v29  ;;  %v3132_v53 = vadd.f32 %v3131_v62, %v7301_v3  ;;  %v3220_v42 = vpop.f32.mrf.mxu3  ;;  %v3870_v29 = vld [vmem:[%s5908_s29 + $0x8] sm:$0xff] (%p5711_p9)  ;;  %v3872_v62 = vld [vmem:[%s5908_s29 + $0x10] sm:$0xff] (%p5711_p9)  ;;  %v3874_v3 = vld [vmem:[%s5908_s29 + $0x18] sm:$0xff] (%p5711_p9) }
 0x534   : > { %v3535_v34 = vpop.f32.mrf.mxu0  ;;  %3871 = vst [vmem:[%s7085_s12 + $0x10] sm:$0xff] (%p5711_p9), %v3870_v29 }
 0x535   : > { %v3221_v28 = vadd.f32 %v3220_v42, %v3132_v53  ;;  %v3691_v43 = vadd.f32 %v3535_v34, %v7303_v46  ;;  %v3876_v53 = vld [vmem:[%s5908_s29 + $0x20] sm:$0xff] (%p5711_p9)  ;;  %3873 = vst [vmem:[%s7085_s12 + $0x20] sm:$0xff] (%p5711_p9), %v3872_v62  ;;  %v3878_v42 = vld [vmem:[%s5908_s29 + $0x28] sm:$0xff] (%p5711_p9)  ;;  %v3880_v34 = vld [vmem:[%s5908_s29 + $0x30] sm:$0xff] (%p5711_p9) }
 0x536   : > { %v3624_v1 = vpop.f32.mrf.mxu1  ;;  %3875 = vst [vmem:[%s7085_s12 + $0x30] sm:$0xff] (%p5711_p9), %v3874_v3  ;;  %v3904_v46 = vld [vmem:[%s5908_s29 + $0x90] sm:$0xff] (%p5711_p9) }
 0x537   : > { %v3690_v8 = vadd.f32 %v3622_v2, %v3221_v28  ;;  %3877 = vst [vmem:[%s7085_s12 + $0x40] sm:$0xff] (%p5711_p9), %v3876_v53  ;;  %v3882_v28 = vld [vmem:[%s5908_s29 + $0x38] sm:$0xff] (%p5711_p9) }
 0x538   : > { %3879 = vst [vmem:[%s7085_s12 + $0x50] sm:$0xff] (%p5711_p9), %v3878_v42 }
 0x539   : > { %v3727_v16 = vpack.c.bf16 %v3690_v8, %v3689_v18  ;;  %3881 = vst [vmem:[%s7085_s12 + $0x60] sm:$0xff] (%p5711_p9), %v3880_v34  ;;  %v3886_v18 = vld [vmem:[%s5908_s29 + $0x48] sm:$0xff] (%p5711_p9)  ;;  %v3888_v8 = vld [vmem:[%s5908_s29 + $0x50] sm:$0xff] (%p5711_p9) }
 0x53a   : > { %v3133_v38 = vpop.f32.mrf.mxu2  ;;  %3883 = vst [vmem:[%s7085_s12 + $0x70] sm:$0xff] (%p5711_p9), %v3882_v28 }
 0x53b   : > { %3759 = vst [vmem:[%s5908_s29 + $0xd0] sm:$0xff] %v3727_v16  ;;  %v3134_v11 = vadd.f32 %v3133_v38, %v7302_v5  ;;  %v3222_v22 = vpop.f32.mrf.mxu3  ;;  %v3890_v16 = vld [vmem:[%s5908_s29 + $0x58] sm:$0xff] (%p5711_p9)  ;;  %v3892_v38 = vld [vmem:[%s5908_s29 + $0x60] sm:$0xff] (%p5711_p9)  ;;  %v3894_v5 = vld [vmem:[%s5908_s29 + $0x68] sm:$0xff] (%p5711_p9) }
 0x53c   : > { %v3538_v58 = vpop.f32.mrf.mxu0  ;;  %3887 = vst [vmem:[%s7085_s12 + $0x90] sm:$0xff] (%p5711_p9), %v3886_v18 }
 0x53d   : > { %v3223_v54 = vadd.f32 %v3222_v22, %v3134_v11  ;;  %v3693_v10 = vadd.f32 %v3538_v58, %v6942_v60  ;;  %3889 = vst [vmem:[%s7085_s12 + $0xa0] sm:$0xff] (%p5711_p9), %v3888_v8  ;;  %v3896_v11 = vld [vmem:[%s5908_s29 + $0x70] sm:$0xff] (%p5711_p9)  ;;  %v3898_v22 = vld [vmem:[%s5908_s29 + $0x78] sm:$0xff] (%p5711_p9)  ;;  %v3902_v58 = vld [vmem:[%s5908_s29 + $0x88] sm:$0xff] (%p5711_p9) }
 0x53e   : > { %v3627_v33 = vpop.f32.mrf.mxu1  ;;  %3891 = vst [vmem:[%s7085_s12 + $0xb0] sm:$0xff] (%p5711_p9), %v3890_v16 }
 0x53f   : > { %v3692_v41 = vadd.f32 %v3624_v1, %v3223_v54  ;;  %v3884_v1 = vld [vmem:[%s5908_s29 + $0x40] sm:$0xff] (%p5711_p9)  ;;  %3893 = vst [vmem:[%s7085_s12 + $0xc0] sm:$0xff] (%p5711_p9), %v3892_v38 }
 0x540   : > { %3885 = vst [vmem:[%s7085_s12 + $0x80] sm:$0xff] (%p5711_p9), %v3884_v1  ;;  %v3900_v54 = vld [vmem:[%s5908_s29 + $0x80] sm:$0xff] (%p5711_p9) }
 0x541   : > { %v3728_v56 = vpack.c.bf16 %v3692_v41, %v3691_v43  ;;  %3895 = vst [vmem:[%s7085_s12 + $0xd0] sm:$0xff] (%p5711_p9), %v3894_v5  ;;  %v3906_v43 = vld [vmem:[%s5908_s29 + $0x98] sm:$0xff] (%p5711_p9)  ;;  %v3908_v41 = vld [vmem:[%s5908_s29 + $0xa0] sm:$0xff] (%p5711_p9) }
 0x542   : > { %v3136_v51 = vpop.f32.mrf.mxu2  ;;  %3897 = vst [vmem:[%s7085_s12 + $0xe0] sm:$0xff] (%p5711_p9), %v3896_v11 }
 0x543   : > { %3760 = vst [vmem:[%s5908_s29 + $0xd8] sm:$0xff] %v3728_v56  ;;  %v3137_v4 = vadd.f32 %v3136_v51, %v7304_v13  ;;  %v3225_v30 = vpop.f32.mrf.mxu3  ;;  %v3912_v56 = vld [vmem:[%s5908_s29 + $0xb0] sm:$0xff] (%p5711_p9)  ;;  %v3914_v51 = vld [vmem:[%s5908_s29 + $0xb8] sm:$0xff] (%p5711_p9)  ;;  %v3916_v13 = vld [vmem:[%s5908_s29 + $0xc0] sm:$0xff] (%p5711_p9) }
 0x544   : > { %v3540_v15 = vpop.f32.mrf.mxu0  ;;  %3899 = vst [vmem:[%s7085_s12 + $0xf0] sm:$0xff] (%p5711_p9), %v3898_v22 }
 0x545   : > { %v3226_v25 = vadd.f32 %v3225_v30, %v3137_v4  ;;  %v3695_v17 = vadd.f32 %v3540_v15, %v7306_v35  ;;  %3901 = vst [vmem:[%s7085_s12 + $0x100] sm:$0xff] (%p5711_p9), %v3900_v54  ;;  %v3918_v4 = vld [vmem:[%s5908_s29 + $0xc8] sm:$0xff] (%p5711_p9)  ;;  %v3920_v30 = vld [vmem:[%s5908_s29 + $0xd0] sm:$0xff] (%p5711_p9) }
 0x546   : > { %v3629_v0 = vpop.f32.mrf.mxu1  ;;  %3903 = vst [vmem:[%s7085_s12 + $0x110] sm:$0xff] (%p5711_p9), %v3902_v58 }
 0x547   : > { %v3694_v23 = vadd.f32 %v3627_v33, %v3226_v25  ;;  %3905 = vst [vmem:[%s7085_s12 + $0x120] sm:$0xff] (%p5711_p9), %v3904_v46  ;;  %v3910_v33 = vld [vmem:[%s5908_s29 + $0xa8] sm:$0xff] (%p5711_p9) }
 0x548   : > { %3907 = vst [vmem:[%s7085_s12 + $0x130] sm:$0xff] (%p5711_p9), %v3906_v43 }
 0x549   : > { %v3729_v21 = vpack.c.bf16 %v3694_v23, %v3693_v10  ;;  %3909 = vst [vmem:[%s7085_s12 + $0x140] sm:$0xff] (%p5711_p9), %v3908_v41 }
 0x54a   : > { %v3138_v24 = vpop.f32.mrf.mxu2  ;;  %3911 = vst [vmem:[%s7085_s12 + $0x150] sm:$0xff] (%p5711_p9), %v3910_v33  ;;  %v3922_v25 = vld [vmem:[%s5908_s29 + $0xd8] sm:$0xff] (%p5711_p9) }
 0x54b   : > { %3761 = vst [vmem:[%s5908_s29 + $0xe0] sm:$0xff] %v3729_v21  ;;  %v3139_v49 = vadd.f32 %v3138_v24, %v7305_v7  ;;  %v3227_v6 = vpop.f32.mrf.mxu3 }
 0x54c   : > { %v3543_v40 = vpop.f32.mrf.mxu0  ;;  %3913 = vst [vmem:[%s7085_s12 + $0x160] sm:$0xff] (%p5711_p9), %v3912_v56 }
 0x54d   : > { %v3228_v57 = vadd.f32 %v3227_v6, %v3139_v49  ;;  %v3697_v48 = vadd.f32 %v3543_v40, %v7308_v31  ;;  %3915 = vst [vmem:[%s7085_s12 + $0x170] sm:$0xff] (%p5711_p9), %v3914_v51 }
 0x54e   : > { %v3632_v55 = vpop.f32.mrf.mxu1  ;;  %3917 = vst [vmem:[%s7085_s12 + $0x180] sm:$0xff] (%p5711_p9), %v3916_v13 }
 0x54f   : > { %v3696_v32 = vadd.f32 %v3629_v0, %v3228_v57  ;;  %3919 = vst [vmem:[%s7085_s12 + $0x190] sm:$0xff] (%p5711_p9), %v3918_v4 }
 0x550   : > { %3921 = vst [vmem:[%s7085_s12 + $0x1a0] sm:$0xff] (%p5711_p9), %v3920_v30 }
 0x551   : > { %v3730_v63 = vpack.c.bf16 %v3696_v32, %v3695_v17  ;;  %3923 = vst [vmem:[%s7085_s12 + $0x1b0] sm:$0xff] (%p5711_p9), %v3922_v25 }
 0x552   : > { %v3141_v61 = vpop.f32.mrf.mxu2  ;;  %v3924_v10 = vld [vmem:[%s5908_s29 + $0xe0] sm:$0xff] (%p5711_p9) }
 0x553   : > { %3762 = vst [vmem:[%s5908_s29 + $0xe8] sm:$0xff] %v3730_v63  ;;  %v3142_v60 = vadd.f32 %v3141_v61, %v7307_v59  ;;  %v3230_v47 = vpop.f32.mrf.mxu3 }
 0x554   : > { %v3545_v20 = vpop.f32.mrf.mxu0  ;;  %3925 = vst [vmem:[%s7085_s12 + $0x1c0] sm:$0xff] (%p5711_p9), %v3924_v10 }
 0x555   : > { %v3231_v9 = vadd.f32 %v3230_v47, %v3142_v60  ;;  %v3699_v2 = vadd.f32 %v3545_v20, %v7310_v26 }
 0x556   : > { %v3634_v12 = vpop.f32.mrf.mxu1 }
 0x557   : > { %v3698_v45 = vadd.f32 %v3632_v55, %v3231_v9 }
 0x559   : > { %v3731_v52 = vpack.c.bf16 %v3698_v45, %v3697_v48 }
 0x55a   : > { %v3143_v27 = vpop.f32.mrf.mxu2  ;;  %v3926_v23 = vld [vmem:[%s5908_s29 + $0xe8] sm:$0xff] (%p5711_p9) }
 0x55b   : > { %3763 = vst [vmem:[%s5908_s29 + $0xf0] sm:$0xff] %v3731_v52  ;;  %v3144_v19 = vadd.f32 %v3143_v27, %v7309_v14  ;;  %v3232_v50 = vpop.f32.mrf.mxu3 }
 0x55c   : > { %3927 = vst [vmem:[%s7085_s12 + $0x1d0] sm:$0xff] (%p5711_p9), %v3926_v23 }
 0x55d   : > { %v3233_v36 = vadd.f32 %v3232_v50, %v3144_v19 }
 0x55f   : > { %v3700_v37 = vadd.f32 %v3634_v12, %v3233_v36  ;;  %3771 = sbr.rel (!%p5711_p9) target bundleno = 1388 (0x56c), region = 124 }
 0x561   : > { %v3732_v44 = vpack.c.bf16 %v3700_v37, %v3699_v2 }
 0x562   : > { %v3928_v15 = vld [vmem:[%s5908_s29 + $0xf0] sm:$0xff] (%p5711_p9) }
 0x563   : > { %3764 = vst [vmem:[%s5908_s29 + $0xf8] sm:$0xff] %v3732_v44 }
 0x564   : > { %3929 = vst [vmem:[%s7085_s12 + $0x1e0] sm:$0xff] %v3928_v15 }
 0x56a   : > { %v3930_v21 = vld [vmem:[%s5908_s29 + $0xf8] sm:$0xff] }
 0x56b   : > { %3931 = vst [vmem:[%s7085_s12 + $0x1f0] sm:$0xff] %v3930_v21 }
 0x56c PF: > { %s15_s26 = sadd.s32 1, %s5608_s26   ;;  %s7311_s11 = sld [smem:[#allocation6_spill]] }
 0x56d   : > { %p12_p3 = scmp.ge.s32.totalorder %s15_s26, 6   ;;  %s7312_s18 = smov %s5580_s19 }
 0x56e   : > { %s7313_s19 = smov %s5716_s13  ;;  %s7314_s20 = smov %s5588_s21 }
 0x56f   : > { %s7315_s21 = smov %s5705_s9  ;;  %s7316_s22 = smov %s5600_s24 }
 0x570   : > { %s7317_s23 = smov %s5604_s25  ;;  %s7318_s24 = smov %s7321_s28 }
 0x571   :  { %14 = sbr.rel (!%p12_p3) target bundleno = 9 (0x9), region = 207 }
 0x572   : > { %s7319_s25 = smov %s7311_s11 }

</bundles_post_ra>
